<compile_context>
chip_gen: v7x
topology: tpu7x:2x2x1
jax: 0.10.0
libtpu: 0.0.40
codegen_flags: <defaults>
</compile_context>

<pallas_src>
import functools
import math

import jax
import jax.numpy as jnp
from jax.experimental import pallas as pl
from jax.experimental.pallas import tpu as pltpu


# ----------------------- fused LSTM (2 layers) + MLP kernel ------------------
def _lstm_mlp_kernel(x_ref, wih0_ref, b0_ref, wstk_ref, b1_ref,
                     wfc1_ref, bfc1_ref, wfc2_ref, bfc2_ref,
                     out_ref, g0_s, hseq_s, hflat_s, *, T):
    L = x_ref.shape[0]
    H = wstk_ref.shape[0] // 2

    # Prologue: layer-0 input projection for ALL steps in one MXU matmul,
    # parked in a VMEM scratch (cheap row loads in the loop, no vreg live range).
    g0_s[...] = (jnp.dot(x_ref[...], wih0_ref[...],
                         preferred_element_type=jnp.float32) + b0_ref[...])

    # Hoist loop-invariant loads.
    wstk = wstk_ref[...]          # (2H, 8H) = [[whh0, wih1], [0, whh1]]
    b1 = b1_ref[...]              # (1, 4H)

    def gates(g):                 # PyTorch gate order: i, f, g, o
        sg = jax.nn.sigmoid(g)    # ONE EUP call over the whole (1, 4H) row
        th = jnp.tanh(g)          # ONE EUP call over the whole (1, 4H) row
        return (sg[:, 0:H], sg[:, H:2 * H],
                th[:, 2 * H:3 * H], sg[:, 3 * H:4 * H])

    z = jnp.zeros((1, H), jnp.float32)
    c0, h1, c1 = z, z, z
    rec0 = jnp.zeros((1, 4 * H), jnp.float32)    # h0_{-1} @ whh0 == 0

    # TODO(synk): nn.LSTM inter-layer dropout (p=0.2) is train-mode only;
    # eval-mode (no-op) semantics are implemented here.
    for s in range(L):  # L static & small -> fully unrolled straight-line code
        # ---- layer 0, step s (recurrent term comes from last step's fused matmul)
        g0 = g0_s[s:s + 1, :] + rec0
        i0, f0, gg0, o0 = gates(g0)
        c0 = f0 * c0 + i0 * gg0
        h0 = o0 * jnp.tanh(c0)

        # ---- ONE fused recurrent matmul per step ----------------------------
        #   [h0_s | h1_{s-1}] @ W = [h0_s@whh0 | h0_s@wih1 + h1_{s-1}@whh1]
        # left 4H lanes  -> layer-0 recurrent gate term for step s+1
        # right 4H lanes -> layer-1 gate input for step s
        fused = jnp.dot(jnp.concatenate([h0, h1], axis=1), wstk,
                        preferred_element_type=jnp.float32)      # (1, 8H)
        rec0 = fused[:, 0:4 * H]

        # ---- layer 1, step s -------------------------------------------------
        g1 = fused[:, 4 * H:8 * H] + b1
        i1, f1, gg1, o1 = gates(g1)
        c1 = f1 * c1 + i1 * gg1
        h1 = o1 * jnp.tanh(c1)

        hseq_s[s:s + 1, :] = h1          # lane-offset-0 store (cheap)

    # ---- epilogue (off the serial recurrence chain) --------------------------
    # hflat[b, t*H:(t+1)*H] = h1_{b*T + t}   (== x_.reshape(B, -1))
    for s in range(L):
        b, t = divmod(s, T)
        hflat_s[b:b + 1, t * H:(t + 1) * H] = hseq_s[s:s + 1, :]

    hflat = hflat_s[...]                                          # (B, T*H)
    y1 = (jnp.dot(hflat, wfc1_ref[...], preferred_element_type=jnp.float32)
          + bfc1_ref[...])
    y2 = (jnp.dot(y1, wfc2_ref[...], preferred_element_type=jnp.float32)
          + bfc2_ref[...])
    out_ref[...] = y2.astype(out_ref.dtype)


def lstm_mlp_forward(xs, wih0, b0, wstk, b1, wfc1, bfc1, wfc2, bfc2, *, T):
    L, _ = xs.shape
    H = wstk.shape[0] // 2
    B = L // T
    O = wfc2.shape[1]
    args = (xs, wih0, b0, wstk, b1, wfc1, bfc1, wfc2, bfc2)
    vmem = pltpu.MemorySpace.VMEM
    return pl.pallas_call(
        functools.partial(_lstm_mlp_kernel, T=T),
        out_shape=jax.ShapeDtypeStruct((B, O), jnp.float32),
        # No grid: ~40 KB of operands, so skip the pipeline machinery entirely
        # and keep every operand whole-array resident in VMEM.
        in_specs=[pl.BlockSpec(memory_space=vmem) for _ in args],
        out_specs=pl.BlockSpec(memory_space=vmem),
        scratch_shapes=[
            pltpu.VMEM((L, 4 * H), jnp.float32),   # precomputed layer-0 input proj
            pltpu.VMEM((L, H), jnp.float32),       # h1 sequence (lane offset 0)
            pltpu.VMEM((B, T * H), jnp.float32),   # fc1 input layout (epilogue)
        ],
    )(*args)


# ------------------------------ full forward ---------------------------------
@functools.partial(jax.jit, static_argnames=("output_window", "num_labels"))
def lstm_model_forward(x, params, *, output_window, num_labels):
    B, T, D = x.shape
    # PyTorch: x[0].reshape(-1, D) -> single unbatched sequence of length B*T.
    xs = x.reshape(B * T, D)
    # Stacked recurrent weight: one (2H, 8H) matmul per step replaces both the
    # layer-0 hidden projection (for step s+1) and the layer-1 gate projection
    # (for step s).
    wstk = jnp.concatenate([
        jnp.concatenate([params["whh0"], params["wih1"]], axis=1),
        jnp.concatenate([jnp.zeros_like(params["whh1"]), params["whh1"]], axis=1),
    ], axis=0)                                           # (2H, 8H)
    y = lstm_mlp_forward(xs,
                         params["wih0"], params["b0"], wstk, params["b1"],
                         params["w_fc1"], params["b_fc1"],
                         params["w_fc2"], params["b_fc2"], T=T)
    return y.reshape(B, output_window, num_labels)


# --------------------------- deterministic params ----------------------------
def init_params(key, num_features, time_window, output_window, num_labels, hidden_size):
    D, H, T = num_features, hidden_size, time_window
    ks = jax.random.split(key, 12)

    def u(k, shape, bound):
        return jax.random.uniform(k, shape, jnp.float32, -bound, bound)

    k_lstm = 1.0 / math.sqrt(H)
    k_fc1 = 1.0 / math.sqrt(H * T)
    k_fc2 = 1.0 / math.sqrt(D * T)
    return dict(
        # LSTM weights stored transposed: (in_features, 4H); gate order i,f,g,o.
        wih0=u(ks[0], (D, 4 * H), k_lstm),
        whh0=u(ks[1], (H, 4 * H), k_lstm),
        b0=u(ks[2], (1, 4 * H), k_lstm) + u(ks[3], (1, 4 * H), k_lstm),   # b_ih_l0 + b_hh_l0
        wih1=u(ks[4], (H, 4 * H), k_lstm),
        whh1=u(ks[5], (H, 4 * H), k_lstm),
        b1=u(ks[6], (1, 4 * H), k_lstm) + u(ks[7], (1, 4 * H), k_lstm),   # b_ih_l1 + b_hh_l1
        # Linear weights stored transposed: (in_features, out_features).
        w_fc1=u(ks[8], (H * T, D * T), k_fc1),
        b_fc1=u(ks[9], (1, D * T), k_fc1),
        w_fc2=u(ks[10], (D * T, num_labels * output_window), k_fc2),
        b_fc2=u(ks[11], (1, num_labels * output_window), k_fc2),
    )


if __name__ == "__main__":
    # Shapes consistent with LSTMModel(num_tasks=1, num_features=4,
    # time_window=8, output_window=2, num_labels=3, hidden_size=16).
    B, T, D = 2, 8, 4
    output_window, num_labels, hidden = 2, 3, 16

    key = jax.random.PRNGKey(0)
    kx, kp = jax.random.split(key)
    x = jax.random.normal(kx, (B, T, D), jnp.float32)   # forward input x[0]
    params = init_params(kp, D, T, output_window, num_labels, hidden)

    out = lstm_model_forward(x, params, output_window=output_window, num_labels=num_labels)
    out = jax.block_until_ready(out)
    assert out.shape == (B, output_window, num_labels), out.shape
    assert bool(jnp.all(jnp.isfinite(out)))
    print("KERNEL_OK")
</pallas_src>

<mosaic_0001>
module attributes {stable_mosaic.version = 11 : i64} {
  func.func @_lstm_mlp_kernel(%arg0: memref<16x4xf32, #tpu.memory_space<vmem>>, %arg1: memref<4x64xf32, #tpu.memory_space<vmem>>, %arg2: memref<1x64xf32, #tpu.memory_space<vmem>>, %arg3: memref<32x128xf32, #tpu.memory_space<vmem>>, %arg4: memref<1x64xf32, #tpu.memory_space<vmem>>, %arg5: memref<128x32xf32, #tpu.memory_space<vmem>>, %arg6: memref<1x32xf32, #tpu.memory_space<vmem>>, %arg7: memref<32x6xf32, #tpu.memory_space<vmem>>, %arg8: memref<1x6xf32, #tpu.memory_space<vmem>>, %arg9: memref<2x6xf32, #tpu.memory_space<vmem>>, %arg10: memref<16x64xf32, #tpu.memory_space<vmem>>, %arg11: memref<16x16xf32, #tpu.memory_space<vmem>>, %arg12: memref<2x128xf32, #tpu.memory_space<vmem>>) attributes {dimension_semantics = [], scalar_prefetch = 0 : i64, scratch_operands = 3 : i64, tpu.core_type = #tpu.core_type<tc>} {
    %c0 = arith.constant 0 : index
    %c0_0 = arith.constant 0 : index
    %0 = vector.load %arg0[%c0, %c0_0] : memref<16x4xf32, #tpu.memory_space<vmem>>, vector<16x4xf32>
    %c0_1 = arith.constant 0 : index
    %c0_2 = arith.constant 0 : index
    %1 = vector.load %arg1[%c0_1, %c0_2] : memref<4x64xf32, #tpu.memory_space<vmem>>, vector<4x64xf32>
    %cst = arith.constant dense<0.000000e+00> : vector<16x64xf32>
    %2 = tpu.matmul %0, %1, %cst {dimension_numbers = #tpu.dot_dimension_numbers<[1], [0], [0], [1], [0, 0, 1, 1], [], []>} : vector<16x4xf32>, vector<4x64xf32>, vector<16x64xf32> -> vector<16x64xf32>
    %c0_3 = arith.constant 0 : index
    %c0_4 = arith.constant 0 : index
    %3 = vector.load %arg2[%c0_3, %c0_4] : memref<1x64xf32, #tpu.memory_space<vmem>>, vector<1x64xf32>
    %4 = vector.broadcast %3 : vector<1x64xf32> to vector<16x64xf32>
    %5 = arith.addf %2, %4 : vector<16x64xf32>
    %c0_5 = arith.constant 0 : index
    %c0_6 = arith.constant 0 : index
    %6 = vector.load %arg10[%c0_5, %c0_6] : memref<16x64xf32, #tpu.memory_space<vmem>>, vector<16x64xf32>
    tpu.vector_store %arg10[%c0_5, %c0_6], %5 {strides = array<i32>} : memref<16x64xf32, #tpu.memory_space<vmem>>, vector<16x64xf32>,
    %c0_7 = arith.constant 0 : index
    %c0_8 = arith.constant 0 : index
    %7 = vector.load %arg3[%c0_7, %c0_8] : memref<32x128xf32, #tpu.memory_space<vmem>>, vector<32x128xf32>
    %c0_9 = arith.constant 0 : index
    %c0_10 = arith.constant 0 : index
    %8 = vector.load %arg4[%c0_9, %c0_10] : memref<1x64xf32, #tpu.memory_space<vmem>>, vector<1x64xf32>
    %cst_11 = arith.constant 0.000000e+00 : f32
    %9 = vector.broadcast %cst_11 : f32 to vector<1x16xf32>
    %cst_12 = arith.constant 0.000000e+00 : f32
    %10 = vector.broadcast %cst_12 : f32 to vector<1x64xf32>
    %c0_13 = arith.constant 0 : index
    %c0_14 = arith.constant 0 : index
    %11 = vector.load %arg10[%c0_13, %c0_14] : memref<16x64xf32, #tpu.memory_space<vmem>>, vector<1x64xf32>
    %12 = arith.addf %11, %10 : vector<1x64xf32>
    %13 = arith.negf %12 : vector<1x64xf32>
    %14 = math.exp %13 : vector<1x64xf32>
    %cst_15 = arith.constant 1.000000e+00 : f32
    %15 = vector.broadcast %cst_15 : f32 to vector<1x64xf32>
    %16 = arith.addf %15, %14 : vector<1x64xf32>
    %17 = arith.divf %15, %16 : vector<1x64xf32>
    %18 = math.tanh %12 : vector<1x64xf32>
    %19 = vector.extract_strided_slice %17 {offsets = [0, 0], sizes = [1, 16], strides = [1, 1]} : vector<1x64xf32> to vector<1x16xf32>
    %20 = vector.extract_strided_slice %17 {offsets = [0, 16], sizes = [1, 16], strides = [1, 1]} : vector<1x64xf32> to vector<1x16xf32>
    %21 = vector.extract_strided_slice %18 {offsets = [0, 32], sizes = [1, 16], strides = [1, 1]} : vector<1x64xf32> to vector<1x16xf32>
    %22 = vector.extract_strided_slice %17 {offsets = [0, 48], sizes = [1, 16], strides = [1, 1]} : vector<1x64xf32> to vector<1x16xf32>
    %23 = arith.mulf %20, %9 : vector<1x16xf32>
    %24 = arith.mulf %19, %21 : vector<1x16xf32>
    %25 = arith.addf %23, %24 : vector<1x16xf32>
    %26 = math.tanh %25 : vector<1x16xf32>
    %27 = arith.mulf %22, %26 : vector<1x16xf32>
    %28 = tpu.concatenate %27, %9 in 1 : vector<1x16xf32>, vector<1x16xf32> -> vector<1x32xf32>
    %cst_16 = arith.constant dense<0.000000e+00> : vector<1x128xf32>
    %29 = tpu.matmul %28, %7, %cst_16 {dimension_numbers = #tpu.dot_dimension_numbers<[1], [0], [0], [1], [0, 0, 1, 1], [], []>} : vector<1x32xf32>, vector<32x128xf32>, vector<1x128xf32> -> vector<1x128xf32>
    %30 = vector.extract_strided_slice %29 {offsets = [0, 0], sizes = [1, 64], strides = [1, 1]} : vector<1x128xf32> to vector<1x64xf32>
    %31 = vector.extract_strided_slice %29 {offsets = [0, 64], sizes = [1, 64], strides = [1, 1]} : vector<1x128xf32> to vector<1x64xf32>
    %32 = arith.addf %31, %8 : vector<1x64xf32>
    %33 = arith.negf %32 : vector<1x64xf32>
    %34 = math.exp %33 : vector<1x64xf32>
    %cst_17 = arith.constant 1.000000e+00 : f32
    %35 = vector.broadcast %cst_17 : f32 to vector<1x64xf32>
    %36 = arith.addf %35, %34 : vector<1x64xf32>
    %37 = arith.divf %35, %36 : vector<1x64xf32>
    %38 = math.tanh %32 : vector<1x64xf32>
    %39 = vector.extract_strided_slice %37 {offsets = [0, 0], sizes = [1, 16], strides = [1, 1]} : vector<1x64xf32> to vector<1x16xf32>
    %40 = vector.extract_strided_slice %37 {offsets = [0, 16], sizes = [1, 16], strides = [1, 1]} : vector<1x64xf32> to vector<1x16xf32>
    %41 = vector.extract_strided_slice %38 {offsets = [0, 32], sizes = [1, 16], strides = [1, 1]} : vector<1x64xf32> to vector<1x16xf32>
    %42 = vector.extract_strided_slice %37 {offsets = [0, 48], sizes = [1, 16], strides = [1, 1]} : vector<1x64xf32> to vector<1x16xf32>
    %43 = arith.mulf %40, %9 : vector<1x16xf32>
    %44 = arith.mulf %39, %41 : vector<1x16xf32>
    %45 = arith.addf %43, %44 : vector<1x16xf32>
    %46 = math.tanh %45 : vector<1x16xf32>
    %47 = arith.mulf %42, %46 : vector<1x16xf32>
    %c0_18 = arith.constant 0 : index
    %c0_19 = arith.constant 0 : index
    %48 = vector.load %arg11[%c0_18, %c0_19] : memref<16x16xf32, #tpu.memory_space<vmem>>, vector<1x16xf32>
    tpu.vector_store %arg11[%c0_18, %c0_19], %47 {strides = array<i32>} : memref<16x16xf32, #tpu.memory_space<vmem>>, vector<1x16xf32>,
    %c1 = arith.constant 1 : index
    %c0_20 = arith.constant 0 : index
    %49 = vector.load %arg10[%c1, %c0_20] : memref<16x64xf32, #tpu.memory_space<vmem>>, vector<1x64xf32>
    %50 = arith.addf %49, %30 : vector<1x64xf32>
    %51 = arith.negf %50 : vector<1x64xf32>
    %52 = math.exp %51 : vector<1x64xf32>
    %cst_21 = arith.constant 1.000000e+00 : f32
    %53 = vector.broadcast %cst_21 : f32 to vector<1x64xf32>
    %54 = arith.addf %53, %52 : vector<1x64xf32>
    %55 = arith.divf %53, %54 : vector<1x64xf32>
    %56 = math.tanh %50 : vector<1x64xf32>
    %57 = vector.extract_strided_slice %55 {offsets = [0, 0], sizes = [1, 16], strides = [1, 1]} : vector<1x64xf32> to vector<1x16xf32>
    %58 = vector.extract_strided_slice %55 {offsets = [0, 16], sizes = [1, 16], strides = [1, 1]} : vector<1x64xf32> to vector<1x16xf32>
    %59 = vector.extract_strided_slice %56 {offsets = [0, 32], sizes = [1, 16], strides = [1, 1]} : vector<1x64xf32> to vector<1x16xf32>
    %60 = vector.extract_strided_slice %55 {offsets = [0, 48], sizes = [1, 16], strides = [1, 1]} : vector<1x64xf32> to vector<1x16xf32>
    %61 = arith.mulf %58, %25 : vector<1x16xf32>
    %62 = arith.mulf %57, %59 : vector<1x16xf32>
    %63 = arith.addf %61, %62 : vector<1x16xf32>
    %64 = math.tanh %63 : vector<1x16xf32>
    %65 = arith.mulf %60, %64 : vector<1x16xf32>
    %66 = tpu.concatenate %65, %47 in 1 : vector<1x16xf32>, vector<1x16xf32> -> vector<1x32xf32>
    %cst_22 = arith.constant dense<0.000000e+00> : vector<1x128xf32>
    %67 = tpu.matmul %66, %7, %cst_22 {dimension_numbers = #tpu.dot_dimension_numbers<[1], [0], [0], [1], [0, 0, 1, 1], [], []>} : vector<1x32xf32>, vector<32x128xf32>, vector<1x128xf32> -> vector<1x128xf32>
    %68 = vector.extract_strided_slice %67 {offsets = [0, 0], sizes = [1, 64], strides = [1, 1]} : vector<1x128xf32> to vector<1x64xf32>
    %69 = vector.extract_strided_slice %67 {offsets = [0, 64], sizes = [1, 64], strides = [1, 1]} : vector<1x128xf32> to vector<1x64xf32>
    %70 = arith.addf %69, %8 : vector<1x64xf32>
    %71 = arith.negf %70 : vector<1x64xf32>
    %72 = math.exp %71 : vector<1x64xf32>
    %cst_23 = arith.constant 1.000000e+00 : f32
    %73 = vector.broadcast %cst_23 : f32 to vector<1x64xf32>
    %74 = arith.addf %73, %72 : vector<1x64xf32>
    %75 = arith.divf %73, %74 : vector<1x64xf32>
    %76 = math.tanh %70 : vector<1x64xf32>
    %77 = vector.extract_strided_slice %75 {offsets = [0, 0], sizes = [1, 16], strides = [1, 1]} : vector<1x64xf32> to vector<1x16xf32>
    %78 = vector.extract_strided_slice %75 {offsets = [0, 16], sizes = [1, 16], strides = [1, 1]} : vector<1x64xf32> to vector<1x16xf32>
    %79 = vector.extract_strided_slice %76 {offsets = [0, 32], sizes = [1, 16], strides = [1, 1]} : vector<1x64xf32> to vector<1x16xf32>
    %80 = vector.extract_strided_slice %75 {offsets = [0, 48], sizes = [1, 16], strides = [1, 1]} : vector<1x64xf32> to vector<1x16xf32>
    %81 = arith.mulf %78, %45 : vector<1x16xf32>
    %82 = arith.mulf %77, %79 : vector<1x16xf32>
    %83 = arith.addf %81, %82 : vector<1x16xf32>
    %84 = math.tanh %83 : vector<1x16xf32>
    %85 = arith.mulf %80, %84 : vector<1x16xf32>
    %c1_24 = arith.constant 1 : index
    %c0_25 = arith.constant 0 : index
    %86 = vector.load %arg11[%c1_24, %c0_25] : memref<16x16xf32, #tpu.memory_space<vmem>>, vector<1x16xf32>
    tpu.vector_store %arg11[%c1_24, %c0_25], %85 {strides = array<i32>} : memref<16x16xf32, #tpu.memory_space<vmem>>, vector<1x16xf32>,
    %c2 = arith.constant 2 : index
    %c0_26 = arith.constant 0 : index
    %87 = vector.load %arg10[%c2, %c0_26] : memref<16x64xf32, #tpu.memory_space<vmem>>, vector<1x64xf32>
    %88 = arith.addf %87, %68 : vector<1x64xf32>
    %89 = arith.negf %88 : vector<1x64xf32>
    %90 = math.exp %89 : vector<1x64xf32>
    %cst_27 = arith.constant 1.000000e+00 : f32
    %91 = vector.broadcast %cst_27 : f32 to vector<1x64xf32>
    %92 = arith.addf %91, %90 : vector<1x64xf32>
    %93 = arith.divf %91, %92 : vector<1x64xf32>
    %94 = math.tanh %88 : vector<1x64xf32>
    %95 = vector.extract_strided_slice %93 {offsets = [0, 0], sizes = [1, 16], strides = [1, 1]} : vector<1x64xf32> to vector<1x16xf32>
    %96 = vector.extract_strided_slice %93 {offsets = [0, 16], sizes = [1, 16], strides = [1, 1]} : vector<1x64xf32> to vector<1x16xf32>
    %97 = vector.extract_strided_slice %94 {offsets = [0, 32], sizes = [1, 16], strides = [1, 1]} : vector<1x64xf32> to vector<1x16xf32>
    %98 = vector.extract_strided_slice %93 {offsets = [0, 48], sizes = [1, 16], strides = [1, 1]} : vector<1x64xf32> to vector<1x16xf32>
    %99 = arith.mulf %96, %63 : vector<1x16xf32>
    %100 = arith.mulf %95, %97 : vector<1x16xf32>
    %101 = arith.addf %99, %100 : vector<1x16xf32>
    %102 = math.tanh %101 : vector<1x16xf32>
    %103 = arith.mulf %98, %102 : vector<1x16xf32>
    %104 = tpu.concatenate %103, %85 in 1 : vector<1x16xf32>, vector<1x16xf32> -> vector<1x32xf32>
    %cst_28 = arith.constant dense<0.000000e+00> : vector<1x128xf32>
    %105 = tpu.matmul %104, %7, %cst_28 {dimension_numbers = #tpu.dot_dimension_numbers<[1], [0], [0], [1], [0, 0, 1, 1], [], []>} : vector<1x32xf32>, vector<32x128xf32>, vector<1x128xf32> -> vector<1x128xf32>
    %106 = vector.extract_strided_slice %105 {offsets = [0, 0], sizes = [1, 64], strides = [1, 1]} : vector<1x128xf32> to vector<1x64xf32>
    %107 = vector.extract_strided_slice %105 {offsets = [0, 64], sizes = [1, 64], strides = [1, 1]} : vector<1x128xf32> to vector<1x64xf32>
    %108 = arith.addf %107, %8 : vector<1x64xf32>
    %109 = arith.negf %108 : vector<1x64xf32>
    %110 = math.exp %109 : vector<1x64xf32>
    %cst_29 = arith.constant 1.000000e+00 : f32
    %111 = vector.broadcast %cst_29 : f32 to vector<1x64xf32>
    %112 = arith.addf %111, %110 : vector<1x64xf32>
    %113 = arith.divf %111, %112 : vector<1x64xf32>
    %114 = math.tanh %108 : vector<1x64xf32>
    %115 = vector.extract_strided_slice %113 {offsets = [0, 0], sizes = [1, 16], strides = [1, 1]} : vector<1x64xf32> to vector<1x16xf32>
    %116 = vector.extract_strided_slice %113 {offsets = [0, 16], sizes = [1, 16], strides = [1, 1]} : vector<1x64xf32> to vector<1x16xf32>
    %117 = vector.extract_strided_slice %114 {offsets = [0, 32], sizes = [1, 16], strides = [1, 1]} : vector<1x64xf32> to vector<1x16xf32>
    %118 = vector.extract_strided_slice %113 {offsets = [0, 48], sizes = [1, 16], strides = [1, 1]} : vector<1x64xf32> to vector<1x16xf32>
    %119 = arith.mulf %116, %83 : vector<1x16xf32>
    %120 = arith.mulf %115, %117 : vector<1x16xf32>
    %121 = arith.addf %119, %120 : vector<1x16xf32>
    %122 = math.tanh %121 : vector<1x16xf32>
    %123 = arith.mulf %118, %122 : vector<1x16xf32>
    %c2_30 = arith.constant 2 : index
    %c0_31 = arith.constant 0 : index
    %124 = vector.load %arg11[%c2_30, %c0_31] : memref<16x16xf32, #tpu.memory_space<vmem>>, vector<1x16xf32>
    tpu.vector_store %arg11[%c2_30, %c0_31], %123 {strides = array<i32>} : memref<16x16xf32, #tpu.memory_space<vmem>>, vector<1x16xf32>,
    %c3 = arith.constant 3 : index
    %c0_32 = arith.constant 0 : index
    %125 = vector.load %arg10[%c3, %c0_32] : memref<16x64xf32, #tpu.memory_space<vmem>>, vector<1x64xf32>
    %126 = arith.addf %125, %106 : vector<1x64xf32>
    %127 = arith.negf %126 : vector<1x64xf32>
    %128 = math.exp %127 : vector<1x64xf32>
    %cst_33 = arith.constant 1.000000e+00 : f32
    %129 = vector.broadcast %cst_33 : f32 to vector<1x64xf32>
    %130 = arith.addf %129, %128 : vector<1x64xf32>
    %131 = arith.divf %129, %130 : vector<1x64xf32>
    %132 = math.tanh %126 : vector<1x64xf32>
    %133 = vector.extract_strided_slice %131 {offsets = [0, 0], sizes = [1, 16], strides = [1, 1]} : vector<1x64xf32> to vector<1x16xf32>
    %134 = vector.extract_strided_slice %131 {offsets = [0, 16], sizes = [1, 16], strides = [1, 1]} : vector<1x64xf32> to vector<1x16xf32>
    %135 = vector.extract_strided_slice %132 {offsets = [0, 32], sizes = [1, 16], strides = [1, 1]} : vector<1x64xf32> to vector<1x16xf32>
    %136 = vector.extract_strided_slice %131 {offsets = [0, 48], sizes = [1, 16], strides = [1, 1]} : vector<1x64xf32> to vector<1x16xf32>
    %137 = arith.mulf %134, %101 : vector<1x16xf32>
    %138 = arith.mulf %133, %135 : vector<1x16xf32>
    %139 = arith.addf %137, %138 : vector<1x16xf32>
    %140 = math.tanh %139 : vector<1x16xf32>
    %141 = arith.mulf %136, %140 : vector<1x16xf32>
    %142 = tpu.concatenate %141, %123 in 1 : vector<1x16xf32>, vector<1x16xf32> -> vector<1x32xf32>
    %cst_34 = arith.constant dense<0.000000e+00> : vector<1x128xf32>
    %143 = tpu.matmul %142, %7, %cst_34 {dimension_numbers = #tpu.dot_dimension_numbers<[1], [0], [0], [1], [0, 0, 1, 1], [], []>} : vector<1x32xf32>, vector<32x128xf32>, vector<1x128xf32> -> vector<1x128xf32>
    %144 = vector.extract_strided_slice %143 {offsets = [0, 0], sizes = [1, 64], strides = [1, 1]} : vector<1x128xf32> to vector<1x64xf32>
    %145 = vector.extract_strided_slice %143 {offsets = [0, 64], sizes = [1, 64], strides = [1, 1]} : vector<1x128xf32> to vector<1x64xf32>
    %146 = arith.addf %145, %8 : vector<1x64xf32>
    %147 = arith.negf %146 : vector<1x64xf32>
    %148 = math.exp %147 : vector<1x64xf32>
    %cst_35 = arith.constant 1.000000e+00 : f32
    %149 = vector.broadcast %cst_35 : f32 to vector<1x64xf32>
    %150 = arith.addf %149, %148 : vector<1x64xf32>
    %151 = arith.divf %149, %150 : vector<1x64xf32>
    %152 = math.tanh %146 : vector<1x64xf32>
    %153 = vector.extract_strided_slice %151 {offsets = [0, 0], sizes = [1, 16], strides = [1, 1]} : vector<1x64xf32> to vector<1x16xf32>
    %154 = vector.extract_strided_slice %151 {offsets = [0, 16], sizes = [1, 16], strides = [1, 1]} : vector<1x64xf32> to vector<1x16xf32>
    %155 = vector.extract_strided_slice %152 {offsets = [0, 32], sizes = [1, 16], strides = [1, 1]} : vector<1x64xf32> to vector<1x16xf32>
    %156 = vector.extract_strided_slice %151 {offsets = [0, 48], sizes = [1, 16], strides = [1, 1]} : vector<1x64xf32> to vector<1x16xf32>
    %157 = arith.mulf %154, %121 : vector<1x16xf32>
    %158 = arith.mulf %153, %155 : vector<1x16xf32>
    %159 = arith.addf %157, %158 : vector<1x16xf32>
    %160 = math.tanh %159 : vector<1x16xf32>
    %161 = arith.mulf %156, %160 : vector<1x16xf32>
    %c3_36 = arith.constant 3 : index
    %c0_37 = arith.constant 0 : index
    %162 = vector.load %arg11[%c3_36, %c0_37] : memref<16x16xf32, #tpu.memory_space<vmem>>, vector<1x16xf32>
    tpu.vector_store %arg11[%c3_36, %c0_37], %161 {strides = array<i32>} : memref<16x16xf32, #tpu.memory_space<vmem>>, vector<1x16xf32>,
    %c4 = arith.constant 4 : index
    %c0_38 = arith.constant 0 : index
    %163 = vector.load %arg10[%c4, %c0_38] : memref<16x64xf32, #tpu.memory_space<vmem>>, vector<1x64xf32>
    %164 = arith.addf %163, %144 : vector<1x64xf32>
    %165 = arith.negf %164 : vector<1x64xf32>
    %166 = math.exp %165 : vector<1x64xf32>
    %cst_39 = arith.constant 1.000000e+00 : f32
    %167 = vector.broadcast %cst_39 : f32 to vector<1x64xf32>
    %168 = arith.addf %167, %166 : vector<1x64xf32>
    %169 = arith.divf %167, %168 : vector<1x64xf32>
    %170 = math.tanh %164 : vector<1x64xf32>
    %171 = vector.extract_strided_slice %169 {offsets = [0, 0], sizes = [1, 16], strides = [1, 1]} : vector<1x64xf32> to vector<1x16xf32>
    %172 = vector.extract_strided_slice %169 {offsets = [0, 16], sizes = [1, 16], strides = [1, 1]} : vector<1x64xf32> to vector<1x16xf32>
    %173 = vector.extract_strided_slice %170 {offsets = [0, 32], sizes = [1, 16], strides = [1, 1]} : vector<1x64xf32> to vector<1x16xf32>
    %174 = vector.extract_strided_slice %169 {offsets = [0, 48], sizes = [1, 16], strides = [1, 1]} : vector<1x64xf32> to vector<1x16xf32>
    %175 = arith.mulf %172, %139 : vector<1x16xf32>
    %176 = arith.mulf %171, %173 : vector<1x16xf32>
    %177 = arith.addf %175, %176 : vector<1x16xf32>
    %178 = math.tanh %177 : vector<1x16xf32>
    %179 = arith.mulf %174, %178 : vector<1x16xf32>
    %180 = tpu.concatenate %179, %161 in 1 : vector<1x16xf32>, vector<1x16xf32> -> vector<1x32xf32>
    %cst_40 = arith.constant dense<0.000000e+00> : vector<1x128xf32>
    %181 = tpu.matmul %180, %7, %cst_40 {dimension_numbers = #tpu.dot_dimension_numbers<[1], [0], [0], [1], [0, 0, 1, 1], [], []>} : vector<1x32xf32>, vector<32x128xf32>, vector<1x128xf32> -> vector<1x128xf32>
    %182 = vector.extract_strided_slice %181 {offsets = [0, 0], sizes = [1, 64], strides = [1, 1]} : vector<1x128xf32> to vector<1x64xf32>
    %183 = vector.extract_strided_slice %181 {offsets = [0, 64], sizes = [1, 64], strides = [1, 1]} : vector<1x128xf32> to vector<1x64xf32>
    %184 = arith.addf %183, %8 : vector<1x64xf32>
    %185 = arith.negf %184 : vector<1x64xf32>
    %186 = math.exp %185 : vector<1x64xf32>
    %cst_41 = arith.constant 1.000000e+00 : f32
    %187 = vector.broadcast %cst_41 : f32 to vector<1x64xf32>
    %188 = arith.addf %187, %186 : vector<1x64xf32>
    %189 = arith.divf %187, %188 : vector<1x64xf32>
    %190 = math.tanh %184 : vector<1x64xf32>
    %191 = vector.extract_strided_slice %189 {offsets = [0, 0], sizes = [1, 16], strides = [1, 1]} : vector<1x64xf32> to vector<1x16xf32>
    %192 = vector.extract_strided_slice %189 {offsets = [0, 16], sizes = [1, 16], strides = [1, 1]} : vector<1x64xf32> to vector<1x16xf32>
    %193 = vector.extract_strided_slice %190 {offsets = [0, 32], sizes = [1, 16], strides = [1, 1]} : vector<1x64xf32> to vector<1x16xf32>
    %194 = vector.extract_strided_slice %189 {offsets = [0, 48], sizes = [1, 16], strides = [1, 1]} : vector<1x64xf32> to vector<1x16xf32>
    %195 = arith.mulf %192, %159 : vector<1x16xf32>
    %196 = arith.mulf %191, %193 : vector<1x16xf32>
    %197 = arith.addf %195, %196 : vector<1x16xf32>
    %198 = math.tanh %197 : vector<1x16xf32>
    %199 = arith.mulf %194, %198 : vector<1x16xf32>
    %c4_42 = arith.constant 4 : index
    %c0_43 = arith.constant 0 : index
    %200 = vector.load %arg11[%c4_42, %c0_43] : memref<16x16xf32, #tpu.memory_space<vmem>>, vector<1x16xf32>
    tpu.vector_store %arg11[%c4_42, %c0_43], %199 {strides = array<i32>} : memref<16x16xf32, #tpu.memory_space<vmem>>, vector<1x16xf32>,
    %c5 = arith.constant 5 : index
    %c0_44 = arith.constant 0 : index
    %201 = vector.load %arg10[%c5, %c0_44] : memref<16x64xf32, #tpu.memory_space<vmem>>, vector<1x64xf32>
    %202 = arith.addf %201, %182 : vector<1x64xf32>
    %203 = arith.negf %202 : vector<1x64xf32>
    %204 = math.exp %203 : vector<1x64xf32>
    %cst_45 = arith.constant 1.000000e+00 : f32
    %205 = vector.broadcast %cst_45 : f32 to vector<1x64xf32>
    %206 = arith.addf %205, %204 : vector<1x64xf32>
    %207 = arith.divf %205, %206 : vector<1x64xf32>
    %208 = math.tanh %202 : vector<1x64xf32>
    %209 = vector.extract_strided_slice %207 {offsets = [0, 0], sizes = [1, 16], strides = [1, 1]} : vector<1x64xf32> to vector<1x16xf32>
    %210 = vector.extract_strided_slice %207 {offsets = [0, 16], sizes = [1, 16], strides = [1, 1]} : vector<1x64xf32> to vector<1x16xf32>
    %211 = vector.extract_strided_slice %208 {offsets = [0, 32], sizes = [1, 16], strides = [1, 1]} : vector<1x64xf32> to vector<1x16xf32>
    %212 = vector.extract_strided_slice %207 {offsets = [0, 48], sizes = [1, 16], strides = [1, 1]} : vector<1x64xf32> to vector<1x16xf32>
    %213 = arith.mulf %210, %177 : vector<1x16xf32>
    %214 = arith.mulf %209, %211 : vector<1x16xf32>
    %215 = arith.addf %213, %214 : vector<1x16xf32>
    %216 = math.tanh %215 : vector<1x16xf32>
    %217 = arith.mulf %212, %216 : vector<1x16xf32>
    %218 = tpu.concatenate %217, %199 in 1 : vector<1x16xf32>, vector<1x16xf32> -> vector<1x32xf32>
    %cst_46 = arith.constant dense<0.000000e+00> : vector<1x128xf32>
    %219 = tpu.matmul %218, %7, %cst_46 {dimension_numbers = #tpu.dot_dimension_numbers<[1], [0], [0], [1], [0, 0, 1, 1], [], []>} : vector<1x32xf32>, vector<32x128xf32>, vector<1x128xf32> -> vector<1x128xf32>
    %220 = vector.extract_strided_slice %219 {offsets = [0, 0], sizes = [1, 64], strides = [1, 1]} : vector<1x128xf32> to vector<1x64xf32>
    %221 = vector.extract_strided_slice %219 {offsets = [0, 64], sizes = [1, 64], strides = [1, 1]} : vector<1x128xf32> to vector<1x64xf32>
    %222 = arith.addf %221, %8 : vector<1x64xf32>
    %223 = arith.negf %222 : vector<1x64xf32>
    %224 = math.exp %223 : vector<1x64xf32>
    %cst_47 = arith.constant 1.000000e+00 : f32
    %225 = vector.broadcast %cst_47 : f32 to vector<1x64xf32>
    %226 = arith.addf %225, %224 : vector<1x64xf32>
    %227 = arith.divf %225, %226 : vector<1x64xf32>
    %228 = math.tanh %222 : vector<1x64xf32>
    %229 = vector.extract_strided_slice %227 {offsets = [0, 0], sizes = [1, 16], strides = [1, 1]} : vector<1x64xf32> to vector<1x16xf32>
    %230 = vector.extract_strided_slice %227 {offsets = [0, 16], sizes = [1, 16], strides = [1, 1]} : vector<1x64xf32> to vector<1x16xf32>
    %231 = vector.extract_strided_slice %228 {offsets = [0, 32], sizes = [1, 16], strides = [1, 1]} : vector<1x64xf32> to vector<1x16xf32>
    %232 = vector.extract_strided_slice %227 {offsets = [0, 48], sizes = [1, 16], strides = [1, 1]} : vector<1x64xf32> to vector<1x16xf32>
    %233 = arith.mulf %230, %197 : vector<1x16xf32>
    %234 = arith.mulf %229, %231 : vector<1x16xf32>
    %235 = arith.addf %233, %234 : vector<1x16xf32>
    %236 = math.tanh %235 : vector<1x16xf32>
    %237 = arith.mulf %232, %236 : vector<1x16xf32>
    %c5_48 = arith.constant 5 : index
    %c0_49 = arith.constant 0 : index
    %238 = vector.load %arg11[%c5_48, %c0_49] : memref<16x16xf32, #tpu.memory_space<vmem>>, vector<1x16xf32>
    tpu.vector_store %arg11[%c5_48, %c0_49], %237 {strides = array<i32>} : memref<16x16xf32, #tpu.memory_space<vmem>>, vector<1x16xf32>,
    %c6 = arith.constant 6 : index
    %c0_50 = arith.constant 0 : index
    %239 = vector.load %arg10[%c6, %c0_50] : memref<16x64xf32, #tpu.memory_space<vmem>>, vector<1x64xf32>
    %240 = arith.addf %239, %220 : vector<1x64xf32>
    %241 = arith.negf %240 : vector<1x64xf32>
    %242 = math.exp %241 : vector<1x64xf32>
    %cst_51 = arith.constant 1.000000e+00 : f32
    %243 = vector.broadcast %cst_51 : f32 to vector<1x64xf32>
    %244 = arith.addf %243, %242 : vector<1x64xf32>
    %245 = arith.divf %243, %244 : vector<1x64xf32>
    %246 = math.tanh %240 : vector<1x64xf32>
    %247 = vector.extract_strided_slice %245 {offsets = [0, 0], sizes = [1, 16], strides = [1, 1]} : vector<1x64xf32> to vector<1x16xf32>
    %248 = vector.extract_strided_slice %245 {offsets = [0, 16], sizes = [1, 16], strides = [1, 1]} : vector<1x64xf32> to vector<1x16xf32>
    %249 = vector.extract_strided_slice %246 {offsets = [0, 32], sizes = [1, 16], strides = [1, 1]} : vector<1x64xf32> to vector<1x16xf32>
    %250 = vector.extract_strided_slice %245 {offsets = [0, 48], sizes = [1, 16], strides = [1, 1]} : vector<1x64xf32> to vector<1x16xf32>
    %251 = arith.mulf %248, %215 : vector<1x16xf32>
    %252 = arith.mulf %247, %249 : vector<1x16xf32>
    %253 = arith.addf %251, %252 : vector<1x16xf32>
    %254 = math.tanh %253 : vector<1x16xf32>
    %255 = arith.mulf %250, %254 : vector<1x16xf32>
    %256 = tpu.concatenate %255, %237 in 1 : vector<1x16xf32>, vector<1x16xf32> -> vector<1x32xf32>
    %cst_52 = arith.constant dense<0.000000e+00> : vector<1x128xf32>
    %257 = tpu.matmul %256, %7, %cst_52 {dimension_numbers = #tpu.dot_dimension_numbers<[1], [0], [0], [1], [0, 0, 1, 1], [], []>} : vector<1x32xf32>, vector<32x128xf32>, vector<1x128xf32> -> vector<1x128xf32>
    %258 = vector.extract_strided_slice %257 {offsets = [0, 0], sizes = [1, 64], strides = [1, 1]} : vector<1x128xf32> to vector<1x64xf32>
    %259 = vector.extract_strided_slice %257 {offsets = [0, 64], sizes = [1, 64], strides = [1, 1]} : vector<1x128xf32> to vector<1x64xf32>
    %260 = arith.addf %259, %8 : vector<1x64xf32>
    %261 = arith.negf %260 : vector<1x64xf32>
    %262 = math.exp %261 : vector<1x64xf32>
    %cst_53 = arith.constant 1.000000e+00 : f32
    %263 = vector.broadcast %cst_53 : f32 to vector<1x64xf32>
    %264 = arith.addf %263, %262 : vector<1x64xf32>
    %265 = arith.divf %263, %264 : vector<1x64xf32>
    %266 = math.tanh %260 : vector<1x64xf32>
    %267 = vector.extract_strided_slice %265 {offsets = [0, 0], sizes = [1, 16], strides = [1, 1]} : vector<1x64xf32> to vector<1x16xf32>
    %268 = vector.extract_strided_slice %265 {offsets = [0, 16], sizes = [1, 16], strides = [1, 1]} : vector<1x64xf32> to vector<1x16xf32>
    %269 = vector.extract_strided_slice %266 {offsets = [0, 32], sizes = [1, 16], strides = [1, 1]} : vector<1x64xf32> to vector<1x16xf32>
    %270 = vector.extract_strided_slice %265 {offsets = [0, 48], sizes = [1, 16], strides = [1, 1]} : vector<1x64xf32> to vector<1x16xf32>
    %271 = arith.mulf %268, %235 : vector<1x16xf32>
    %272 = arith.mulf %267, %269 : vector<1x16xf32>
    %273 = arith.addf %271, %272 : vector<1x16xf32>
    %274 = math.tanh %273 : vector<1x16xf32>
    %275 = arith.mulf %270, %274 : vector<1x16xf32>
    %c6_54 = arith.constant 6 : index
    %c0_55 = arith.constant 0 : index
    %276 = vector.load %arg11[%c6_54, %c0_55] : memref<16x16xf32, #tpu.memory_space<vmem>>, vector<1x16xf32>
    tpu.vector_store %arg11[%c6_54, %c0_55], %275 {strides = array<i32>} : memref<16x16xf32, #tpu.memory_space<vmem>>, vector<1x16xf32>,
    %c7 = arith.constant 7 : index
    %c0_56 = arith.constant 0 : index
    %277 = vector.load %arg10[%c7, %c0_56] : memref<16x64xf32, #tpu.memory_space<vmem>>, vector<1x64xf32>
    %278 = arith.addf %277, %258 : vector<1x64xf32>
    %279 = arith.negf %278 : vector<1x64xf32>
    %280 = math.exp %279 : vector<1x64xf32>
    %cst_57 = arith.constant 1.000000e+00 : f32
    %281 = vector.broadcast %cst_57 : f32 to vector<1x64xf32>
    %282 = arith.addf %281, %280 : vector<1x64xf32>
    %283 = arith.divf %281, %282 : vector<1x64xf32>
    %284 = math.tanh %278 : vector<1x64xf32>
    %285 = vector.extract_strided_slice %283 {offsets = [0, 0], sizes = [1, 16], strides = [1, 1]} : vector<1x64xf32> to vector<1x16xf32>
    %286 = vector.extract_strided_slice %283 {offsets = [0, 16], sizes = [1, 16], strides = [1, 1]} : vector<1x64xf32> to vector<1x16xf32>
    %287 = vector.extract_strided_slice %284 {offsets = [0, 32], sizes = [1, 16], strides = [1, 1]} : vector<1x64xf32> to vector<1x16xf32>
    %288 = vector.extract_strided_slice %283 {offsets = [0, 48], sizes = [1, 16], strides = [1, 1]} : vector<1x64xf32> to vector<1x16xf32>
    %289 = arith.mulf %286, %253 : vector<1x16xf32>
    %290 = arith.mulf %285, %287 : vector<1x16xf32>
    %291 = arith.addf %289, %290 : vector<1x16xf32>
    %292 = math.tanh %291 : vector<1x16xf32>
    %293 = arith.mulf %288, %292 : vector<1x16xf32>
    %294 = tpu.concatenate %293, %275 in 1 : vector<1x16xf32>, vector<1x16xf32> -> vector<1x32xf32>
    %cst_58 = arith.constant dense<0.000000e+00> : vector<1x128xf32>
    %295 = tpu.matmul %294, %7, %cst_58 {dimension_numbers = #tpu.dot_dimension_numbers<[1], [0], [0], [1], [0, 0, 1, 1], [], []>} : vector<1x32xf32>, vector<32x128xf32>, vector<1x128xf32> -> vector<1x128xf32>
    %296 = vector.extract_strided_slice %295 {offsets = [0, 0], sizes = [1, 64], strides = [1, 1]} : vector<1x128xf32> to vector<1x64xf32>
    %297 = vector.extract_strided_slice %295 {offsets = [0, 64], sizes = [1, 64], strides = [1, 1]} : vector<1x128xf32> to vector<1x64xf32>
    %298 = arith.addf %297, %8 : vector<1x64xf32>
    %299 = arith.negf %298 : vector<1x64xf32>
    %300 = math.exp %299 : vector<1x64xf32>
    %cst_59 = arith.constant 1.000000e+00 : f32
    %301 = vector.broadcast %cst_59 : f32 to vector<1x64xf32>
    %302 = arith.addf %301, %300 : vector<1x64xf32>
    %303 = arith.divf %301, %302 : vector<1x64xf32>
    %304 = math.tanh %298 : vector<1x64xf32>
    %305 = vector.extract_strided_slice %303 {offsets = [0, 0], sizes = [1, 16], strides = [1, 1]} : vector<1x64xf32> to vector<1x16xf32>
    %306 = vector.extract_strided_slice %303 {offsets = [0, 16], sizes = [1, 16], strides = [1, 1]} : vector<1x64xf32> to vector<1x16xf32>
    %307 = vector.extract_strided_slice %304 {offsets = [0, 32], sizes = [1, 16], strides = [1, 1]} : vector<1x64xf32> to vector<1x16xf32>
    %308 = vector.extract_strided_slice %303 {offsets = [0, 48], sizes = [1, 16], strides = [1, 1]} : vector<1x64xf32> to vector<1x16xf32>
    %309 = arith.mulf %306, %273 : vector<1x16xf32>
    %310 = arith.mulf %305, %307 : vector<1x16xf32>
    %311 = arith.addf %309, %310 : vector<1x16xf32>
    %312 = math.tanh %311 : vector<1x16xf32>
    %313 = arith.mulf %308, %312 : vector<1x16xf32>
    %c7_60 = arith.constant 7 : index
    %c0_61 = arith.constant 0 : index
    %314 = vector.load %arg11[%c7_60, %c0_61] : memref<16x16xf32, #tpu.memory_space<vmem>>, vector<1x16xf32>
    tpu.vector_store %arg11[%c7_60, %c0_61], %313 {strides = array<i32>} : memref<16x16xf32, #tpu.memory_space<vmem>>, vector<1x16xf32>,
    %c8 = arith.constant 8 : index
    %c0_62 = arith.constant 0 : index
    %315 = vector.load %arg10[%c8, %c0_62] : memref<16x64xf32, #tpu.memory_space<vmem>>, vector<1x64xf32>
    %316 = arith.addf %315, %296 : vector<1x64xf32>
    %317 = arith.negf %316 : vector<1x64xf32>
    %318 = math.exp %317 : vector<1x64xf32>
    %cst_63 = arith.constant 1.000000e+00 : f32
    %319 = vector.broadcast %cst_63 : f32 to vector<1x64xf32>
    %320 = arith.addf %319, %318 : vector<1x64xf32>
    %321 = arith.divf %319, %320 : vector<1x64xf32>
    %322 = math.tanh %316 : vector<1x64xf32>
    %323 = vector.extract_strided_slice %321 {offsets = [0, 0], sizes = [1, 16], strides = [1, 1]} : vector<1x64xf32> to vector<1x16xf32>
    %324 = vector.extract_strided_slice %321 {offsets = [0, 16], sizes = [1, 16], strides = [1, 1]} : vector<1x64xf32> to vector<1x16xf32>
    %325 = vector.extract_strided_slice %322 {offsets = [0, 32], sizes = [1, 16], strides = [1, 1]} : vector<1x64xf32> to vector<1x16xf32>
    %326 = vector.extract_strided_slice %321 {offsets = [0, 48], sizes = [1, 16], strides = [1, 1]} : vector<1x64xf32> to vector<1x16xf32>
    %327 = arith.mulf %324, %291 : vector<1x16xf32>
    %328 = arith.mulf %323, %325 : vector<1x16xf32>
    %329 = arith.addf %327, %328 : vector<1x16xf32>
    %330 = math.tanh %329 : vector<1x16xf32>
    %331 = arith.mulf %326, %330 : vector<1x16xf32>
    %332 = tpu.concatenate %331, %313 in 1 : vector<1x16xf32>, vector<1x16xf32> -> vector<1x32xf32>
    %cst_64 = arith.constant dense<0.000000e+00> : vector<1x128xf32>
    %333 = tpu.matmul %332, %7, %cst_64 {dimension_numbers = #tpu.dot_dimension_numbers<[1], [0], [0], [1], [0, 0, 1, 1], [], []>} : vector<1x32xf32>, vector<32x128xf32>, vector<1x128xf32> -> vector<1x128xf32>
    %334 = vector.extract_strided_slice %333 {offsets = [0, 0], sizes = [1, 64], strides = [1, 1]} : vector<1x128xf32> to vector<1x64xf32>
    %335 = vector.extract_strided_slice %333 {offsets = [0, 64], sizes = [1, 64], strides = [1, 1]} : vector<1x128xf32> to vector<1x64xf32>
    %336 = arith.addf %335, %8 : vector<1x64xf32>
    %337 = arith.negf %336 : vector<1x64xf32>
    %338 = math.exp %337 : vector<1x64xf32>
    %cst_65 = arith.constant 1.000000e+00 : f32
    %339 = vector.broadcast %cst_65 : f32 to vector<1x64xf32>
    %340 = arith.addf %339, %338 : vector<1x64xf32>
    %341 = arith.divf %339, %340 : vector<1x64xf32>
    %342 = math.tanh %336 : vector<1x64xf32>
    %343 = vector.extract_strided_slice %341 {offsets = [0, 0], sizes = [1, 16], strides = [1, 1]} : vector<1x64xf32> to vector<1x16xf32>
    %344 = vector.extract_strided_slice %341 {offsets = [0, 16], sizes = [1, 16], strides = [1, 1]} : vector<1x64xf32> to vector<1x16xf32>
    %345 = vector.extract_strided_slice %342 {offsets = [0, 32], sizes = [1, 16], strides = [1, 1]} : vector<1x64xf32> to vector<1x16xf32>
    %346 = vector.extract_strided_slice %341 {offsets = [0, 48], sizes = [1, 16], strides = [1, 1]} : vector<1x64xf32> to vector<1x16xf32>
    %347 = arith.mulf %344, %311 : vector<1x16xf32>
    %348 = arith.mulf %343, %345 : vector<1x16xf32>
    %349 = arith.addf %347, %348 : vector<1x16xf32>
    %350 = math.tanh %349 : vector<1x16xf32>
    %351 = arith.mulf %346, %350 : vector<1x16xf32>
    %c8_66 = arith.constant 8 : index
    %c0_67 = arith.constant 0 : index
    %352 = vector.load %arg11[%c8_66, %c0_67] : memref<16x16xf32, #tpu.memory_space<vmem>>, vector<1x16xf32>
    tpu.vector_store %arg11[%c8_66, %c0_67], %351 {strides = array<i32>} : memref<16x16xf32, #tpu.memory_space<vmem>>, vector<1x16xf32>,
    %c9 = arith.constant 9 : index
    %c0_68 = arith.constant 0 : index
    %353 = vector.load %arg10[%c9, %c0_68] : memref<16x64xf32, #tpu.memory_space<vmem>>, vector<1x64xf32>
    %354 = arith.addf %353, %334 : vector<1x64xf32>
    %355 = arith.negf %354 : vector<1x64xf32>
    %356 = math.exp %355 : vector<1x64xf32>
    %cst_69 = arith.constant 1.000000e+00 : f32
    %357 = vector.broadcast %cst_69 : f32 to vector<1x64xf32>
    %358 = arith.addf %357, %356 : vector<1x64xf32>
    %359 = arith.divf %357, %358 : vector<1x64xf32>
    %360 = math.tanh %354 : vector<1x64xf32>
    %361 = vector.extract_strided_slice %359 {offsets = [0, 0], sizes = [1, 16], strides = [1, 1]} : vector<1x64xf32> to vector<1x16xf32>
    %362 = vector.extract_strided_slice %359 {offsets = [0, 16], sizes = [1, 16], strides = [1, 1]} : vector<1x64xf32> to vector<1x16xf32>
    %363 = vector.extract_strided_slice %360 {offsets = [0, 32], sizes = [1, 16], strides = [1, 1]} : vector<1x64xf32> to vector<1x16xf32>
    %364 = vector.extract_strided_slice %359 {offsets = [0, 48], sizes = [1, 16], strides = [1, 1]} : vector<1x64xf32> to vector<1x16xf32>
    %365 = arith.mulf %362, %329 : vector<1x16xf32>
    %366 = arith.mulf %361, %363 : vector<1x16xf32>
    %367 = arith.addf %365, %366 : vector<1x16xf32>
    %368 = math.tanh %367 : vector<1x16xf32>
    %369 = arith.mulf %364, %368 : vector<1x16xf32>
    %370 = tpu.concatenate %369, %351 in 1 : vector<1x16xf32>, vector<1x16xf32> -> vector<1x32xf32>
    %cst_70 = arith.constant dense<0.000000e+00> : vector<1x128xf32>
    %371 = tpu.matmul %370, %7, %cst_70 {dimension_numbers = #tpu.dot_dimension_numbers<[1], [0], [0], [1], [0, 0, 1, 1], [], []>} : vector<1x32xf32>, vector<32x128xf32>, vector<1x128xf32> -> vector<1x128xf32>
    %372 = vector.extract_strided_slice %371 {offsets = [0, 0], sizes = [1, 64], strides = [1, 1]} : vector<1x128xf32> to vector<1x64xf32>
    %373 = vector.extract_strided_slice %371 {offsets = [0, 64], sizes = [1, 64], strides = [1, 1]} : vector<1x128xf32> to vector<1x64xf32>
    %374 = arith.addf %373, %8 : vector<1x64xf32>
    %375 = arith.negf %374 : vector<1x64xf32>
    %376 = math.exp %375 : vector<1x64xf32>
    %cst_71 = arith.constant 1.000000e+00 : f32
    %377 = vector.broadcast %cst_71 : f32 to vector<1x64xf32>
    %378 = arith.addf %377, %376 : vector<1x64xf32>
    %379 = arith.divf %377, %378 : vector<1x64xf32>
    %380 = math.tanh %374 : vector<1x64xf32>
    %381 = vector.extract_strided_slice %379 {offsets = [0, 0], sizes = [1, 16], strides = [1, 1]} : vector<1x64xf32> to vector<1x16xf32>
    %382 = vector.extract_strided_slice %379 {offsets = [0, 16], sizes = [1, 16], strides = [1, 1]} : vector<1x64xf32> to vector<1x16xf32>
    %383 = vector.extract_strided_slice %380 {offsets = [0, 32], sizes = [1, 16], strides = [1, 1]} : vector<1x64xf32> to vector<1x16xf32>
    %384 = vector.extract_strided_slice %379 {offsets = [0, 48], sizes = [1, 16], strides = [1, 1]} : vector<1x64xf32> to vector<1x16xf32>
    %385 = arith.mulf %382, %349 : vector<1x16xf32>
    %386 = arith.mulf %381, %383 : vector<1x16xf32>
    %387 = arith.addf %385, %386 : vector<1x16xf32>
    %388 = math.tanh %387 : vector<1x16xf32>
    %389 = arith.mulf %384, %388 : vector<1x16xf32>
    %c9_72 = arith.constant 9 : index
    %c0_73 = arith.constant 0 : index
    %390 = vector.load %arg11[%c9_72, %c0_73] : memref<16x16xf32, #tpu.memory_space<vmem>>, vector<1x16xf32>
    tpu.vector_store %arg11[%c9_72, %c0_73], %389 {strides = array<i32>} : memref<16x16xf32, #tpu.memory_space<vmem>>, vector<1x16xf32>,
    %c10 = arith.constant 10 : index
    %c0_74 = arith.constant 0 : index
    %391 = vector.load %arg10[%c10, %c0_74] : memref<16x64xf32, #tpu.memory_space<vmem>>, vector<1x64xf32>
    %392 = arith.addf %391, %372 : vector<1x64xf32>
    %393 = arith.negf %392 : vector<1x64xf32>
    %394 = math.exp %393 : vector<1x64xf32>
    %cst_75 = arith.constant 1.000000e+00 : f32
    %395 = vector.broadcast %cst_75 : f32 to vector<1x64xf32>
    %396 = arith.addf %395, %394 : vector<1x64xf32>
    %397 = arith.divf %395, %396 : vector<1x64xf32>
    %398 = math.tanh %392 : vector<1x64xf32>
    %399 = vector.extract_strided_slice %397 {offsets = [0, 0], sizes = [1, 16], strides = [1, 1]} : vector<1x64xf32> to vector<1x16xf32>
    %400 = vector.extract_strided_slice %397 {offsets = [0, 16], sizes = [1, 16], strides = [1, 1]} : vector<1x64xf32> to vector<1x16xf32>
    %401 = vector.extract_strided_slice %398 {offsets = [0, 32], sizes = [1, 16], strides = [1, 1]} : vector<1x64xf32> to vector<1x16xf32>
    %402 = vector.extract_strided_slice %397 {offsets = [0, 48], sizes = [1, 16], strides = [1, 1]} : vector<1x64xf32> to vector<1x16xf32>
    %403 = arith.mulf %400, %367 : vector<1x16xf32>
    %404 = arith.mulf %399, %401 : vector<1x16xf32>
    %405 = arith.addf %403, %404 : vector<1x16xf32>
    %406 = math.tanh %405 : vector<1x16xf32>
    %407 = arith.mulf %402, %406 : vector<1x16xf32>
    %408 = tpu.concatenate %407, %389 in 1 : vector<1x16xf32>, vector<1x16xf32> -> vector<1x32xf32>
    %cst_76 = arith.constant dense<0.000000e+00> : vector<1x128xf32>
    %409 = tpu.matmul %408, %7, %cst_76 {dimension_numbers = #tpu.dot_dimension_numbers<[1], [0], [0], [1], [0, 0, 1, 1], [], []>} : vector<1x32xf32>, vector<32x128xf32>, vector<1x128xf32> -> vector<1x128xf32>
    %410 = vector.extract_strided_slice %409 {offsets = [0, 0], sizes = [1, 64], strides = [1, 1]} : vector<1x128xf32> to vector<1x64xf32>
    %411 = vector.extract_strided_slice %409 {offsets = [0, 64], sizes = [1, 64], strides = [1, 1]} : vector<1x128xf32> to vector<1x64xf32>
    %412 = arith.addf %411, %8 : vector<1x64xf32>
    %413 = arith.negf %412 : vector<1x64xf32>
    %414 = math.exp %413 : vector<1x64xf32>
    %cst_77 = arith.constant 1.000000e+00 : f32
    %415 = vector.broadcast %cst_77 : f32 to vector<1x64xf32>
    %416 = arith.addf %415, %414 : vector<1x64xf32>
    %417 = arith.divf %415, %416 : vector<1x64xf32>
    %418 = math.tanh %412 : vector<1x64xf32>
    %419 = vector.extract_strided_slice %417 {offsets = [0, 0], sizes = [1, 16], strides = [1, 1]} : vector<1x64xf32> to vector<1x16xf32>
    %420 = vector.extract_strided_slice %417 {offsets = [0, 16], sizes = [1, 16], strides = [1, 1]} : vector<1x64xf32> to vector<1x16xf32>
    %421 = vector.extract_strided_slice %418 {offsets = [0, 32], sizes = [1, 16], strides = [1, 1]} : vector<1x64xf32> to vector<1x16xf32>
    %422 = vector.extract_strided_slice %417 {offsets = [0, 48], sizes = [1, 16], strides = [1, 1]} : vector<1x64xf32> to vector<1x16xf32>
    %423 = arith.mulf %420, %387 : vector<1x16xf32>
    %424 = arith.mulf %419, %421 : vector<1x16xf32>
    %425 = arith.addf %423, %424 : vector<1x16xf32>
    %426 = math.tanh %425 : vector<1x16xf32>
    %427 = arith.mulf %422, %426 : vector<1x16xf32>
    %c10_78 = arith.constant 10 : index
    %c0_79 = arith.constant 0 : index
    %428 = vector.load %arg11[%c10_78, %c0_79] : memref<16x16xf32, #tpu.memory_space<vmem>>, vector<1x16xf32>
    tpu.vector_store %arg11[%c10_78, %c0_79], %427 {strides = array<i32>} : memref<16x16xf32, #tpu.memory_space<vmem>>, vector<1x16xf32>,
    %c11 = arith.constant 11 : index
    %c0_80 = arith.constant 0 : index
    %429 = vector.load %arg10[%c11, %c0_80] : memref<16x64xf32, #tpu.memory_space<vmem>>, vector<1x64xf32>
    %430 = arith.addf %429, %410 : vector<1x64xf32>
    %431 = arith.negf %430 : vector<1x64xf32>
    %432 = math.exp %431 : vector<1x64xf32>
    %cst_81 = arith.constant 1.000000e+00 : f32
    %433 = vector.broadcast %cst_81 : f32 to vector<1x64xf32>
    %434 = arith.addf %433, %432 : vector<1x64xf32>
    %435 = arith.divf %433, %434 : vector<1x64xf32>
    %436 = math.tanh %430 : vector<1x64xf32>
    %437 = vector.extract_strided_slice %435 {offsets = [0, 0], sizes = [1, 16], strides = [1, 1]} : vector<1x64xf32> to vector<1x16xf32>
    %438 = vector.extract_strided_slice %435 {offsets = [0, 16], sizes = [1, 16], strides = [1, 1]} : vector<1x64xf32> to vector<1x16xf32>
    %439 = vector.extract_strided_slice %436 {offsets = [0, 32], sizes = [1, 16], strides = [1, 1]} : vector<1x64xf32> to vector<1x16xf32>
    %440 = vector.extract_strided_slice %435 {offsets = [0, 48], sizes = [1, 16], strides = [1, 1]} : vector<1x64xf32> to vector<1x16xf32>
    %441 = arith.mulf %438, %405 : vector<1x16xf32>
    %442 = arith.mulf %437, %439 : vector<1x16xf32>
    %443 = arith.addf %441, %442 : vector<1x16xf32>
    %444 = math.tanh %443 : vector<1x16xf32>
    %445 = arith.mulf %440, %444 : vector<1x16xf32>
    %446 = tpu.concatenate %445, %427 in 1 : vector<1x16xf32>, vector<1x16xf32> -> vector<1x32xf32>
    %cst_82 = arith.constant dense<0.000000e+00> : vector<1x128xf32>
    %447 = tpu.matmul %446, %7, %cst_82 {dimension_numbers = #tpu.dot_dimension_numbers<[1], [0], [0], [1], [0, 0, 1, 1], [], []>} : vector<1x32xf32>, vector<32x128xf32>, vector<1x128xf32> -> vector<1x128xf32>
    %448 = vector.extract_strided_slice %447 {offsets = [0, 0], sizes = [1, 64], strides = [1, 1]} : vector<1x128xf32> to vector<1x64xf32>
    %449 = vector.extract_strided_slice %447 {offsets = [0, 64], sizes = [1, 64], strides = [1, 1]} : vector<1x128xf32> to vector<1x64xf32>
    %450 = arith.addf %449, %8 : vector<1x64xf32>
    %451 = arith.negf %450 : vector<1x64xf32>
    %452 = math.exp %451 : vector<1x64xf32>
    %cst_83 = arith.constant 1.000000e+00 : f32
    %453 = vector.broadcast %cst_83 : f32 to vector<1x64xf32>
    %454 = arith.addf %453, %452 : vector<1x64xf32>
    %455 = arith.divf %453, %454 : vector<1x64xf32>
    %456 = math.tanh %450 : vector<1x64xf32>
    %457 = vector.extract_strided_slice %455 {offsets = [0, 0], sizes = [1, 16], strides = [1, 1]} : vector<1x64xf32> to vector<1x16xf32>
    %458 = vector.extract_strided_slice %455 {offsets = [0, 16], sizes = [1, 16], strides = [1, 1]} : vector<1x64xf32> to vector<1x16xf32>
    %459 = vector.extract_strided_slice %456 {offsets = [0, 32], sizes = [1, 16], strides = [1, 1]} : vector<1x64xf32> to vector<1x16xf32>
    %460 = vector.extract_strided_slice %455 {offsets = [0, 48], sizes = [1, 16], strides = [1, 1]} : vector<1x64xf32> to vector<1x16xf32>
    %461 = arith.mulf %458, %425 : vector<1x16xf32>
    %462 = arith.mulf %457, %459 : vector<1x16xf32>
    %463 = arith.addf %461, %462 : vector<1x16xf32>
    %464 = math.tanh %463 : vector<1x16xf32>
    %465 = arith.mulf %460, %464 : vector<1x16xf32>
    %c11_84 = arith.constant 11 : index
    %c0_85 = arith.constant 0 : index
    %466 = vector.load %arg11[%c11_84, %c0_85] : memref<16x16xf32, #tpu.memory_space<vmem>>, vector<1x16xf32>
    tpu.vector_store %arg11[%c11_84, %c0_85], %465 {strides = array<i32>} : memref<16x16xf32, #tpu.memory_space<vmem>>, vector<1x16xf32>,
    %c12 = arith.constant 12 : index
    %c0_86 = arith.constant 0 : index
    %467 = vector.load %arg10[%c12, %c0_86] : memref<16x64xf32, #tpu.memory_space<vmem>>, vector<1x64xf32>
    %468 = arith.addf %467, %448 : vector<1x64xf32>
    %469 = arith.negf %468 : vector<1x64xf32>
    %470 = math.exp %469 : vector<1x64xf32>
    %cst_87 = arith.constant 1.000000e+00 : f32
    %471 = vector.broadcast %cst_87 : f32 to vector<1x64xf32>
    %472 = arith.addf %471, %470 : vector<1x64xf32>
    %473 = arith.divf %471, %472 : vector<1x64xf32>
    %474 = math.tanh %468 : vector<1x64xf32>
    %475 = vector.extract_strided_slice %473 {offsets = [0, 0], sizes = [1, 16], strides = [1, 1]} : vector<1x64xf32> to vector<1x16xf32>
    %476 = vector.extract_strided_slice %473 {offsets = [0, 16], sizes = [1, 16], strides = [1, 1]} : vector<1x64xf32> to vector<1x16xf32>
    %477 = vector.extract_strided_slice %474 {offsets = [0, 32], sizes = [1, 16], strides = [1, 1]} : vector<1x64xf32> to vector<1x16xf32>
    %478 = vector.extract_strided_slice %473 {offsets = [0, 48], sizes = [1, 16], strides = [1, 1]} : vector<1x64xf32> to vector<1x16xf32>
    %479 = arith.mulf %476, %443 : vector<1x16xf32>
    %480 = arith.mulf %475, %477 : vector<1x16xf32>
    %481 = arith.addf %479, %480 : vector<1x16xf32>
    %482 = math.tanh %481 : vector<1x16xf32>
    %483 = arith.mulf %478, %482 : vector<1x16xf32>
    %484 = tpu.concatenate %483, %465 in 1 : vector<1x16xf32>, vector<1x16xf32> -> vector<1x32xf32>
    %cst_88 = arith.constant dense<0.000000e+00> : vector<1x128xf32>
    %485 = tpu.matmul %484, %7, %cst_88 {dimension_numbers = #tpu.dot_dimension_numbers<[1], [0], [0], [1], [0, 0, 1, 1], [], []>} : vector<1x32xf32>, vector<32x128xf32>, vector<1x128xf32> -> vector<1x128xf32>
    %486 = vector.extract_strided_slice %485 {offsets = [0, 0], sizes = [1, 64], strides = [1, 1]} : vector<1x128xf32> to vector<1x64xf32>
    %487 = vector.extract_strided_slice %485 {offsets = [0, 64], sizes = [1, 64], strides = [1, 1]} : vector<1x128xf32> to vector<1x64xf32>
    %488 = arith.addf %487, %8 : vector<1x64xf32>
    %489 = arith.negf %488 : vector<1x64xf32>
    %490 = math.exp %489 : vector<1x64xf32>
    %cst_89 = arith.constant 1.000000e+00 : f32
    %491 = vector.broadcast %cst_89 : f32 to vector<1x64xf32>
    %492 = arith.addf %491, %490 : vector<1x64xf32>
    %493 = arith.divf %491, %492 : vector<1x64xf32>
    %494 = math.tanh %488 : vector<1x64xf32>
    %495 = vector.extract_strided_slice %493 {offsets = [0, 0], sizes = [1, 16], strides = [1, 1]} : vector<1x64xf32> to vector<1x16xf32>
    %496 = vector.extract_strided_slice %493 {offsets = [0, 16], sizes = [1, 16], strides = [1, 1]} : vector<1x64xf32> to vector<1x16xf32>
    %497 = vector.extract_strided_slice %494 {offsets = [0, 32], sizes = [1, 16], strides = [1, 1]} : vector<1x64xf32> to vector<1x16xf32>
    %498 = vector.extract_strided_slice %493 {offsets = [0, 48], sizes = [1, 16], strides = [1, 1]} : vector<1x64xf32> to vector<1x16xf32>
    %499 = arith.mulf %496, %463 : vector<1x16xf32>
    %500 = arith.mulf %495, %497 : vector<1x16xf32>
    %501 = arith.addf %499, %500 : vector<1x16xf32>
    %502 = math.tanh %501 : vector<1x16xf32>
    %503 = arith.mulf %498, %502 : vector<1x16xf32>
    %c12_90 = arith.constant 12 : index
    %c0_91 = arith.constant 0 : index
    %504 = vector.load %arg11[%c12_90, %c0_91] : memref<16x16xf32, #tpu.memory_space<vmem>>, vector<1x16xf32>
    tpu.vector_store %arg11[%c12_90, %c0_91], %503 {strides = array<i32>} : memref<16x16xf32, #tpu.memory_space<vmem>>, vector<1x16xf32>,
    %c13 = arith.constant 13 : index
    %c0_92 = arith.constant 0 : index
    %505 = vector.load %arg10[%c13, %c0_92] : memref<16x64xf32, #tpu.memory_space<vmem>>, vector<1x64xf32>
    %506 = arith.addf %505, %486 : vector<1x64xf32>
    %507 = arith.negf %506 : vector<1x64xf32>
    %508 = math.exp %507 : vector<1x64xf32>
    %cst_93 = arith.constant 1.000000e+00 : f32
    %509 = vector.broadcast %cst_93 : f32 to vector<1x64xf32>
    %510 = arith.addf %509, %508 : vector<1x64xf32>
    %511 = arith.divf %509, %510 : vector<1x64xf32>
    %512 = math.tanh %506 : vector<1x64xf32>
    %513 = vector.extract_strided_slice %511 {offsets = [0, 0], sizes = [1, 16], strides = [1, 1]} : vector<1x64xf32> to vector<1x16xf32>
    %514 = vector.extract_strided_slice %511 {offsets = [0, 16], sizes = [1, 16], strides = [1, 1]} : vector<1x64xf32> to vector<1x16xf32>
    %515 = vector.extract_strided_slice %512 {offsets = [0, 32], sizes = [1, 16], strides = [1, 1]} : vector<1x64xf32> to vector<1x16xf32>
    %516 = vector.extract_strided_slice %511 {offsets = [0, 48], sizes = [1, 16], strides = [1, 1]} : vector<1x64xf32> to vector<1x16xf32>
    %517 = arith.mulf %514, %481 : vector<1x16xf32>
    %518 = arith.mulf %513, %515 : vector<1x16xf32>
    %519 = arith.addf %517, %518 : vector<1x16xf32>
    %520 = math.tanh %519 : vector<1x16xf32>
    %521 = arith.mulf %516, %520 : vector<1x16xf32>
    %522 = tpu.concatenate %521, %503 in 1 : vector<1x16xf32>, vector<1x16xf32> -> vector<1x32xf32>
    %cst_94 = arith.constant dense<0.000000e+00> : vector<1x128xf32>
    %523 = tpu.matmul %522, %7, %cst_94 {dimension_numbers = #tpu.dot_dimension_numbers<[1], [0], [0], [1], [0, 0, 1, 1], [], []>} : vector<1x32xf32>, vector<32x128xf32>, vector<1x128xf32> -> vector<1x128xf32>
    %524 = vector.extract_strided_slice %523 {offsets = [0, 0], sizes = [1, 64], strides = [1, 1]} : vector<1x128xf32> to vector<1x64xf32>
    %525 = vector.extract_strided_slice %523 {offsets = [0, 64], sizes = [1, 64], strides = [1, 1]} : vector<1x128xf32> to vector<1x64xf32>
    %526 = arith.addf %525, %8 : vector<1x64xf32>
    %527 = arith.negf %526 : vector<1x64xf32>
    %528 = math.exp %527 : vector<1x64xf32>
    %cst_95 = arith.constant 1.000000e+00 : f32
    %529 = vector.broadcast %cst_95 : f32 to vector<1x64xf32>
    %530 = arith.addf %529, %528 : vector<1x64xf32>
    %531 = arith.divf %529, %530 : vector<1x64xf32>
    %532 = math.tanh %526 : vector<1x64xf32>
    %533 = vector.extract_strided_slice %531 {offsets = [0, 0], sizes = [1, 16], strides = [1, 1]} : vector<1x64xf32> to vector<1x16xf32>
    %534 = vector.extract_strided_slice %531 {offsets = [0, 16], sizes = [1, 16], strides = [1, 1]} : vector<1x64xf32> to vector<1x16xf32>
    %535 = vector.extract_strided_slice %532 {offsets = [0, 32], sizes = [1, 16], strides = [1, 1]} : vector<1x64xf32> to vector<1x16xf32>
    %536 = vector.extract_strided_slice %531 {offsets = [0, 48], sizes = [1, 16], strides = [1, 1]} : vector<1x64xf32> to vector<1x16xf32>
    %537 = arith.mulf %534, %501 : vector<1x16xf32>
    %538 = arith.mulf %533, %535 : vector<1x16xf32>
    %539 = arith.addf %537, %538 : vector<1x16xf32>
    %540 = math.tanh %539 : vector<1x16xf32>
    %541 = arith.mulf %536, %540 : vector<1x16xf32>
    %c13_96 = arith.constant 13 : index
    %c0_97 = arith.constant 0 : index
    %542 = vector.load %arg11[%c13_96, %c0_97] : memref<16x16xf32, #tpu.memory_space<vmem>>, vector<1x16xf32>
    tpu.vector_store %arg11[%c13_96, %c0_97], %541 {strides = array<i32>} : memref<16x16xf32, #tpu.memory_space<vmem>>, vector<1x16xf32>,
    %c14 = arith.constant 14 : index
    %c0_98 = arith.constant 0 : index
    %543 = vector.load %arg10[%c14, %c0_98] : memref<16x64xf32, #tpu.memory_space<vmem>>, vector<1x64xf32>
    %544 = arith.addf %543, %524 : vector<1x64xf32>
    %545 = arith.negf %544 : vector<1x64xf32>
    %546 = math.exp %545 : vector<1x64xf32>
    %cst_99 = arith.constant 1.000000e+00 : f32
    %547 = vector.broadcast %cst_99 : f32 to vector<1x64xf32>
    %548 = arith.addf %547, %546 : vector<1x64xf32>
    %549 = arith.divf %547, %548 : vector<1x64xf32>
    %550 = math.tanh %544 : vector<1x64xf32>
    %551 = vector.extract_strided_slice %549 {offsets = [0, 0], sizes = [1, 16], strides = [1, 1]} : vector<1x64xf32> to vector<1x16xf32>
    %552 = vector.extract_strided_slice %549 {offsets = [0, 16], sizes = [1, 16], strides = [1, 1]} : vector<1x64xf32> to vector<1x16xf32>
    %553 = vector.extract_strided_slice %550 {offsets = [0, 32], sizes = [1, 16], strides = [1, 1]} : vector<1x64xf32> to vector<1x16xf32>
    %554 = vector.extract_strided_slice %549 {offsets = [0, 48], sizes = [1, 16], strides = [1, 1]} : vector<1x64xf32> to vector<1x16xf32>
    %555 = arith.mulf %552, %519 : vector<1x16xf32>
    %556 = arith.mulf %551, %553 : vector<1x16xf32>
    %557 = arith.addf %555, %556 : vector<1x16xf32>
    %558 = math.tanh %557 : vector<1x16xf32>
    %559 = arith.mulf %554, %558 : vector<1x16xf32>
    %560 = tpu.concatenate %559, %541 in 1 : vector<1x16xf32>, vector<1x16xf32> -> vector<1x32xf32>
    %cst_100 = arith.constant dense<0.000000e+00> : vector<1x128xf32>
    %561 = tpu.matmul %560, %7, %cst_100 {dimension_numbers = #tpu.dot_dimension_numbers<[1], [0], [0], [1], [0, 0, 1, 1], [], []>} : vector<1x32xf32>, vector<32x128xf32>, vector<1x128xf32> -> vector<1x128xf32>
    %562 = vector.extract_strided_slice %561 {offsets = [0, 0], sizes = [1, 64], strides = [1, 1]} : vector<1x128xf32> to vector<1x64xf32>
    %563 = vector.extract_strided_slice %561 {offsets = [0, 64], sizes = [1, 64], strides = [1, 1]} : vector<1x128xf32> to vector<1x64xf32>
    %564 = arith.addf %563, %8 : vector<1x64xf32>
    %565 = arith.negf %564 : vector<1x64xf32>
    %566 = math.exp %565 : vector<1x64xf32>
    %cst_101 = arith.constant 1.000000e+00 : f32
    %567 = vector.broadcast %cst_101 : f32 to vector<1x64xf32>
    %568 = arith.addf %567, %566 : vector<1x64xf32>
    %569 = arith.divf %567, %568 : vector<1x64xf32>
    %570 = math.tanh %564 : vector<1x64xf32>
    %571 = vector.extract_strided_slice %569 {offsets = [0, 0], sizes = [1, 16], strides = [1, 1]} : vector<1x64xf32> to vector<1x16xf32>
    %572 = vector.extract_strided_slice %569 {offsets = [0, 16], sizes = [1, 16], strides = [1, 1]} : vector<1x64xf32> to vector<1x16xf32>
    %573 = vector.extract_strided_slice %570 {offsets = [0, 32], sizes = [1, 16], strides = [1, 1]} : vector<1x64xf32> to vector<1x16xf32>
    %574 = vector.extract_strided_slice %569 {offsets = [0, 48], sizes = [1, 16], strides = [1, 1]} : vector<1x64xf32> to vector<1x16xf32>
    %575 = arith.mulf %572, %539 : vector<1x16xf32>
    %576 = arith.mulf %571, %573 : vector<1x16xf32>
    %577 = arith.addf %575, %576 : vector<1x16xf32>
    %578 = math.tanh %577 : vector<1x16xf32>
    %579 = arith.mulf %574, %578 : vector<1x16xf32>
    %c14_102 = arith.constant 14 : index
    %c0_103 = arith.constant 0 : index
    %580 = vector.load %arg11[%c14_102, %c0_103] : memref<16x16xf32, #tpu.memory_space<vmem>>, vector<1x16xf32>
    tpu.vector_store %arg11[%c14_102, %c0_103], %579 {strides = array<i32>} : memref<16x16xf32, #tpu.memory_space<vmem>>, vector<1x16xf32>,
    %c15 = arith.constant 15 : index
    %c0_104 = arith.constant 0 : index
    %581 = vector.load %arg10[%c15, %c0_104] : memref<16x64xf32, #tpu.memory_space<vmem>>, vector<1x64xf32>
    %582 = arith.addf %581, %562 : vector<1x64xf32>
    %583 = arith.negf %582 : vector<1x64xf32>
    %584 = math.exp %583 : vector<1x64xf32>
    %cst_105 = arith.constant 1.000000e+00 : f32
    %585 = vector.broadcast %cst_105 : f32 to vector<1x64xf32>
    %586 = arith.addf %585, %584 : vector<1x64xf32>
    %587 = arith.divf %585, %586 : vector<1x64xf32>
    %588 = math.tanh %582 : vector<1x64xf32>
    %589 = vector.extract_strided_slice %587 {offsets = [0, 0], sizes = [1, 16], strides = [1, 1]} : vector<1x64xf32> to vector<1x16xf32>
    %590 = vector.extract_strided_slice %587 {offsets = [0, 16], sizes = [1, 16], strides = [1, 1]} : vector<1x64xf32> to vector<1x16xf32>
    %591 = vector.extract_strided_slice %588 {offsets = [0, 32], sizes = [1, 16], strides = [1, 1]} : vector<1x64xf32> to vector<1x16xf32>
    %592 = vector.extract_strided_slice %587 {offsets = [0, 48], sizes = [1, 16], strides = [1, 1]} : vector<1x64xf32> to vector<1x16xf32>
    %593 = arith.mulf %590, %557 : vector<1x16xf32>
    %594 = arith.mulf %589, %591 : vector<1x16xf32>
    %595 = arith.addf %593, %594 : vector<1x16xf32>
    %596 = math.tanh %595 : vector<1x16xf32>
    %597 = arith.mulf %592, %596 : vector<1x16xf32>
    %598 = tpu.concatenate %597, %579 in 1 : vector<1x16xf32>, vector<1x16xf32> -> vector<1x32xf32>
    %cst_106 = arith.constant dense<0.000000e+00> : vector<1x128xf32>
    %599 = tpu.matmul %598, %7, %cst_106 {dimension_numbers = #tpu.dot_dimension_numbers<[1], [0], [0], [1], [0, 0, 1, 1], [], []>} : vector<1x32xf32>, vector<32x128xf32>, vector<1x128xf32> -> vector<1x128xf32>
    %600 = vector.extract_strided_slice %599 {offsets = [0, 64], sizes = [1, 64], strides = [1, 1]} : vector<1x128xf32> to vector<1x64xf32>
    %601 = arith.addf %600, %8 : vector<1x64xf32>
    %602 = arith.negf %601 : vector<1x64xf32>
    %603 = math.exp %602 : vector<1x64xf32>
    %cst_107 = arith.constant 1.000000e+00 : f32
    %604 = vector.broadcast %cst_107 : f32 to vector<1x64xf32>
    %605 = arith.addf %604, %603 : vector<1x64xf32>
    %606 = arith.divf %604, %605 : vector<1x64xf32>
    %607 = math.tanh %601 : vector<1x64xf32>
    %608 = vector.extract_strided_slice %606 {offsets = [0, 0], sizes = [1, 16], strides = [1, 1]} : vector<1x64xf32> to vector<1x16xf32>
    %609 = vector.extract_strided_slice %606 {offsets = [0, 16], sizes = [1, 16], strides = [1, 1]} : vector<1x64xf32> to vector<1x16xf32>
    %610 = vector.extract_strided_slice %607 {offsets = [0, 32], sizes = [1, 16], strides = [1, 1]} : vector<1x64xf32> to vector<1x16xf32>
    %611 = vector.extract_strided_slice %606 {offsets = [0, 48], sizes = [1, 16], strides = [1, 1]} : vector<1x64xf32> to vector<1x16xf32>
    %612 = arith.mulf %609, %577 : vector<1x16xf32>
    %613 = arith.mulf %608, %610 : vector<1x16xf32>
    %614 = arith.addf %612, %613 : vector<1x16xf32>
    %615 = math.tanh %614 : vector<1x16xf32>
    %616 = arith.mulf %611, %615 : vector<1x16xf32>
    %c15_108 = arith.constant 15 : index
    %c0_109 = arith.constant 0 : index
    %617 = vector.load %arg11[%c15_108, %c0_109] : memref<16x16xf32, #tpu.memory_space<vmem>>, vector<1x16xf32>
    tpu.vector_store %arg11[%c15_108, %c0_109], %616 {strides = array<i32>} : memref<16x16xf32, #tpu.memory_space<vmem>>, vector<1x16xf32>,
    %c0_110 = arith.constant 0 : index
    %c0_111 = arith.constant 0 : index
    %618 = vector.load %arg11[%c0_110, %c0_111] : memref<16x16xf32, #tpu.memory_space<vmem>>, vector<1x16xf32>
    %c0_112 = arith.constant 0 : index
    %c0_113 = arith.constant 0 : index
    %619 = vector.load %arg12[%c0_112, %c0_113] : memref<2x128xf32, #tpu.memory_space<vmem>>, vector<1x16xf32>
    tpu.vector_store %arg12[%c0_112, %c0_113], %618 {strides = array<i32>} : memref<2x128xf32, #tpu.memory_space<vmem>>, vector<1x16xf32>,
    %c1_114 = arith.constant 1 : index
    %c0_115 = arith.constant 0 : index
    %620 = vector.load %arg11[%c1_114, %c0_115] : memref<16x16xf32, #tpu.memory_space<vmem>>, vector<1x16xf32>
    %c0_116 = arith.constant 0 : index
    %c16 = arith.constant 16 : index
    %621 = vector.load %arg12[%c0_116, %c16] : memref<2x128xf32, #tpu.memory_space<vmem>>, vector<1x16xf32>
    tpu.vector_store %arg12[%c0_116, %c16], %620 {strides = array<i32>} : memref<2x128xf32, #tpu.memory_space<vmem>>, vector<1x16xf32>,
    %c2_117 = arith.constant 2 : index
    %c0_118 = arith.constant 0 : index
    %622 = vector.load %arg11[%c2_117, %c0_118] : memref<16x16xf32, #tpu.memory_space<vmem>>, vector<1x16xf32>
    %c0_119 = arith.constant 0 : index
    %c32 = arith.constant 32 : index
    %623 = vector.load %arg12[%c0_119, %c32] : memref<2x128xf32, #tpu.memory_space<vmem>>, vector<1x16xf32>
    tpu.vector_store %arg12[%c0_119, %c32], %622 {strides = array<i32>} : memref<2x128xf32, #tpu.memory_space<vmem>>, vector<1x16xf32>,
    %c3_120 = arith.constant 3 : index
    %c0_121 = arith.constant 0 : index
    %624 = vector.load %arg11[%c3_120, %c0_121] : memref<16x16xf32, #tpu.memory_space<vmem>>, vector<1x16xf32>
    %c0_122 = arith.constant 0 : index
    %c48 = arith.constant 48 : index
    %625 = vector.load %arg12[%c0_122, %c48] : memref<2x128xf32, #tpu.memory_space<vmem>>, vector<1x16xf32>
    tpu.vector_store %arg12[%c0_122, %c48], %624 {strides = array<i32>} : memref<2x128xf32, #tpu.memory_space<vmem>>, vector<1x16xf32>,
    %c4_123 = arith.constant 4 : index
    %c0_124 = arith.constant 0 : index
    %626 = vector.load %arg11[%c4_123, %c0_124] : memref<16x16xf32, #tpu.memory_space<vmem>>, vector<1x16xf32>
    %c0_125 = arith.constant 0 : index
    %c64 = arith.constant 64 : index
    %627 = vector.load %arg12[%c0_125, %c64] : memref<2x128xf32, #tpu.memory_space<vmem>>, vector<1x16xf32>
    tpu.vector_store %arg12[%c0_125, %c64], %626 {strides = array<i32>} : memref<2x128xf32, #tpu.memory_space<vmem>>, vector<1x16xf32>,
    %c5_126 = arith.constant 5 : index
    %c0_127 = arith.constant 0 : index
    %628 = vector.load %arg11[%c5_126, %c0_127] : memref<16x16xf32, #tpu.memory_space<vmem>>, vector<1x16xf32>
    %c0_128 = arith.constant 0 : index
    %c80 = arith.constant 80 : index
    %629 = vector.load %arg12[%c0_128, %c80] : memref<2x128xf32, #tpu.memory_space<vmem>>, vector<1x16xf32>
    tpu.vector_store %arg12[%c0_128, %c80], %628 {strides = array<i32>} : memref<2x128xf32, #tpu.memory_space<vmem>>, vector<1x16xf32>,
    %c6_129 = arith.constant 6 : index
    %c0_130 = arith.constant 0 : index
    %630 = vector.load %arg11[%c6_129, %c0_130] : memref<16x16xf32, #tpu.memory_space<vmem>>, vector<1x16xf32>
    %c0_131 = arith.constant 0 : index
    %c96 = arith.constant 96 : index
    %631 = vector.load %arg12[%c0_131, %c96] : memref<2x128xf32, #tpu.memory_space<vmem>>, vector<1x16xf32>
    tpu.vector_store %arg12[%c0_131, %c96], %630 {strides = array<i32>} : memref<2x128xf32, #tpu.memory_space<vmem>>, vector<1x16xf32>,
    %c7_132 = arith.constant 7 : index
    %c0_133 = arith.constant 0 : index
    %632 = vector.load %arg11[%c7_132, %c0_133] : memref<16x16xf32, #tpu.memory_space<vmem>>, vector<1x16xf32>
    %c0_134 = arith.constant 0 : index
    %c112 = arith.constant 112 : index
    %633 = vector.load %arg12[%c0_134, %c112] : memref<2x128xf32, #tpu.memory_space<vmem>>, vector<1x16xf32>
    tpu.vector_store %arg12[%c0_134, %c112], %632 {strides = array<i32>} : memref<2x128xf32, #tpu.memory_space<vmem>>, vector<1x16xf32>,
    %c8_135 = arith.constant 8 : index
    %c0_136 = arith.constant 0 : index
    %634 = vector.load %arg11[%c8_135, %c0_136] : memref<16x16xf32, #tpu.memory_space<vmem>>, vector<1x16xf32>
    %c1_137 = arith.constant 1 : index
    %c0_138 = arith.constant 0 : index
    %635 = vector.load %arg12[%c1_137, %c0_138] : memref<2x128xf32, #tpu.memory_space<vmem>>, vector<1x16xf32>
    tpu.vector_store %arg12[%c1_137, %c0_138], %634 {strides = array<i32>} : memref<2x128xf32, #tpu.memory_space<vmem>>, vector<1x16xf32>,
    %c9_139 = arith.constant 9 : index
    %c0_140 = arith.constant 0 : index
    %636 = vector.load %arg11[%c9_139, %c0_140] : memref<16x16xf32, #tpu.memory_space<vmem>>, vector<1x16xf32>
    %c1_141 = arith.constant 1 : index
    %c16_142 = arith.constant 16 : index
    %637 = vector.load %arg12[%c1_141, %c16_142] : memref<2x128xf32, #tpu.memory_space<vmem>>, vector<1x16xf32>
    tpu.vector_store %arg12[%c1_141, %c16_142], %636 {strides = array<i32>} : memref<2x128xf32, #tpu.memory_space<vmem>>, vector<1x16xf32>,
    %c10_143 = arith.constant 10 : index
    %c0_144 = arith.constant 0 : index
    %638 = vector.load %arg11[%c10_143, %c0_144] : memref<16x16xf32, #tpu.memory_space<vmem>>, vector<1x16xf32>
    %c1_145 = arith.constant 1 : index
    %c32_146 = arith.constant 32 : index
    %639 = vector.load %arg12[%c1_145, %c32_146] : memref<2x128xf32, #tpu.memory_space<vmem>>, vector<1x16xf32>
    tpu.vector_store %arg12[%c1_145, %c32_146], %638 {strides = array<i32>} : memref<2x128xf32, #tpu.memory_space<vmem>>, vector<1x16xf32>,
    %c11_147 = arith.constant 11 : index
    %c0_148 = arith.constant 0 : index
    %640 = vector.load %arg11[%c11_147, %c0_148] : memref<16x16xf32, #tpu.memory_space<vmem>>, vector<1x16xf32>
    %c1_149 = arith.constant 1 : index
    %c48_150 = arith.constant 48 : index
    %641 = vector.load %arg12[%c1_149, %c48_150] : memref<2x128xf32, #tpu.memory_space<vmem>>, vector<1x16xf32>
    tpu.vector_store %arg12[%c1_149, %c48_150], %640 {strides = array<i32>} : memref<2x128xf32, #tpu.memory_space<vmem>>, vector<1x16xf32>,
    %c12_151 = arith.constant 12 : index
    %c0_152 = arith.constant 0 : index
    %642 = vector.load %arg11[%c12_151, %c0_152] : memref<16x16xf32, #tpu.memory_space<vmem>>, vector<1x16xf32>
    %c1_153 = arith.constant 1 : index
    %c64_154 = arith.constant 64 : index
    %643 = vector.load %arg12[%c1_153, %c64_154] : memref<2x128xf32, #tpu.memory_space<vmem>>, vector<1x16xf32>
    tpu.vector_store %arg12[%c1_153, %c64_154], %642 {strides = array<i32>} : memref<2x128xf32, #tpu.memory_space<vmem>>, vector<1x16xf32>,
    %c13_155 = arith.constant 13 : index
    %c0_156 = arith.constant 0 : index
    %644 = vector.load %arg11[%c13_155, %c0_156] : memref<16x16xf32, #tpu.memory_space<vmem>>, vector<1x16xf32>
    %c1_157 = arith.constant 1 : index
    %c80_158 = arith.constant 80 : index
    %645 = vector.load %arg12[%c1_157, %c80_158] : memref<2x128xf32, #tpu.memory_space<vmem>>, vector<1x16xf32>
    tpu.vector_store %arg12[%c1_157, %c80_158], %644 {strides = array<i32>} : memref<2x128xf32, #tpu.memory_space<vmem>>, vector<1x16xf32>,
    %c14_159 = arith.constant 14 : index
    %c0_160 = arith.constant 0 : index
    %646 = vector.load %arg11[%c14_159, %c0_160] : memref<16x16xf32, #tpu.memory_space<vmem>>, vector<1x16xf32>
    %c1_161 = arith.constant 1 : index
    %c96_162 = arith.constant 96 : index
    %647 = vector.load %arg12[%c1_161, %c96_162] : memref<2x128xf32, #tpu.memory_space<vmem>>, vector<1x16xf32>
    tpu.vector_store %arg12[%c1_161, %c96_162], %646 {strides = array<i32>} : memref<2x128xf32, #tpu.memory_space<vmem>>, vector<1x16xf32>,
    %c15_163 = arith.constant 15 : index
    %c0_164 = arith.constant 0 : index
    %648 = vector.load %arg11[%c15_163, %c0_164] : memref<16x16xf32, #tpu.memory_space<vmem>>, vector<1x16xf32>
    %c1_165 = arith.constant 1 : index
    %c112_166 = arith.constant 112 : index
    %649 = vector.load %arg12[%c1_165, %c112_166] : memref<2x128xf32, #tpu.memory_space<vmem>>, vector<1x16xf32>
    tpu.vector_store %arg12[%c1_165, %c112_166], %648 {strides = array<i32>} : memref<2x128xf32, #tpu.memory_space<vmem>>, vector<1x16xf32>,
    %c0_167 = arith.constant 0 : index
    %c0_168 = arith.constant 0 : index
    %650 = vector.load %arg12[%c0_167, %c0_168] : memref<2x128xf32, #tpu.memory_space<vmem>>, vector<2x128xf32>
    %c0_169 = arith.constant 0 : index
    %c0_170 = arith.constant 0 : index
    %651 = vector.load %arg5[%c0_169, %c0_170] : memref<128x32xf32, #tpu.memory_space<vmem>>, vector<128x32xf32>
    %cst_171 = arith.constant dense<0.000000e+00> : vector<2x32xf32>
    %652 = tpu.matmul %650, %651, %cst_171 {dimension_numbers = #tpu.dot_dimension_numbers<[1], [0], [0], [1], [0, 0, 1, 1], [], []>} : vector<2x128xf32>, vector<128x32xf32>, vector<2x32xf32> -> vector<2x32xf32>
    %c0_172 = arith.constant 0 : index
    %c0_173 = arith.constant 0 : index
    %653 = vector.load %arg6[%c0_172, %c0_173] : memref<1x32xf32, #tpu.memory_space<vmem>>, vector<1x32xf32>
    %654 = vector.broadcast %653 : vector<1x32xf32> to vector<2x32xf32>
    %655 = arith.addf %652, %654 : vector<2x32xf32>
    %c0_174 = arith.constant 0 : index
    %c0_175 = arith.constant 0 : index
    %656 = vector.load %arg7[%c0_174, %c0_175] : memref<32x6xf32, #tpu.memory_space<vmem>>, vector<32x6xf32>
    %cst_176 = arith.constant dense<0.000000e+00> : vector<2x6xf32>
    %657 = tpu.matmul %655, %656, %cst_176 {dimension_numbers = #tpu.dot_dimension_numbers<[1], [0], [0], [1], [0, 0, 1, 1], [], []>} : vector<2x32xf32>, vector<32x6xf32>, vector<2x6xf32> -> vector<2x6xf32>
    %c0_177 = arith.constant 0 : index
    %c0_178 = arith.constant 0 : index
    %658 = vector.load %arg8[%c0_177, %c0_178] : memref<1x6xf32, #tpu.memory_space<vmem>>, vector<1x6xf32>
    %659 = vector.broadcast %658 : vector<1x6xf32> to vector<2x6xf32>
    %660 = arith.addf %657, %659 : vector<2x6xf32>
    %c0_179 = arith.constant 0 : index
    %c0_180 = arith.constant 0 : index
    %661 = vector.load %arg9[%c0_179, %c0_180] : memref<2x6xf32, #tpu.memory_space<vmem>>, vector<2x6xf32>
    tpu.vector_store %arg9[%c0_179, %c0_180], %660 {strides = array<i32>} : memref<2x6xf32, #tpu.memory_space<vmem>>, vector<2x6xf32>,
    return
  }
}

</mosaic_0001>

<bundles_post_ra>
// kernel: lstm_model_forward.1
= control target key start
LH: loop header
LB: loop body
LE: loop exit
PB: predicated region body
PF: predicated region fallthrough
CT: control target
= control target key end

     0   :  { %vm49_vm0 = vcmask 1043456   ;;  %vm42_vm1 = vcmask 31744   ;;  %vm128_vm2 = vcmask 523264   ;;  %v3397_v19 = vmov 0.0|0.0   ;;  %s3401_s26 = smov 64   ;;  %s3402_s27 = smov 80   ;;  %s3975_s1 = inlined_call_operand.vmem [shape: f32[4,64], index: 1, kind: input, shape index: {}]   ;;  %s3976_s0 = inlined_call_operand.vmem [shape: f32[16,4], index: 0, kind: input, shape index: {}]   ;;  %s3977_s2 = inlined_call_operand.vmem [shape: f32[1,64], index: 2, kind: input, shape index: {}]   ;;  %s3978_s3 = inlined_call_operand.vmem [shape: f32[32,128], index: 3, kind: input, shape index: {}]   ;;  %s3979_s4 = inlined_call_operand.vmem [shape: f32[1,64], index: 4, kind: input, shape index: {}]   ;;  %s3980_s5 = inlined_call_operand.vmem [shape: f32[128,32], index: 5, kind: input, shape index: {}]   ;;  %s3981_s7 = inlined_call_operand.vmem [shape: f32[32,6], index: 7, kind: input, shape index: {}]   ;;  %s3982_s6 = inlined_call_operand.vmem [shape: f32[1,32], index: 6, kind: input, shape index: {}]   ;;  %s3983_s8 = inlined_call_operand.vmem [shape: f32[1,6], index: 8, kind: input, shape index: {}]   ;;  %s3984_s9 = inlined_call_operand.vmem [shape: f32[2,6], index: 9, kind: output, shape index: {}]  }
   0x1   :  { %v34_v0 = vld [vmem:[%s3975_s1] sm:$0xf]  ;;  %v33_v2 = vld [vmem:[%s3976_s0 + $0x8] sm:$0xff]  ;;  %s3395_s1 = smov 96   ;;  %v133_v22 = vld [vmem:[%s3978_s3 + $0x10] sm:$0xff]  ;;  %3015 = vmatprep.subr.bf16.mxu1 %v3397_v19  ;;  %vm3399_vm3 = vmmov 0  }
   0x2   :  { %v32_v1 = vld [vmem:[%s3976_s0] sm:$0xff]  ;;  %2776 = vmatprep.subr.msk.mxu0 %vm49_vm0, %v34_v0  ;;  %s3396_s0 = smov 16   ;;  %v132_v21 = vld [vmem:[%s3978_s3 + $0x8] sm:$0xff]  ;;  %v134_v24 = vld [vmem:[%s3978_s3 + $0x18] sm:$0xff]  ;;  %v3400_v27 = vmov 0.0   ;;  %vm166_vm4 = vcmask 130048  }
   0x3   :  { %2778 = vmatprep.mubr.msk.f32.mxu0 %vm42_vm1, %v32_v1  ;;  %2777 = vmatpush3.msk.msra.mxu0 %vm49_vm0, %v34_v0  ;;  %v2615_v3 = vld [vmem:[%s3977_s2] ss:$0 sm:$0xff]  ;;  %v3489_v25 = vpack.c.bf16 %v134_v24, %v133_v22  ;;  %vm168_vm5 = vcmask 261120   ;;  %vm279_vm6 = vcmask 122880   ;;  %s3404_s28 = smov 112   ;;  %vm2343_vm7 = vcmask 254080  }
   0x4   :  { %2779 = vmatmul.mubr.msk.f32.vlgmr.msra.gmra.mrb[0].mxu0 %vm42_vm1, %v33_v2  ;;  %3003 = vmatprep.subr.bf16.mxu0 %v3397_v19  ;;  %v131_v20 = vld [vmem:[%s3978_s3] sm:$0xff]  ;;  %s3398_s3 = smov 32   ;;  %vm2350_vm8 = vcmask 385280   ;;  %vm2357_vm9 = vcmask 516480   ;;  %vm2364_vm10 = vcmask 647680   ;;  %vm2371_vm11 = vcmask 778880  }
   0x5   :  { %v3483_v23 = vpack.c.bf16 %v132_v21, %v131_v20  ;;  %2789 = vmatprep.mubr.msk.f32.mxu0 %vm3399_vm3, %v3400_v27  ;;  %2811 = vmatprep.mubr.msk.f32.mxu1 %vm3399_vm3, %v3400_v27  ;;  %v2621_v28 = vld [vmem:[%s3979_s4] ss:$0 sm:$0xff]  ;;  %s3403_s4 = smov 48   ;;  %vm2378_vm12 = vcmask 910080   ;;  %vm2385_vm13 = vcmask 1041280   ;;  %vm2609_vm14 = vcmask 41984  }
   0x7   :  { %3005 = vmatpush3.bf16.msra.mxu0 %v3483_v23  ;;  %3017 = vmatpush3.bf16.msra.mxu1 %v3483_v23 }
   0x8   :  { %3006 = vmatprep.subr.bf16.mxu0 %v3397_v19  ;;  %3018 = vmatprep.subr.bf16.mxu1 %v3397_v19 }
   0xb   :  { %3008 = vmatpush3.bf16.msra.mxu0 %v3489_v25  ;;  %3020 = vmatpush3.bf16.msra.mxu1 %v3489_v25 }
   0xc   :  { %3009 = vmatprep.subr.bf16.mxu0 %v3397_v19  ;;  %3027 = vmatprep.subr.bf16.mxu1 %v3397_v19 }
  0xd7   :  { %v2780_v4 = vpop.f32.mrb[0].mxu0 }
  0xd8   :  { %v125_v5 = vadd.f32 %v2780_v4, %v2615_v3  ;;  %v119_v6 = vpop.f32.mrb[1].mxu0 }
  0xd9   :  { %v120_v7 = vadd.f32 %v2615_v3, %v119_v6 }
  0xda   :  { %130 = vst.msk [vmem:[#allocation2 + $0x8] sm:$0xff] %vm128_vm2, %v125_v5 }
  0xdb   :  { %129 = vst.msk [vmem:[#allocation2] sm:$0xff] %vm128_vm2, %v120_v7 }
  0xe2   :  { %v136_v8 = vld [vmem:[#allocation2] sm:$0x1]  ;;  %v281_v35 = vld [vmem:[#allocation2 + $0x1] sm:$0x1]  ;;  %v418_v5 = vld [vmem:[#allocation2 + $0x2] sm:$0x1] }
  0xe3   :  { %3139 = vtanh.f32 %v136_v8  ;;  %v2619_v10 = vmul.f32 -1.442695, %v136_v8 }
  0xe5   :  { %3141 = vpow2.f32 %v2619_v10 }
  0xed   :  { %v3140_v9 = vpop.eup %3139 }
  0xee   :  { %147 = vrot.lane.b32.xlu0 %v3140_v9, %s3395_s1 }
  0xef   :  { %v3142_v11 = vpop.eup %3141 }
  0xf0   :  { %v141_v12 = vadd.f32 1.0, %v3142_v11 }
  0xf2   :  { %3143 = vrcp.f32 %v141_v12 }
  0xfc   :  { %v3144_v13 = vpop.eup %3143 }
  0xfd   :  { %v145_v16 = vmul.f32 0.0, %v3144_v13 }
 0x160   :  { %v148_v14 = vpop.permute.xlu0 %147 }
 0x161   :  { %v150_v15 = vmul.f32 %v3144_v13, %v148_v14 }
 0x163   :  { %152 = vrot.lane.b32.xlu0 %v150_v15, %s3396_s0 }
 0x167   :  { %247 = vrot.lane.b32.xlu0 %v2621_v28, %s3401_s26 }
 0x1d5   :  { %v153_v17 = vpop.permute.xlu0 %152 }
 0x1d6   :  { %v3469_v18 = vadd.f32 %v153_v17, %v145_v16 }
 0x1d8   :  { %3145 = vtanh.f32 %v3469_v18 }
 0x1d9   :  { %v3516_v33 = vpop.permute.xlu0 %247 }
 0x1e2   :  { %v3146_v26 = vpop.eup %3145 }
 0x1e3   :  { %158 = vrot.lane.b32.xlu1 %v3146_v26, %s3398_s3 }
 0x255   :  { %v159_v29 = vpop.permute.xlu1 %158 }
 0x256   :  { %v161_v30 = vmul.f32 %v3144_v13, %v159_v29 }
 0x258   :  { %163 = vrot.lane.b32.xlu1 %v161_v30, %s3402_s27 }
 0x2ca   :  { %v164_v31 = vpop.permute.xlu1 %163 }
 0x2cb   :  { %v167_v32 = vsel %vm166_vm4, %v164_v31, 0.0 }
 0x2cc   :  { %2790 = vmatmul.mubr.msk.f32.vlgmr.msra.gmra.mrb[2].mxu0 %vm168_vm5, %v167_v32 }
 0x2cd   :  { %3011 = vmatpush3.bf16.msra.mxu0 %v3483_v23  ;;  %2800 = vmatprep.mubr.msk.f32.mxu0 %vm3399_vm3, %v3400_v27 }
 0x2ce   :  { %3012 = vmatprep.subr.bf16.mxu0 %v3397_v19 }
 0x2d1   :  { %3014 = vmatpush3.bf16.msra.mxu0 %v3489_v25 }
 0x2d2   :  { %3021 = vmatprep.subr.bf16.mxu0 %v3397_v19 }
 0x39f   :  { %v238_v34 = vpop.f32.mrb[2].mxu0 }
 0x3a0   :  { %v250_v36 = vadd.f32 %v3516_v33, %v238_v34  ;;  %v282_v37 = vadd.f32 %v281_v35, %v238_v34  ;;  %v2791_v38 = vpop.f32.mrb[3].mxu0 }
 0x3a2   :  { %3147 = vtanh.f32 %v250_v36  ;;  %v2622_v41 = vmul.f32 -1.442695, %v250_v36  ;;  %v2623_v42 = vmul.f32 -1.442695, %v282_v37 }
 0x3a3   :  { %3149 = vtanh.f32 %v282_v37 }
 0x3a4   :  { %3151 = vpow2.f32 %v2622_v41 }
 0x3a5   :  { %3153 = vpow2.f32 %v2623_v42 }
 0x3ac   :  { %v3148_v39 = vpop.eup %3147 }
 0x3ad   :  { %v3150_v40 = vpop.eup %3149  ;;  %260 = vrot.lane.b32.xlu1 %v3148_v39, %s3395_s1 }
 0x3ae   :  { %292 = vrot.lane.b32.xlu0 %v3150_v40, %s3395_s1  ;;  %v3152_v43 = vpop.eup %3151 }
 0x3af   :  { %v3154_v44 = vpop.eup %3153  ;;  %v254_v45 = vadd.f32 1.0, %v3152_v43 }
 0x3b0   :  { %v286_v46 = vadd.f32 1.0, %v3154_v44  ;;  %v555_v44 = vld [vmem:[#allocation2 + $0x3] sm:$0x1] }
 0x3b1   :  { %3155 = vrcp.f32 %v254_v45 }
 0x3b2   :  { %3157 = vrcp.f32 %v286_v46 }
 0x3bb   :  { %v3156_v47 = vpop.eup %3155 }
 0x3bc   :  { %v3158_v49 = vpop.eup %3157  ;;  %v258_v53 = vmul.f32 0.0, %v3156_v47 }
 0x3bd   :  { %v290_v54 = vmul.f32 %v3158_v49, %v3469_v18 }
 0x41f   :  { %v261_v48 = vpop.permute.xlu1 %260 }
 0x420   :  { %v293_v50 = vpop.permute.xlu0 %292  ;;  %v263_v51 = vmul.f32 %v3156_v47, %v261_v48 }
 0x421   :  { %v295_v52 = vmul.f32 %v3158_v49, %v293_v50 }
 0x422   :  { %265 = vrot.lane.b32.xlu1 %v263_v51, %s3396_s0 }
 0x423   :  { %297 = vrot.lane.b32.xlu0 %v295_v52, %s3396_s0 }
 0x494   :  { %v266_v55 = vpop.permute.xlu1 %265 }
 0x495   :  { %v298_v56 = vpop.permute.xlu0 %297  ;;  %v268_v57 = vadd.f32 %v266_v55, %v258_v53 }
 0x496   :  { %v300_v58 = vadd.f32 %v298_v56, %v290_v54 }
 0x497   :  { %3159 = vtanh.f32 %v268_v57 }
 0x498   :  { %3161 = vtanh.f32 %v300_v58 }
 0x4a1   :  { %v3160_v59 = vpop.eup %3159 }
 0x4a2   :  { %v3162_v60 = vpop.eup %3161  ;;  %271 = vrot.lane.b32.xlu1 %v3160_v59, %s3398_s3 }
 0x4a3   :  { %303 = vrot.lane.b32.xlu0 %v3162_v60, %s3398_s3 }
 0x514   :  { %v272_v61 = vpop.permute.xlu1 %271 }
 0x515   :  { %v304_v62 = vpop.permute.xlu0 %303  ;;  %v3526_v63 = vmul.f32 %v3156_v47, %v272_v61 }
 0x516   :  { %v306_v0 = vmul.f32 %v3158_v49, %v304_v62 }
 0x517   :  { %311 = vrot.lane.b32.xlu0 %v3526_v63, %s3398_s3 }
 0x518   :  { %308 = vrot.lane.b32.xlu1 %v306_v0, %s3402_s27 }
 0x589   :  { %v312_v1 = vpop.permute.xlu0 %311 }
 0x58a   :  { %v309_v2 = vpop.permute.xlu1 %308 }
 0x58b   :  { %v314_v3 = vsel %vm166_vm4, %v309_v2, %v312_v1 }
 0x58c   :  { %2801 = vmatmul.mubr.msk.f32.vlgmr.msra.gmra.mrb[4].mxu0 %vm168_vm5, %v314_v3 }
 0x58d   :  { %3023 = vmatpush3.bf16.msra.mxu0 %v3483_v23  ;;  %2822 = vmatprep.mubr.msk.f32.mxu0 %vm3399_vm3, %v3400_v27 }
 0x58e   :  { %3024 = vmatprep.subr.bf16.mxu0 %v3397_v19 }
 0x591   :  { %3026 = vmatpush3.bf16.msra.mxu0 %v3489_v25 }
 0x592   :  { %3033 = vmatprep.subr.bf16.mxu0 %v3397_v19 }
 0x65f   :  { %v384_v4 = vpop.f32.mrb[4].mxu0 }
 0x660   :  { %v388_v6 = vadd.f32 %v384_v4, %v3516_v33  ;;  %v419_v7 = vadd.f32 %v418_v5, %v384_v4  ;;  %v2802_v8 = vpop.f32.mrb[5].mxu0 }
 0x662   :  { %3163 = vtanh.f32 %v388_v6  ;;  %v2625_v11 = vmul.f32 -1.442695, %v388_v6  ;;  %v2626_v12 = vmul.f32 -1.442695, %v419_v7 }
 0x663   :  { %3165 = vtanh.f32 %v419_v7 }
 0x664   :  { %3167 = vpow2.f32 %v2625_v11 }
 0x665   :  { %3169 = vpow2.f32 %v2626_v12 }
 0x66c   :  { %v3164_v9 = vpop.eup %3163 }
 0x66d   :  { %v3166_v10 = vpop.eup %3165  ;;  %398 = vrot.lane.b32.xlu1 %v3164_v9, %s3395_s1 }
 0x66e   :  { %429 = vrot.lane.b32.xlu0 %v3166_v10, %s3395_s1  ;;  %v3168_v13 = vpop.eup %3167 }
 0x66f   :  { %v3170_v14 = vpop.eup %3169  ;;  %v392_v15 = vadd.f32 1.0, %v3168_v13 }
 0x670   :  { %v423_v16 = vadd.f32 1.0, %v3170_v14 }
 0x671   :  { %3171 = vrcp.f32 %v392_v15  ;;  %v692_v15 = vld [vmem:[#allocation2 + $0x4] sm:$0x1] }
 0x672   :  { %3173 = vrcp.f32 %v423_v16 }
 0x67b   :  { %v3172_v17 = vpop.eup %3171 }
 0x67c   :  { %v3174_v20 = vpop.eup %3173  ;;  %v396_v26 = vmul.f32 %v3172_v17, %v268_v57 }
 0x67d   :  { %v427_v28 = vmul.f32 %v3174_v20, %v300_v58 }
 0x6df   :  { %v399_v18 = vpop.permute.xlu1 %398 }
 0x6e0   :  { %v430_v21 = vpop.permute.xlu0 %429  ;;  %v401_v22 = vmul.f32 %v3172_v17, %v399_v18 }
 0x6e1   :  { %v432_v24 = vmul.f32 %v3174_v20, %v430_v21 }
 0x6e2   :  { %403 = vrot.lane.b32.xlu1 %v401_v22, %s3396_s0 }
 0x6e3   :  { %434 = vrot.lane.b32.xlu0 %v432_v24, %s3396_s0 }
 0x754   :  { %v404_v29 = vpop.permute.xlu1 %403 }
 0x755   :  { %v435_v30 = vpop.permute.xlu0 %434  ;;  %v406_v31 = vadd.f32 %v404_v29, %v396_v26 }
 0x756   :  { %v437_v32 = vadd.f32 %v435_v30, %v427_v28 }
 0x757   :  { %3175 = vtanh.f32 %v406_v31 }
 0x758   :  { %3177 = vtanh.f32 %v437_v32 }
 0x761   :  { %v3176_v34 = vpop.eup %3175 }
 0x762   :  { %v3178_v35 = vpop.eup %3177  ;;  %409 = vrot.lane.b32.xlu1 %v3176_v34, %s3398_s3 }
 0x763   :  { %440 = vrot.lane.b32.xlu0 %v3178_v35, %s3398_s3 }
 0x7d4   :  { %v410_v36 = vpop.permute.xlu1 %409 }
 0x7d5   :  { %v441_v37 = vpop.permute.xlu0 %440  ;;  %v3546_v38 = vmul.f32 %v3172_v17, %v410_v36 }
 0x7d6   :  { %v443_v39 = vmul.f32 %v3174_v20, %v441_v37 }
 0x7d7   :  { %448 = vrot.lane.b32.xlu0 %v3546_v38, %s3398_s3 }
 0x7d8   :  { %445 = vrot.lane.b32.xlu1 %v443_v39, %s3402_s27 }
 0x849   :  { %v449_v40 = vpop.permute.xlu0 %448 }
 0x84a   :  { %v446_v41 = vpop.permute.xlu1 %445 }
 0x84b   :  { %v451_v42 = vsel %vm166_vm4, %v446_v41, %v449_v40 }
 0x84c   :  { %2812 = vmatmul.mubr.msk.f32.vlgmr.msra.gmra.mrb[0].mxu1 %vm168_vm5, %v451_v42 }
 0x84d   :  { %3029 = vmatpush3.bf16.msra.mxu1 %v3483_v23  ;;  %2833 = vmatprep.mubr.msk.f32.mxu1 %vm3399_vm3, %v3400_v27 }
 0x84e   :  { %3030 = vmatprep.subr.bf16.mxu1 %v3397_v19 }
 0x851   :  { %3032 = vmatpush3.bf16.msra.mxu1 %v3489_v25 }
 0x852   :  { %3039 = vmatprep.subr.bf16.mxu1 %v3397_v19 }
 0x91f   :  { %v521_v43 = vpop.f32.mrb[0].mxu1 }
 0x920   :  { %v525_v45 = vadd.f32 %v521_v43, %v3516_v33  ;;  %v556_v46 = vadd.f32 %v555_v44, %v521_v43  ;;  %v2813_v47 = vpop.f32.mrb[1].mxu1 }
 0x922   :  { %3179 = vtanh.f32 %v525_v45  ;;  %v2628_v50 = vmul.f32 -1.442695, %v525_v45  ;;  %v2629_v51 = vmul.f32 -1.442695, %v556_v46 }
 0x923   :  { %3181 = vtanh.f32 %v556_v46 }
 0x924   :  { %3183 = vpow2.f32 %v2628_v50 }
 0x925   :  { %3185 = vpow2.f32 %v2629_v51 }
 0x92c   :  { %v3180_v48 = vpop.eup %3179 }
 0x92d   :  { %v3182_v49 = vpop.eup %3181  ;;  %535 = vrot.lane.b32.xlu1 %v3180_v48, %s3395_s1 }
 0x92e   :  { %566 = vrot.lane.b32.xlu0 %v3182_v49, %s3395_s1  ;;  %v3184_v52 = vpop.eup %3183 }
 0x92f   :  { %v3186_v53 = vpop.eup %3185  ;;  %v529_v54 = vadd.f32 1.0, %v3184_v52 }
 0x930   :  { %v560_v55 = vadd.f32 1.0, %v3186_v53 }
 0x931   :  { %3187 = vrcp.f32 %v529_v54 }
 0x932   :  { %3189 = vrcp.f32 %v560_v55  ;;  %v829_v55 = vld [vmem:[#allocation2 + $0x5] sm:$0x1] }
 0x93b   :  { %v3188_v56 = vpop.eup %3187 }
 0x93c   :  { %v3190_v58 = vpop.eup %3189  ;;  %v533_v62 = vmul.f32 %v3188_v56, %v406_v31 }
 0x93d   :  { %v564_v0 = vmul.f32 %v3190_v58, %v437_v32 }
 0x99f   :  { %v536_v57 = vpop.permute.xlu1 %535 }
 0x9a0   :  { %v567_v59 = vpop.permute.xlu0 %566  ;;  %v538_v60 = vmul.f32 %v3188_v56, %v536_v57 }
 0x9a1   :  { %v569_v61 = vmul.f32 %v3190_v58, %v567_v59 }
 0x9a2   :  { %540 = vrot.lane.b32.xlu1 %v538_v60, %s3396_s0 }
 0x9a3   :  { %571 = vrot.lane.b32.xlu0 %v569_v61, %s3396_s0 }
 0xa14   :  { %v541_v1 = vpop.permute.xlu1 %540 }
 0xa15   :  { %v572_v2 = vpop.permute.xlu0 %571  ;;  %v543_v3 = vadd.f32 %v541_v1, %v533_v62 }
 0xa16   :  { %v574_v4 = vadd.f32 %v572_v2, %v564_v0 }
 0xa17   :  { %3191 = vtanh.f32 %v543_v3 }
 0xa18   :  { %3193 = vtanh.f32 %v574_v4 }
 0xa21   :  { %v3192_v5 = vpop.eup %3191 }
 0xa22   :  { %v3194_v6 = vpop.eup %3193  ;;  %546 = vrot.lane.b32.xlu1 %v3192_v5, %s3398_s3 }
 0xa23   :  { %577 = vrot.lane.b32.xlu0 %v3194_v6, %s3398_s3 }
 0xa94   :  { %v547_v7 = vpop.permute.xlu1 %546 }
 0xa95   :  { %v578_v8 = vpop.permute.xlu0 %577  ;;  %v3566_v9 = vmul.f32 %v3188_v56, %v547_v7 }
 0xa96   :  { %v580_v10 = vmul.f32 %v3190_v58, %v578_v8 }
 0xa97   :  { %585 = vrot.lane.b32.xlu0 %v3566_v9, %s3398_s3 }
 0xa98   :  { %582 = vrot.lane.b32.xlu1 %v580_v10, %s3402_s27 }
 0xb09   :  { %v586_v11 = vpop.permute.xlu0 %585 }
 0xb0a   :  { %v583_v12 = vpop.permute.xlu1 %582 }
 0xb0b   :  { %v588_v13 = vsel %vm166_vm4, %v583_v12, %v586_v11 }
 0xb0c   :  { %2823 = vmatmul.mubr.msk.f32.vlgmr.msra.gmra.mrb[6].mxu0 %vm168_vm5, %v588_v13 }
 0xb0d   :  { %3035 = vmatpush3.bf16.msra.mxu0 %v3483_v23  ;;  %2844 = vmatprep.mubr.msk.f32.mxu0 %vm3399_vm3, %v3400_v27 }
 0xb0e   :  { %3036 = vmatprep.subr.bf16.mxu0 %v3397_v19 }
 0xb11   :  { %3038 = vmatpush3.bf16.msra.mxu0 %v3489_v25 }
 0xb12   :  { %3045 = vmatprep.subr.bf16.mxu0 %v3397_v19 }
 0xbdf   :  { %v658_v14 = vpop.f32.mrb[6].mxu0 }
 0xbe0   :  { %v662_v16 = vadd.f32 %v658_v14, %v3516_v33  ;;  %v693_v17 = vadd.f32 %v692_v15, %v658_v14  ;;  %v2824_v18 = vpop.f32.mrb[7].mxu0 }
 0xbe2   :  { %3195 = vtanh.f32 %v662_v16  ;;  %v2631_v22 = vmul.f32 -1.442695, %v662_v16  ;;  %v2632_v24 = vmul.f32 -1.442695, %v693_v17 }
 0xbe3   :  { %3197 = vtanh.f32 %v693_v17 }
 0xbe4   :  { %3199 = vpow2.f32 %v2631_v22 }
 0xbe5   :  { %3201 = vpow2.f32 %v2632_v24 }
 0xbec   :  { %v3196_v20 = vpop.eup %3195 }
 0xbed   :  { %v3198_v21 = vpop.eup %3197  ;;  %672 = vrot.lane.b32.xlu1 %v3196_v20, %s3395_s1 }
 0xbee   :  { %703 = vrot.lane.b32.xlu0 %v3198_v21, %s3395_s1  ;;  %v3200_v26 = vpop.eup %3199 }
 0xbef   :  { %v3202_v28 = vpop.eup %3201  ;;  %v666_v29 = vadd.f32 1.0, %v3200_v26 }
 0xbf0   :  { %v697_v30 = vadd.f32 1.0, %v3202_v28 }
 0xbf1   :  { %3203 = vrcp.f32 %v666_v29 }
 0xbf2   :  { %3205 = vrcp.f32 %v697_v30 }
 0xbfb   :  { %v3204_v31 = vpop.eup %3203 }
 0xbfc   :  { %v3206_v34 = vpop.eup %3205  ;;  %v670_v39 = vmul.f32 %v3204_v31, %v543_v3 }
 0xbfd   :  { %v701_v40 = vmul.f32 %v3206_v34, %v574_v4 }
 0xc5f   :  { %v673_v32 = vpop.permute.xlu1 %672 }
 0xc60   :  { %v704_v35 = vpop.permute.xlu0 %703  ;;  %v675_v36 = vmul.f32 %v3204_v31, %v673_v32 }
 0xc61   :  { %v706_v37 = vmul.f32 %v3206_v34, %v704_v35 }
 0xc62   :  { %677 = vrot.lane.b32.xlu1 %v675_v36, %s3396_s0 }
 0xc63   :  { %708 = vrot.lane.b32.xlu0 %v706_v37, %s3396_s0 }
 0xcd4   :  { %v678_v41 = vpop.permute.xlu1 %677 }
 0xcd5   :  { %v709_v42 = vpop.permute.xlu0 %708  ;;  %v680_v43 = vadd.f32 %v678_v41, %v670_v39 }
 0xcd6   :  { %v711_v44 = vadd.f32 %v709_v42, %v701_v40 }
 0xcd7   :  { %3207 = vtanh.f32 %v680_v43 }
 0xcd8   :  { %3209 = vtanh.f32 %v711_v44 }
 0xce1   :  { %v3208_v45 = vpop.eup %3207 }
 0xce2   :  { %v3210_v46 = vpop.eup %3209  ;;  %683 = vrot.lane.b32.xlu1 %v3208_v45, %s3398_s3 }
 0xce3   :  { %714 = vrot.lane.b32.xlu0 %v3210_v46, %s3398_s3 }
 0xd54   :  { %v684_v47 = vpop.permute.xlu1 %683 }
 0xd55   :  { %v715_v48 = vpop.permute.xlu0 %714  ;;  %v3586_v49 = vmul.f32 %v3204_v31, %v684_v47  ;;  %v966_v31 = vld [vmem:[#allocation2 + $0x6] sm:$0x1] }
 0xd56   :  { %v717_v50 = vmul.f32 %v3206_v34, %v715_v48 }
 0xd57   :  { %722 = vrot.lane.b32.xlu0 %v3586_v49, %s3398_s3 }
 0xd58   :  { %719 = vrot.lane.b32.xlu1 %v717_v50, %s3402_s27 }
 0xdc9   :  { %v723_v51 = vpop.permute.xlu0 %722 }
 0xdca   :  { %v720_v52 = vpop.permute.xlu1 %719 }
 0xdcb   :  { %v725_v53 = vsel %vm166_vm4, %v720_v52, %v723_v51 }
 0xdcc   :  { %2834 = vmatmul.mubr.msk.f32.vlgmr.msra.gmra.mrb[2].mxu1 %vm168_vm5, %v725_v53 }
 0xdcd   :  { %3041 = vmatpush3.bf16.msra.mxu1 %v3483_v23  ;;  %2855 = vmatprep.mubr.msk.f32.mxu1 %vm3399_vm3, %v3400_v27 }
 0xdce   :  { %3042 = vmatprep.subr.bf16.mxu1 %v3397_v19 }
 0xdd1   :  { %3044 = vmatpush3.bf16.msra.mxu1 %v3489_v25 }
 0xdd2   :  { %3051 = vmatprep.subr.bf16.mxu1 %v3397_v19 }
 0xe9f   :  { %v795_v54 = vpop.f32.mrb[2].mxu1 }
 0xea0   :  { %v799_v56 = vadd.f32 %v795_v54, %v3516_v33  ;;  %v830_v57 = vadd.f32 %v829_v55, %v795_v54  ;;  %v2835_v58 = vpop.f32.mrb[3].mxu1 }
 0xea2   :  { %3211 = vtanh.f32 %v799_v56  ;;  %v2634_v61 = vmul.f32 -1.442695, %v799_v56  ;;  %v2635_v62 = vmul.f32 -1.442695, %v830_v57 }
 0xea3   :  { %3213 = vtanh.f32 %v830_v57 }
 0xea4   :  { %3215 = vpow2.f32 %v2634_v61 }
 0xea5   :  { %3217 = vpow2.f32 %v2635_v62 }
 0xeac   :  { %v3212_v59 = vpop.eup %3211 }
 0xead   :  { %v3214_v60 = vpop.eup %3213  ;;  %809 = vrot.lane.b32.xlu1 %v3212_v59, %s3395_s1 }
 0xeae   :  { %840 = vrot.lane.b32.xlu0 %v3214_v60, %s3395_s1  ;;  %v3216_v0 = vpop.eup %3215 }
 0xeaf   :  { %v3218_v1 = vpop.eup %3217  ;;  %v803_v2 = vadd.f32 1.0, %v3216_v0 }
 0xeb0   :  { %v834_v3 = vadd.f32 1.0, %v3218_v1 }
 0xeb1   :  { %3219 = vrcp.f32 %v803_v2 }
 0xeb2   :  { %3221 = vrcp.f32 %v834_v3 }
 0xebb   :  { %v3220_v4 = vpop.eup %3219 }
 0xebc   :  { %v3222_v6 = vpop.eup %3221  ;;  %v807_v11 = vmul.f32 %v3220_v4, %v680_v43 }
 0xebd   :  { %v838_v12 = vmul.f32 %v3222_v6, %v711_v44 }
 0xf1f   :  { %v810_v5 = vpop.permute.xlu1 %809 }
 0xf20   :  { %v841_v7 = vpop.permute.xlu0 %840  ;;  %v812_v8 = vmul.f32 %v3220_v4, %v810_v5  ;;  %v1103_v5 = vld [vmem:[#allocation2 + $0x7] sm:$0x1] }
 0xf21   :  { %v843_v10 = vmul.f32 %v3222_v6, %v841_v7 }
 0xf22   :  { %814 = vrot.lane.b32.xlu1 %v812_v8, %s3396_s0 }
 0xf23   :  { %845 = vrot.lane.b32.xlu0 %v843_v10, %s3396_s0 }
 0xf94   :  { %v815_v13 = vpop.permute.xlu1 %814 }
 0xf95   :  { %v846_v14 = vpop.permute.xlu0 %845  ;;  %v817_v15 = vadd.f32 %v815_v13, %v807_v11 }
 0xf96   :  { %v848_v16 = vadd.f32 %v846_v14, %v838_v12 }
 0xf97   :  { %3223 = vtanh.f32 %v817_v15 }
 0xf98   :  { %3225 = vtanh.f32 %v848_v16 }
 0xfa1   :  { %v3224_v17 = vpop.eup %3223 }
 0xfa2   :  { %v3226_v18 = vpop.eup %3225  ;;  %820 = vrot.lane.b32.xlu1 %v3224_v17, %s3398_s3 }
 0xfa3   :  { %851 = vrot.lane.b32.xlu0 %v3226_v18, %s3398_s3 }
0x1014   :  { %v821_v20 = vpop.permute.xlu1 %820 }
0x1015   :  { %v852_v21 = vpop.permute.xlu0 %851  ;;  %v3606_v22 = vmul.f32 %v3220_v4, %v821_v20 }
0x1016   :  { %v854_v24 = vmul.f32 %v3222_v6, %v852_v21 }
0x1017   :  { %859 = vrot.lane.b32.xlu0 %v3606_v22, %s3398_s3 }
0x1018   :  { %856 = vrot.lane.b32.xlu1 %v854_v24, %s3402_s27 }
0x1089   :  { %v860_v26 = vpop.permute.xlu0 %859 }
0x108a   :  { %v857_v28 = vpop.permute.xlu1 %856 }
0x108b   :  { %v862_v29 = vsel %vm166_vm4, %v857_v28, %v860_v26 }
0x108c   :  { %2845 = vmatmul.mubr.msk.f32.vlgmr.msra.gmra.mrb[8].mxu0 %vm168_vm5, %v862_v29 }
0x108d   :  { %3047 = vmatpush3.bf16.msra.mxu0 %v3483_v23  ;;  %2866 = vmatprep.mubr.msk.f32.mxu0 %vm3399_vm3, %v3400_v27 }
0x108e   :  { %3048 = vmatprep.subr.bf16.mxu0 %v3397_v19 }
0x1091   :  { %3050 = vmatpush3.bf16.msra.mxu0 %v3489_v25 }
0x1092   :  { %3057 = vmatprep.subr.bf16.mxu0 %v3397_v19 }
0x115f   :  { %v932_v30 = vpop.f32.mrb[8].mxu0 }
0x1160   :  { %v936_v32 = vadd.f32 %v932_v30, %v3516_v33  ;;  %v967_v34 = vadd.f32 %v966_v31, %v932_v30  ;;  %v2846_v35 = vpop.f32.mrb[9].mxu0 }
0x1162   :  { %3227 = vtanh.f32 %v936_v32  ;;  %v2637_v39 = vmul.f32 -1.442695, %v936_v32  ;;  %v2638_v40 = vmul.f32 -1.442695, %v967_v34 }
0x1163   :  { %3229 = vtanh.f32 %v967_v34 }
0x1164   :  { %3231 = vpow2.f32 %v2637_v39 }
0x1165   :  { %3233 = vpow2.f32 %v2638_v40 }
0x116c   :  { %v3228_v36 = vpop.eup %3227 }
0x116d   :  { %v3230_v37 = vpop.eup %3229  ;;  %946 = vrot.lane.b32.xlu1 %v3228_v36, %s3395_s1 }
0x116e   :  { %977 = vrot.lane.b32.xlu0 %v3230_v37, %s3395_s1  ;;  %v3232_v41 = vpop.eup %3231 }
0x116f   :  { %v3234_v42 = vpop.eup %3233  ;;  %v940_v43 = vadd.f32 1.0, %v3232_v41 }
0x1170   :  { %v971_v44 = vadd.f32 1.0, %v3234_v42 }
0x1171   :  { %3235 = vrcp.f32 %v940_v43 }
0x1172   :  { %3237 = vrcp.f32 %v971_v44 }
0x117b   :  { %v3236_v45 = vpop.eup %3235 }
0x117c   :  { %v3238_v47 = vpop.eup %3237  ;;  %v944_v52 = vmul.f32 %v3236_v45, %v817_v15 }
0x117d   :  { %v975_v53 = vmul.f32 %v3238_v47, %v848_v16 }
0x11df   :  { %v947_v46 = vpop.permute.xlu1 %946 }
0x11e0   :  { %v978_v48 = vpop.permute.xlu0 %977  ;;  %v949_v50 = vmul.f32 %v3236_v45, %v947_v46 }
0x11e1   :  { %v980_v51 = vmul.f32 %v3238_v47, %v978_v48 }
0x11e2   :  { %951 = vrot.lane.b32.xlu1 %v949_v50, %s3396_s0 }
0x11e3   :  { %982 = vrot.lane.b32.xlu0 %v980_v51, %s3396_s0 }
0x1254   :  { %v952_v54 = vpop.permute.xlu1 %951 }
0x1255   :  { %v983_v55 = vpop.permute.xlu0 %982  ;;  %v954_v56 = vadd.f32 %v952_v54, %v944_v52 }
0x1256   :  { %v985_v57 = vadd.f32 %v983_v55, %v975_v53 }
0x1257   :  { %3239 = vtanh.f32 %v954_v56 }
0x1258   :  { %3241 = vtanh.f32 %v985_v57 }
0x1261   :  { %v3240_v58 = vpop.eup %3239 }
0x1262   :  { %v3242_v59 = vpop.eup %3241  ;;  %957 = vrot.lane.b32.xlu1 %v3240_v58, %s3398_s3 }
0x1263   :  { %988 = vrot.lane.b32.xlu0 %v3242_v59, %s3398_s3 }
0x12d4   :  { %v958_v60 = vpop.permute.xlu1 %957 }
0x12d5   :  { %v989_v61 = vpop.permute.xlu0 %988  ;;  %v3626_v62 = vmul.f32 %v3236_v45, %v958_v60 }
0x12d6   :  { %v991_v0 = vmul.f32 %v3238_v47, %v989_v61  ;;  %v1240_v47 = vld [vmem:[#allocation2 + $0x8] sm:$0x1] }
0x12d7   :  { %996 = vrot.lane.b32.xlu0 %v3626_v62, %s3398_s3 }
0x12d8   :  { %993 = vrot.lane.b32.xlu1 %v991_v0, %s3402_s27 }
0x1349   :  { %v997_v1 = vpop.permute.xlu0 %996 }
0x134a   :  { %v994_v2 = vpop.permute.xlu1 %993 }
0x134b   :  { %v999_v3 = vsel %vm166_vm4, %v994_v2, %v997_v1 }
0x134c   :  { %2856 = vmatmul.mubr.msk.f32.vlgmr.msra.gmra.mrb[4].mxu1 %vm168_vm5, %v999_v3 }
0x134d   :  { %3053 = vmatpush3.bf16.msra.mxu1 %v3483_v23  ;;  %2877 = vmatprep.mubr.msk.f32.mxu1 %vm3399_vm3, %v3400_v27 }
0x134e   :  { %3054 = vmatprep.subr.bf16.mxu1 %v3397_v19 }
0x1351   :  { %3056 = vmatpush3.bf16.msra.mxu1 %v3489_v25 }
0x1352   :  { %3063 = vmatprep.subr.bf16.mxu1 %v3397_v19 }
0x141f   :  { %v1069_v4 = vpop.f32.mrb[4].mxu1 }
0x1420   :  { %v1073_v6 = vadd.f32 %v1069_v4, %v3516_v33  ;;  %v1104_v7 = vadd.f32 %v1103_v5, %v1069_v4  ;;  %v2857_v8 = vpop.f32.mrb[5].mxu1 }
0x1422   :  { %3243 = vtanh.f32 %v1073_v6  ;;  %v2640_v12 = vmul.f32 -1.442695, %v1073_v6  ;;  %v2641_v13 = vmul.f32 -1.442695, %v1104_v7 }
0x1423   :  { %3245 = vtanh.f32 %v1104_v7 }
0x1424   :  { %3247 = vpow2.f32 %v2640_v12 }
0x1425   :  { %3249 = vpow2.f32 %v2641_v13 }
0x142c   :  { %v3244_v10 = vpop.eup %3243 }
0x142d   :  { %v3246_v11 = vpop.eup %3245  ;;  %1083 = vrot.lane.b32.xlu1 %v3244_v10, %s3395_s1 }
0x142e   :  { %1114 = vrot.lane.b32.xlu0 %v3246_v11, %s3395_s1  ;;  %v3248_v14 = vpop.eup %3247 }
0x142f   :  { %v3250_v15 = vpop.eup %3249  ;;  %v1077_v16 = vadd.f32 1.0, %v3248_v14 }
0x1430   :  { %v1108_v17 = vadd.f32 1.0, %v3250_v15 }
0x1431   :  { %3251 = vrcp.f32 %v1077_v16 }
0x1432   :  { %3253 = vrcp.f32 %v1108_v17 }
0x143b   :  { %v3252_v18 = vpop.eup %3251 }
0x143c   :  { %v3254_v21 = vpop.eup %3253  ;;  %v1081_v29 = vmul.f32 %v3252_v18, %v954_v56 }
0x143d   :  { %v1112_v30 = vmul.f32 %v3254_v21, %v985_v57 }
0x149f   :  { %v1084_v20 = vpop.permute.xlu1 %1083 }
0x14a0   :  { %v1115_v24 = vpop.permute.xlu0 %1114  ;;  %v1086_v26 = vmul.f32 %v3252_v18, %v1084_v20 }
0x14a1   :  { %v1117_v28 = vmul.f32 %v3254_v21, %v1115_v24  ;;  %v1377_v24 = vld [vmem:[#allocation2 + $0x9] sm:$0x1] }
0x14a2   :  { %1088 = vrot.lane.b32.xlu1 %v1086_v26, %s3396_s0 }
0x14a3   :  { %1119 = vrot.lane.b32.xlu0 %v1117_v28, %s3396_s0 }
0x1514   :  { %v1089_v31 = vpop.permute.xlu1 %1088 }
0x1515   :  { %v1120_v32 = vpop.permute.xlu0 %1119  ;;  %v1091_v34 = vadd.f32 %v1089_v31, %v1081_v29 }
0x1516   :  { %v1122_v35 = vadd.f32 %v1120_v32, %v1112_v30 }
0x1517   :  { %3255 = vtanh.f32 %v1091_v34 }
0x1518   :  { %3257 = vtanh.f32 %v1122_v35 }
0x1521   :  { %v3256_v36 = vpop.eup %3255 }
0x1522   :  { %v3258_v37 = vpop.eup %3257  ;;  %1094 = vrot.lane.b32.xlu1 %v3256_v36, %s3398_s3 }
0x1523   :  { %1125 = vrot.lane.b32.xlu0 %v3258_v37, %s3398_s3 }
0x1594   :  { %v1095_v39 = vpop.permute.xlu1 %1094 }
0x1595   :  { %v1126_v40 = vpop.permute.xlu0 %1125  ;;  %v3646_v41 = vmul.f32 %v3252_v18, %v1095_v39 }
0x1596   :  { %v1128_v42 = vmul.f32 %v3254_v21, %v1126_v40 }
0x1597   :  { %1133 = vrot.lane.b32.xlu0 %v3646_v41, %s3398_s3 }
0x1598   :  { %1130 = vrot.lane.b32.xlu1 %v1128_v42, %s3402_s27 }
0x1609   :  { %v1134_v43 = vpop.permute.xlu0 %1133 }
0x160a   :  { %v1131_v44 = vpop.permute.xlu1 %1130 }
0x160b   :  { %v1136_v45 = vsel %vm166_vm4, %v1131_v44, %v1134_v43 }
0x160c   :  { %2867 = vmatmul.mubr.msk.f32.vlgmr.msra.gmra.mrb[10].mxu0 %vm168_vm5, %v1136_v45 }
0x160d   :  { %3059 = vmatpush3.bf16.msra.mxu0 %v3483_v23  ;;  %2888 = vmatprep.mubr.msk.f32.mxu0 %vm3399_vm3, %v3400_v27 }
0x160e   :  { %3060 = vmatprep.subr.bf16.mxu0 %v3397_v19 }
0x1611   :  { %3062 = vmatpush3.bf16.msra.mxu0 %v3489_v25 }
0x1612   :  { %3069 = vmatprep.subr.bf16.mxu0 %v3397_v19 }
0x16df   :  { %v1206_v46 = vpop.f32.mrb[10].mxu0 }
0x16e0   :  { %v1210_v48 = vadd.f32 %v1206_v46, %v3516_v33  ;;  %v1241_v50 = vadd.f32 %v1240_v47, %v1206_v46  ;;  %v2868_v51 = vpop.f32.mrb[11].mxu0 }
0x16e2   :  { %3259 = vtanh.f32 %v1210_v48  ;;  %v2643_v54 = vmul.f32 -1.442695, %v1210_v48  ;;  %v2644_v55 = vmul.f32 -1.442695, %v1241_v50 }
0x16e3   :  { %3261 = vtanh.f32 %v1241_v50 }
0x16e4   :  { %3263 = vpow2.f32 %v2643_v54 }
0x16e5   :  { %3265 = vpow2.f32 %v2644_v55 }
0x16ec   :  { %v3260_v52 = vpop.eup %3259 }
0x16ed   :  { %v3262_v53 = vpop.eup %3261  ;;  %1220 = vrot.lane.b32.xlu1 %v3260_v52, %s3395_s1 }
0x16ee   :  { %1251 = vrot.lane.b32.xlu0 %v3262_v53, %s3395_s1  ;;  %v3264_v56 = vpop.eup %3263 }
0x16ef   :  { %v3266_v57 = vpop.eup %3265  ;;  %v1214_v58 = vadd.f32 1.0, %v3264_v56 }
0x16f0   :  { %v1245_v59 = vadd.f32 1.0, %v3266_v57 }
0x16f1   :  { %3267 = vrcp.f32 %v1214_v58 }
0x16f2   :  { %3269 = vrcp.f32 %v1245_v59 }
0x16fb   :  { %v3268_v60 = vpop.eup %3267 }
0x16fc   :  { %v3270_v0 = vpop.eup %3269  ;;  %v1218_v4 = vmul.f32 %v3268_v60, %v1091_v34 }
0x16fd   :  { %v1249_v5 = vmul.f32 %v3270_v0, %v1122_v35 }
0x175f   :  { %v1221_v61 = vpop.permute.xlu1 %1220 }
0x1760   :  { %v1252_v1 = vpop.permute.xlu0 %1251  ;;  %v1223_v2 = vmul.f32 %v3268_v60, %v1221_v61 }
0x1761   :  { %v1254_v3 = vmul.f32 %v3270_v0, %v1252_v1 }
0x1762   :  { %1225 = vrot.lane.b32.xlu1 %v1223_v2, %s3396_s0  ;;  %v1514_v2 = vld [vmem:[#allocation2 + $0xa] sm:$0x1] }
0x1763   :  { %1256 = vrot.lane.b32.xlu0 %v1254_v3, %s3396_s0 }
0x17d4   :  { %v1226_v6 = vpop.permute.xlu1 %1225 }
0x17d5   :  { %v1257_v7 = vpop.permute.xlu0 %1256  ;;  %v1228_v8 = vadd.f32 %v1226_v6, %v1218_v4 }
0x17d6   :  { %v1259_v10 = vadd.f32 %v1257_v7, %v1249_v5 }
0x17d7   :  { %3271 = vtanh.f32 %v1228_v8 }
0x17d8   :  { %3273 = vtanh.f32 %v1259_v10 }
0x17e1   :  { %v3272_v11 = vpop.eup %3271 }
0x17e2   :  { %v3274_v12 = vpop.eup %3273  ;;  %1231 = vrot.lane.b32.xlu1 %v3272_v11, %s3398_s3 }
0x17e3   :  { %1262 = vrot.lane.b32.xlu0 %v3274_v12, %s3398_s3 }
0x1854   :  { %v1232_v13 = vpop.permute.xlu1 %1231 }
0x1855   :  { %v1263_v14 = vpop.permute.xlu0 %1262  ;;  %v3666_v15 = vmul.f32 %v3268_v60, %v1232_v13 }
0x1856   :  { %v1265_v16 = vmul.f32 %v3270_v0, %v1263_v14 }
0x1857   :  { %1270 = vrot.lane.b32.xlu0 %v3666_v15, %s3398_s3 }
0x1858   :  { %1267 = vrot.lane.b32.xlu1 %v1265_v16, %s3402_s27 }
0x18c9   :  { %v1271_v17 = vpop.permute.xlu0 %1270 }
0x18ca   :  { %v1268_v18 = vpop.permute.xlu1 %1267 }
0x18cb   :  { %v1273_v20 = vsel %vm166_vm4, %v1268_v18, %v1271_v17 }
0x18cc   :  { %2878 = vmatmul.mubr.msk.f32.vlgmr.msra.gmra.mrb[6].mxu1 %vm168_vm5, %v1273_v20 }
0x18cd   :  { %3065 = vmatpush3.bf16.msra.mxu1 %v3483_v23  ;;  %2899 = vmatprep.mubr.msk.f32.mxu1 %vm3399_vm3, %v3400_v27 }
0x18ce   :  { %3066 = vmatprep.subr.bf16.mxu1 %v3397_v19 }
0x18d1   :  { %3068 = vmatpush3.bf16.msra.mxu1 %v3489_v25 }
0x18d2   :  { %3075 = vmatprep.subr.bf16.mxu1 %v3397_v19 }
0x199f   :  { %v1343_v21 = vpop.f32.mrb[6].mxu1 }
0x19a0   :  { %v1347_v26 = vadd.f32 %v1343_v21, %v3516_v33  ;;  %v1378_v28 = vadd.f32 %v1377_v24, %v1343_v21  ;;  %v2879_v29 = vpop.f32.mrb[7].mxu1 }
0x19a2   :  { %3275 = vtanh.f32 %v1347_v26  ;;  %v2646_v32 = vmul.f32 -1.442695, %v1347_v26  ;;  %v2647_v34 = vmul.f32 -1.442695, %v1378_v28 }
0x19a3   :  { %3277 = vtanh.f32 %v1378_v28 }
0x19a4   :  { %3279 = vpow2.f32 %v2646_v32 }
0x19a5   :  { %3281 = vpow2.f32 %v2647_v34 }
0x19ac   :  { %v3276_v30 = vpop.eup %3275 }
0x19ad   :  { %v3278_v31 = vpop.eup %3277  ;;  %1357 = vrot.lane.b32.xlu1 %v3276_v30, %s3395_s1 }
0x19ae   :  { %1388 = vrot.lane.b32.xlu0 %v3278_v31, %s3395_s1  ;;  %v3280_v35 = vpop.eup %3279 }
0x19af   :  { %v3282_v36 = vpop.eup %3281  ;;  %v1351_v37 = vadd.f32 1.0, %v3280_v35 }
0x19b0   :  { %v1382_v39 = vadd.f32 1.0, %v3282_v36 }
0x19b1   :  { %3283 = vrcp.f32 %v1351_v37 }
0x19b2   :  { %3285 = vrcp.f32 %v1382_v39 }
0x19bb   :  { %v3284_v40 = vpop.eup %3283 }
0x19bc   :  { %v3286_v43 = vpop.eup %3285  ;;  %v1355_v47 = vmul.f32 %v3284_v40, %v1228_v8 }
0x19bd   :  { %v1386_v48 = vmul.f32 %v3286_v43, %v1259_v10 }
0x1a1f   :  { %v1358_v42 = vpop.permute.xlu1 %1357 }
0x1a20   :  { %v1389_v44 = vpop.permute.xlu0 %1388  ;;  %v1360_v45 = vmul.f32 %v3284_v40, %v1358_v42 }
0x1a21   :  { %v1391_v46 = vmul.f32 %v3286_v43, %v1389_v44 }
0x1a22   :  { %1362 = vrot.lane.b32.xlu1 %v1360_v45, %s3396_s0 }
0x1a23   :  { %1393 = vrot.lane.b32.xlu0 %v1391_v46, %s3396_s0  ;;  %v1651_v46 = vld [vmem:[#allocation2 + $0xb] sm:$0x1] }
0x1a94   :  { %v1363_v50 = vpop.permute.xlu1 %1362 }
0x1a95   :  { %v1394_v51 = vpop.permute.xlu0 %1393  ;;  %v1365_v52 = vadd.f32 %v1363_v50, %v1355_v47 }
0x1a96   :  { %v1396_v53 = vadd.f32 %v1394_v51, %v1386_v48 }
0x1a97   :  { %3287 = vtanh.f32 %v1365_v52 }
0x1a98   :  { %3289 = vtanh.f32 %v1396_v53 }
0x1aa1   :  { %v3288_v54 = vpop.eup %3287 }
0x1aa2   :  { %v3290_v55 = vpop.eup %3289  ;;  %1368 = vrot.lane.b32.xlu1 %v3288_v54, %s3398_s3 }
0x1aa3   :  { %1399 = vrot.lane.b32.xlu0 %v3290_v55, %s3398_s3 }
0x1b14   :  { %v1369_v56 = vpop.permute.xlu1 %1368 }
0x1b15   :  { %v1400_v57 = vpop.permute.xlu0 %1399  ;;  %v3686_v58 = vmul.f32 %v3284_v40, %v1369_v56 }
0x1b16   :  { %v1402_v59 = vmul.f32 %v3286_v43, %v1400_v57 }
0x1b17   :  { %1407 = vrot.lane.b32.xlu0 %v3686_v58, %s3398_s3 }
0x1b18   :  { %1404 = vrot.lane.b32.xlu1 %v1402_v59, %s3402_s27 }
0x1b89   :  { %v1408_v60 = vpop.permute.xlu0 %1407 }
0x1b8a   :  { %v1405_v61 = vpop.permute.xlu1 %1404 }
0x1b8b   :  { %v1410_v0 = vsel %vm166_vm4, %v1405_v61, %v1408_v60 }
0x1b8c   :  { %2889 = vmatmul.mubr.msk.f32.vlgmr.msra.gmra.mrb[12].mxu0 %vm168_vm5, %v1410_v0 }
0x1b8d   :  { %3071 = vmatpush3.bf16.msra.mxu0 %v3483_v23  ;;  %2910 = vmatprep.mubr.msk.f32.mxu0 %vm3399_vm3, %v3400_v27 }
0x1b8e   :  { %3072 = vmatprep.subr.bf16.mxu0 %v3397_v19 }
0x1b91   :  { %3074 = vmatpush3.bf16.msra.mxu0 %v3489_v25 }
0x1b92   :  { %3081 = vmatprep.subr.bf16.mxu0 %v3397_v19 }
0x1c5f   :  { %v1480_v1 = vpop.f32.mrb[12].mxu0 }
0x1c60   :  { %v1484_v3 = vadd.f32 %v1480_v1, %v3516_v33  ;;  %v1515_v4 = vadd.f32 %v1514_v2, %v1480_v1  ;;  %v2890_v5 = vpop.f32.mrb[13].mxu0 }
0x1c62   :  { %3291 = vtanh.f32 %v1484_v3  ;;  %v2649_v8 = vmul.f32 -1.442695, %v1484_v3  ;;  %v2650_v10 = vmul.f32 -1.442695, %v1515_v4 }
0x1c63   :  { %3293 = vtanh.f32 %v1515_v4 }
0x1c64   :  { %3295 = vpow2.f32 %v2649_v8 }
0x1c65   :  { %3297 = vpow2.f32 %v2650_v10 }
0x1c6c   :  { %v3292_v6 = vpop.eup %3291 }
0x1c6d   :  { %v3294_v7 = vpop.eup %3293  ;;  %1494 = vrot.lane.b32.xlu1 %v3292_v6, %s3395_s1 }
0x1c6e   :  { %1525 = vrot.lane.b32.xlu0 %v3294_v7, %s3395_s1  ;;  %v3296_v11 = vpop.eup %3295 }
0x1c6f   :  { %v3298_v12 = vpop.eup %3297  ;;  %v1488_v13 = vadd.f32 1.0, %v3296_v11 }
0x1c70   :  { %v1519_v14 = vadd.f32 1.0, %v3298_v12 }
0x1c71   :  { %3299 = vrcp.f32 %v1488_v13 }
0x1c72   :  { %3301 = vrcp.f32 %v1519_v14 }
0x1c7b   :  { %v3300_v16 = vpop.eup %3299 }
0x1c7c   :  { %v3302_v18 = vpop.eup %3301  ;;  %v1492_v26 = vmul.f32 %v3300_v16, %v1365_v52 }
0x1c7d   :  { %v1523_v28 = vmul.f32 %v3302_v18, %v1396_v53 }
0x1cdf   :  { %v1495_v17 = vpop.permute.xlu1 %1494 }
0x1ce0   :  { %v1526_v20 = vpop.permute.xlu0 %1525  ;;  %v1497_v21 = vmul.f32 %v3300_v16, %v1495_v17 }
0x1ce1   :  { %v1528_v24 = vmul.f32 %v3302_v18, %v1526_v20 }
0x1ce2   :  { %1499 = vrot.lane.b32.xlu1 %v1497_v21, %s3396_s0 }
0x1ce3   :  { %1530 = vrot.lane.b32.xlu0 %v1528_v24, %s3396_s0 }
0x1d54   :  { %v1500_v29 = vpop.permute.xlu1 %1499 }
0x1d55   :  { %v1531_v30 = vpop.permute.xlu0 %1530  ;;  %v1502_v31 = vadd.f32 %v1500_v29, %v1492_v26  ;;  %v1788_v26 = vld [vmem:[#allocation2 + $0xc] sm:$0x1] }
0x1d56   :  { %v1533_v32 = vadd.f32 %v1531_v30, %v1523_v28 }
0x1d57   :  { %3303 = vtanh.f32 %v1502_v31 }
0x1d58   :  { %3305 = vtanh.f32 %v1533_v32 }
0x1d61   :  { %v3304_v34 = vpop.eup %3303 }
0x1d62   :  { %v3306_v35 = vpop.eup %3305  ;;  %1505 = vrot.lane.b32.xlu1 %v3304_v34, %s3398_s3 }
0x1d63   :  { %1536 = vrot.lane.b32.xlu0 %v3306_v35, %s3398_s3 }
0x1dd4   :  { %v1506_v36 = vpop.permute.xlu1 %1505 }
0x1dd5   :  { %v1537_v37 = vpop.permute.xlu0 %1536  ;;  %v3706_v39 = vmul.f32 %v3300_v16, %v1506_v36 }
0x1dd6   :  { %v1539_v40 = vmul.f32 %v3302_v18, %v1537_v37 }
0x1dd7   :  { %1544 = vrot.lane.b32.xlu0 %v3706_v39, %s3398_s3 }
0x1dd8   :  { %1541 = vrot.lane.b32.xlu1 %v1539_v40, %s3402_s27 }
0x1e49   :  { %v1545_v42 = vpop.permute.xlu0 %1544 }
0x1e4a   :  { %v1542_v43 = vpop.permute.xlu1 %1541 }
0x1e4b   :  { %v1547_v44 = vsel %vm166_vm4, %v1542_v43, %v1545_v42 }
0x1e4c   :  { %2900 = vmatmul.mubr.msk.f32.vlgmr.msra.gmra.mrb[8].mxu1 %vm168_vm5, %v1547_v44 }
0x1e4d   :  { %3077 = vmatpush3.bf16.msra.mxu1 %v3483_v23  ;;  %2921 = vmatprep.mubr.msk.f32.mxu1 %vm3399_vm3, %v3400_v27 }
0x1e4e   :  { %3078 = vmatprep.subr.bf16.mxu1 %v3397_v19 }
0x1e51   :  { %3080 = vmatpush3.bf16.msra.mxu1 %v3489_v25 }
0x1e52   :  { %3087 = vmatprep.subr.bf16.mxu1 %v3397_v19 }
0x1f1f   :  { %v1617_v45 = vpop.f32.mrb[8].mxu1 }
0x1f20   :  { %v1621_v47 = vadd.f32 %v1617_v45, %v3516_v33  ;;  %v1652_v48 = vadd.f32 %v1651_v46, %v1617_v45  ;;  %v2901_v50 = vpop.f32.mrb[9].mxu1 }
0x1f22   :  { %3307 = vtanh.f32 %v1621_v47  ;;  %v2652_v53 = vmul.f32 -1.442695, %v1621_v47  ;;  %v2653_v54 = vmul.f32 -1.442695, %v1652_v48 }
0x1f23   :  { %3309 = vtanh.f32 %v1652_v48 }
0x1f24   :  { %3311 = vpow2.f32 %v2652_v53 }
0x1f25   :  { %3313 = vpow2.f32 %v2653_v54 }
0x1f2c   :  { %v3308_v51 = vpop.eup %3307 }
0x1f2d   :  { %v3310_v52 = vpop.eup %3309  ;;  %1631 = vrot.lane.b32.xlu1 %v3308_v51, %s3395_s1 }
0x1f2e   :  { %1662 = vrot.lane.b32.xlu0 %v3310_v52, %s3395_s1  ;;  %v3312_v55 = vpop.eup %3311 }
0x1f2f   :  { %v3314_v56 = vpop.eup %3313  ;;  %v1625_v57 = vadd.f32 1.0, %v3312_v55 }
0x1f30   :  { %v1656_v59 = vadd.f32 1.0, %v3314_v56 }
0x1f31   :  { %3315 = vrcp.f32 %v1625_v57 }
0x1f32   :  { %3317 = vrcp.f32 %v1656_v59 }
0x1f3b   :  { %v3316_v60 = vpop.eup %3315 }
0x1f3c   :  { %v3318_v0 = vpop.eup %3317  ;;  %v1629_v4 = vmul.f32 %v3316_v60, %v1502_v31 }
0x1f3d   :  { %v1660_v5 = vmul.f32 %v3318_v0, %v1533_v32 }
0x1f9f   :  { %v1632_v61 = vpop.permute.xlu1 %1631 }
0x1fa0   :  { %v1663_v1 = vpop.permute.xlu0 %1662  ;;  %v1634_v2 = vmul.f32 %v3316_v60, %v1632_v61 }
0x1fa1   :  { %v1665_v3 = vmul.f32 %v3318_v0, %v1663_v1 }
0x1fa2   :  { %1636 = vrot.lane.b32.xlu1 %v1634_v2, %s3396_s0 }
0x1fa3   :  { %1667 = vrot.lane.b32.xlu0 %v1665_v3, %s3396_s0 }
0x2014   :  { %v1637_v6 = vpop.permute.xlu1 %1636 }
0x2015   :  { %v1668_v7 = vpop.permute.xlu0 %1667  ;;  %v1639_v8 = vadd.f32 %v1637_v6, %v1629_v4 }
0x2016   :  { %v1670_v10 = vadd.f32 %v1668_v7, %v1660_v5  ;;  %v1925_v5 = vld [vmem:[#allocation2 + $0xd] sm:$0x1] }
0x2017   :  { %3319 = vtanh.f32 %v1639_v8 }
0x2018   :  { %3321 = vtanh.f32 %v1670_v10 }
0x2021   :  { %v3320_v11 = vpop.eup %3319 }
0x2022   :  { %v3322_v12 = vpop.eup %3321  ;;  %1642 = vrot.lane.b32.xlu1 %v3320_v11, %s3398_s3 }
0x2023   :  { %1673 = vrot.lane.b32.xlu0 %v3322_v12, %s3398_s3 }
0x2094   :  { %v1643_v13 = vpop.permute.xlu1 %1642 }
0x2095   :  { %v1674_v14 = vpop.permute.xlu0 %1673  ;;  %v3726_v16 = vmul.f32 %v3316_v60, %v1643_v13 }
0x2096   :  { %v1676_v17 = vmul.f32 %v3318_v0, %v1674_v14 }
0x2097   :  { %1681 = vrot.lane.b32.xlu0 %v3726_v16, %s3398_s3 }
0x2098   :  { %1678 = vrot.lane.b32.xlu1 %v1676_v17, %s3402_s27 }
0x2109   :  { %v1682_v18 = vpop.permute.xlu0 %1681 }
0x210a   :  { %v1679_v20 = vpop.permute.xlu1 %1678 }
0x210b   :  { %v1684_v21 = vsel %vm166_vm4, %v1679_v20, %v1682_v18 }
0x210c   :  { %2911 = vmatmul.mubr.msk.f32.vlgmr.msra.gmra.mrb[14].mxu0 %vm168_vm5, %v1684_v21 }
0x210d   :  { %3083 = vmatpush3.bf16.msra.mxu0 %v3483_v23  ;;  %2932 = vmatprep.mubr.msk.f32.mxu0 %vm3399_vm3, %v3400_v27 }
0x210e   :  { %3084 = vmatprep.subr.bf16.mxu0 %v3397_v19 }
0x2111   :  { %3086 = vmatpush3.bf16.msra.mxu0 %v3489_v25 }
0x2112   :  { %3093 = vmatprep.subr.bf16.mxu0 %v3397_v19 }
0x21df   :  { %v1754_v24 = vpop.f32.mrb[14].mxu0 }
0x21e0   :  { %v1758_v28 = vadd.f32 %v1754_v24, %v3516_v33  ;;  %v1789_v29 = vadd.f32 %v1788_v26, %v1754_v24  ;;  %v2912_v30 = vpop.f32.mrb[15].mxu0 }
0x21e2   :  { %3323 = vtanh.f32 %v1758_v28  ;;  %v2655_v34 = vmul.f32 -1.442695, %v1758_v28  ;;  %v2656_v35 = vmul.f32 -1.442695, %v1789_v29 }
0x21e3   :  { %3325 = vtanh.f32 %v1789_v29 }
0x21e4   :  { %3327 = vpow2.f32 %v2655_v34 }
0x21e5   :  { %3329 = vpow2.f32 %v2656_v35 }
0x21ec   :  { %v3324_v31 = vpop.eup %3323 }
0x21ed   :  { %v3326_v32 = vpop.eup %3325  ;;  %1768 = vrot.lane.b32.xlu1 %v3324_v31, %s3395_s1 }
0x21ee   :  { %1799 = vrot.lane.b32.xlu0 %v3326_v32, %s3395_s1  ;;  %v3328_v36 = vpop.eup %3327 }
0x21ef   :  { %v3330_v37 = vpop.eup %3329  ;;  %v1762_v40 = vadd.f32 1.0, %v3328_v36 }
0x21f0   :  { %v1793_v42 = vadd.f32 1.0, %v3330_v37 }
0x21f1   :  { %3331 = vrcp.f32 %v1762_v40 }
0x21f2   :  { %3333 = vrcp.f32 %v1793_v42 }
0x21fb   :  { %v3332_v43 = vpop.eup %3331 }
0x21fc   :  { %v3334_v45 = vpop.eup %3333  ;;  %v1766_v50 = vmul.f32 %v3332_v43, %v1639_v8 }
0x21fd   :  { %v1797_v51 = vmul.f32 %v3334_v45, %v1670_v10 }
0x225f   :  { %v1769_v44 = vpop.permute.xlu1 %1768 }
0x2260   :  { %v1800_v46 = vpop.permute.xlu0 %1799  ;;  %v1771_v47 = vmul.f32 %v3332_v43, %v1769_v44 }
0x2261   :  { %v1802_v48 = vmul.f32 %v3334_v45, %v1800_v46 }
0x2262   :  { %1773 = vrot.lane.b32.xlu1 %v1771_v47, %s3396_s0 }
0x2263   :  { %1804 = vrot.lane.b32.xlu0 %v1802_v48, %s3396_s0 }
0x22d4   :  { %v1774_v52 = vpop.permute.xlu1 %1773 }
0x22d5   :  { %v1805_v53 = vpop.permute.xlu0 %1804  ;;  %v1776_v54 = vadd.f32 %v1774_v52, %v1766_v50  ;;  %v2062_v52 = vld [vmem:[#allocation2 + $0xe] sm:$0x1] }
0x22d6   :  { %v1807_v55 = vadd.f32 %v1805_v53, %v1797_v51 }
0x22d7   :  { %3335 = vtanh.f32 %v1776_v54 }
0x22d8   :  { %3337 = vtanh.f32 %v1807_v55 }
0x22e1   :  { %v3336_v56 = vpop.eup %3335 }
0x22e2   :  { %v3338_v57 = vpop.eup %3337  ;;  %1779 = vrot.lane.b32.xlu1 %v3336_v56, %s3398_s3 }
0x22e3   :  { %1810 = vrot.lane.b32.xlu0 %v3338_v57, %s3398_s3 }
0x2354   :  { %v1780_v59 = vpop.permute.xlu1 %1779 }
0x2355   :  { %v1811_v60 = vpop.permute.xlu0 %1810  ;;  %v3746_v61 = vmul.f32 %v3332_v43, %v1780_v59 }
0x2356   :  { %v1813_v0 = vmul.f32 %v3334_v45, %v1811_v60 }
0x2357   :  { %1818 = vrot.lane.b32.xlu0 %v3746_v61, %s3398_s3 }
0x2358   :  { %1815 = vrot.lane.b32.xlu1 %v1813_v0, %s3402_s27 }
0x23c9   :  { %v1819_v1 = vpop.permute.xlu0 %1818 }
0x23ca   :  { %v1816_v2 = vpop.permute.xlu1 %1815 }
0x23cb   :  { %v1821_v3 = vsel %vm166_vm4, %v1816_v2, %v1819_v1 }
0x23cc   :  { %2922 = vmatmul.mubr.msk.f32.vlgmr.msra.gmra.mrb[10].mxu1 %vm168_vm5, %v1821_v3 }
0x23cd   :  { %3089 = vmatpush3.bf16.msra.mxu1 %v3483_v23  ;;  %2943 = vmatprep.mubr.msk.f32.mxu1 %vm3399_vm3, %v3400_v27 }
0x23ce   :  { %3090 = vmatprep.subr.bf16.mxu1 %v3397_v19 }
0x23d1   :  { %3092 = vmatpush3.bf16.msra.mxu1 %v3489_v25 }
0x23d2   :  { %3099 = vmatprep.subr.bf16.mxu1 %v3397_v19 }
0x249f   :  { %v1891_v4 = vpop.f32.mrb[10].mxu1 }
0x24a0   :  { %v1895_v6 = vadd.f32 %v1891_v4, %v3516_v33  ;;  %v1926_v7 = vadd.f32 %v1925_v5, %v1891_v4  ;;  %v2923_v8 = vpop.f32.mrb[11].mxu1 }
0x24a2   :  { %3339 = vtanh.f32 %v1895_v6  ;;  %v2658_v12 = vmul.f32 -1.442695, %v1895_v6  ;;  %v2659_v13 = vmul.f32 -1.442695, %v1926_v7 }
0x24a3   :  { %3341 = vtanh.f32 %v1926_v7 }
0x24a4   :  { %3343 = vpow2.f32 %v2658_v12 }
0x24a5   :  { %3345 = vpow2.f32 %v2659_v13 }
0x24ac   :  { %v3340_v10 = vpop.eup %3339 }
0x24ad   :  { %v3342_v11 = vpop.eup %3341  ;;  %1905 = vrot.lane.b32.xlu1 %v3340_v10, %s3395_s1 }
0x24ae   :  { %1936 = vrot.lane.b32.xlu0 %v3342_v11, %s3395_s1  ;;  %v3344_v14 = vpop.eup %3343 }
0x24af   :  { %v3346_v17 = vpop.eup %3345  ;;  %v1899_v18 = vadd.f32 1.0, %v3344_v14 }
0x24b0   :  { %v1930_v20 = vadd.f32 1.0, %v3346_v17 }
0x24b1   :  { %3347 = vrcp.f32 %v1899_v18 }
0x24b2   :  { %3349 = vrcp.f32 %v1930_v20 }
0x24bb   :  { %v3348_v21 = vpop.eup %3347 }
0x24bc   :  { %v3350_v26 = vpop.eup %3349  ;;  %v1903_v31 = vmul.f32 %v3348_v21, %v1776_v54 }
0x24bd   :  { %v1934_v32 = vmul.f32 %v3350_v26, %v1807_v55 }
0x251f   :  { %v1906_v24 = vpop.permute.xlu1 %1905 }
0x2520   :  { %v1937_v28 = vpop.permute.xlu0 %1936  ;;  %v1908_v29 = vmul.f32 %v3348_v21, %v1906_v24 }
0x2521   :  { %v1939_v30 = vmul.f32 %v3350_v26, %v1937_v28 }
0x2522   :  { %1910 = vrot.lane.b32.xlu1 %v1908_v29, %s3396_s0 }
0x2523   :  { %1941 = vrot.lane.b32.xlu0 %v1939_v30, %s3396_s0 }
0x2594   :  { %v1911_v34 = vpop.permute.xlu1 %1910 }
0x2595   :  { %v1942_v35 = vpop.permute.xlu0 %1941  ;;  %v1913_v36 = vadd.f32 %v1911_v34, %v1903_v31 }
0x2596   :  { %v1944_v37 = vadd.f32 %v1942_v35, %v1934_v32  ;;  %v2199_v32 = vld [vmem:[#allocation2 + $0xf] sm:$0x1] }
0x2597   :  { %3351 = vtanh.f32 %v1913_v36 }
0x2598   :  { %3353 = vtanh.f32 %v1944_v37 }
0x25a1   :  { %v3352_v40 = vpop.eup %3351 }
0x25a2   :  { %v3354_v42 = vpop.eup %3353  ;;  %1916 = vrot.lane.b32.xlu1 %v3352_v40, %s3398_s3 }
0x25a3   :  { %1947 = vrot.lane.b32.xlu0 %v3354_v42, %s3398_s3 }
0x2614   :  { %v1917_v43 = vpop.permute.xlu1 %1916 }
0x2615   :  { %v1948_v44 = vpop.permute.xlu0 %1947  ;;  %v3766_v45 = vmul.f32 %v3348_v21, %v1917_v43 }
0x2616   :  { %v1950_v46 = vmul.f32 %v3350_v26, %v1948_v44 }
0x2617   :  { %1955 = vrot.lane.b32.xlu0 %v3766_v45, %s3398_s3 }
0x2618   :  { %1952 = vrot.lane.b32.xlu1 %v1950_v46, %s3402_s27 }
0x2689   :  { %v1956_v47 = vpop.permute.xlu0 %1955 }
0x268a   :  { %v1953_v48 = vpop.permute.xlu1 %1952 }
0x268b   :  { %v1958_v50 = vsel %vm166_vm4, %v1953_v48, %v1956_v47 }
0x268c   :  { %2933 = vmatmul.mubr.msk.f32.vlgmr.msra.gmra.mrb[16].mxu0 %vm168_vm5, %v1958_v50 }
0x268d   :  { %3095 = vmatpush3.bf16.msra.mxu0 %v3483_v23  ;;  %2954 = vmatprep.mubr.msk.f32.mxu0 %vm3399_vm3, %v3400_v27 }
0x268e   :  { %3096 = vmatprep.subr.bf16.mxu0 %v3397_v19 }
0x2691   :  { %3098 = vmatpush3.bf16.msra.mxu0 %v3489_v25 }
0x2692   :  { %3123 = vmatprep.subr.bf16.mxu0 %v3397_v19 }
0x275f   :  { %v2028_v51 = vpop.f32.mrb[16].mxu0 }
0x2760   :  { %v2032_v53 = vadd.f32 %v2028_v51, %v3516_v33  ;;  %v2063_v54 = vadd.f32 %v2062_v52, %v2028_v51  ;;  %v2934_v55 = vpop.f32.mrb[17].mxu0 }
0x2762   :  { %3355 = vtanh.f32 %v2032_v53  ;;  %v2661_v23 = vmul.f32 -1.442695, %v2032_v53  ;;  %v2662_v59 = vmul.f32 -1.442695, %v2063_v54 }
0x2763   :  { %3357 = vtanh.f32 %v2063_v54 }
0x2764   :  { %3359 = vpow2.f32 %v2661_v23 }
0x2765   :  { %3361 = vpow2.f32 %v2662_v59 }
0x276c   :  { %v3356_v56 = vpop.eup %3355 }
0x276d   :  { %v3358_v57 = vpop.eup %3357  ;;  %2042 = vrot.lane.b32.xlu1 %v3356_v56, %s3395_s1 }
0x276e   :  { %2073 = vrot.lane.b32.xlu0 %v3358_v57, %s3395_s1  ;;  %v3360_v25 = vpop.eup %3359 }
0x276f   :  { %v3362_v60 = vpop.eup %3361  ;;  %v2036_v0 = vadd.f32 1.0, %v3360_v25 }
0x2770   :  { %v2067_v1 = vadd.f32 1.0, %v3362_v60 }
0x2771   :  { %3363 = vrcp.f32 %v2036_v0 }
0x2772   :  { %3365 = vrcp.f32 %v2067_v1 }
0x277b   :  { %v3364_v2 = vpop.eup %3363 }
0x277c   :  { %v3366_v4 = vpop.eup %3365  ;;  %v2040_v8 = vmul.f32 %v3364_v2, %v1913_v36 }
0x277d   :  { %v2071_v10 = vmul.f32 %v3366_v4, %v1944_v37 }
0x27df   :  { %v2043_v3 = vpop.permute.xlu1 %2042 }
0x27e0   :  { %v2074_v5 = vpop.permute.xlu0 %2073  ;;  %v2045_v6 = vmul.f32 %v3364_v2, %v2043_v3 }
0x27e1   :  { %v2076_v7 = vmul.f32 %v3366_v4, %v2074_v5 }
0x27e2   :  { %2047 = vrot.lane.b32.xlu1 %v2045_v6, %s3396_s0 }
0x27e3   :  { %2078 = vrot.lane.b32.xlu0 %v2076_v7, %s3396_s0 }
0x2854   :  { %v2048_v11 = vpop.permute.xlu1 %2047 }
0x2855   :  { %v2079_v12 = vpop.permute.xlu0 %2078  ;;  %v2050_v13 = vadd.f32 %v2048_v11, %v2040_v8 }
0x2856   :  { %v2081_v14 = vadd.f32 %v2079_v12, %v2071_v10 }
0x2857   :  { %3367 = vtanh.f32 %v2050_v13 }
0x2858   :  { %3369 = vtanh.f32 %v2081_v14 }
0x2861   :  { %v3368_v17 = vpop.eup %3367 }
0x2862   :  { %v3370_v18 = vpop.eup %3369  ;;  %2053 = vrot.lane.b32.xlu1 %v3368_v17, %s3398_s3 }
0x2863   :  { %2084 = vrot.lane.b32.xlu0 %v3370_v18, %s3398_s3 }
0x28d4   :  { %v2054_v20 = vpop.permute.xlu1 %2053 }
0x28d5   :  { %v2085_v21 = vpop.permute.xlu0 %2084  ;;  %v3786_v24 = vmul.f32 %v3364_v2, %v2054_v20 }
0x28d6   :  { %v2087_v26 = vmul.f32 %v3366_v4, %v2085_v21 }
0x28d7   :  { %2092 = vrot.lane.b32.xlu0 %v3786_v24, %s3398_s3 }
0x28d8   :  { %2089 = vrot.lane.b32.xlu1 %v2087_v26, %s3402_s27 }
0x2949   :  { %v2093_v28 = vpop.permute.xlu0 %2092 }
0x294a   :  { %v2090_v29 = vpop.permute.xlu1 %2089 }
0x294b   :  { %v2095_v30 = vsel %vm166_vm4, %v2090_v29, %v2093_v28 }
0x294c   :  { %2944 = vmatmul.mubr.msk.f32.vlgmr.msra.gmra.mrb[12].mxu1 %vm168_vm5, %v2095_v30 }
0x294d   :  { %2989 = vmatprep.mubr.msk.f32.mxu1 %vm3399_vm3, %v3400_v27 }
0x2a1f   :  { %v2165_v31 = vpop.f32.mrb[12].mxu1 }
0x2a20   :  { %v2169_v34 = vadd.f32 %v2165_v31, %v3516_v33  ;;  %v2200_v35 = vadd.f32 %v2199_v32, %v2165_v31  ;;  %v2945_v36 = vpop.f32.mrb[13].mxu1 }
0x2a22   :  { %3371 = vtanh.f32 %v2169_v34  ;;  %v2664_v42 = vmul.f32 -1.442695, %v2169_v34  ;;  %v2665_v43 = vmul.f32 -1.442695, %v2200_v35 }
0x2a23   :  { %3373 = vtanh.f32 %v2200_v35 }
0x2a24   :  { %3375 = vpow2.f32 %v2664_v42 }
0x2a25   :  { %3377 = vpow2.f32 %v2665_v43 }
0x2a2c   :  { %v3372_v37 = vpop.eup %3371 }
0x2a2d   :  { %v3374_v40 = vpop.eup %3373  ;;  %2179 = vrot.lane.b32.xlu1 %v3372_v37, %s3395_s1 }
0x2a2e   :  { %2210 = vrot.lane.b32.xlu0 %v3374_v40, %s3395_s1  ;;  %v3376_v44 = vpop.eup %3375 }
0x2a2f   :  { %v3378_v46 = vpop.eup %3377  ;;  %v2173_v47 = vadd.f32 1.0, %v3376_v44 }
0x2a30   :  { %v2204_v48 = vadd.f32 1.0, %v3378_v46 }
0x2a31   :  { %3379 = vrcp.f32 %v2173_v47 }
0x2a32   :  { %3381 = vrcp.f32 %v2204_v48 }
0x2a3b   :  { %v3380_v50 = vpop.eup %3379 }
0x2a3c   :  { %v3382_v52 = vpop.eup %3381  ;;  %v2177_v56 = vmul.f32 %v3380_v50, %v2050_v13 }
0x2a3d   :  { %v2208_v57 = vmul.f32 %v3382_v52, %v2081_v14 }
0x2a9f   :  { %v2180_v51 = vpop.permute.xlu1 %2179 }
0x2aa0   :  { %v2211_v53 = vpop.permute.xlu0 %2210  ;;  %v2182_v54 = vmul.f32 %v3380_v50, %v2180_v51 }
0x2aa1   :  { %v2213_v55 = vmul.f32 %v3382_v52, %v2211_v53 }
0x2aa2   :  { %2184 = vrot.lane.b32.xlu1 %v2182_v54, %s3396_s0  ;;  %v2432_v54 = vld [vmem:[%s3980_s5] sm:$0xff] }
0x2aa3   :  { %2215 = vrot.lane.b32.xlu0 %v2213_v55, %s3396_s0  ;;  %v2433_v55 = vld [vmem:[%s3980_s5 + $0x8] sm:$0xff] }
0x2b14   :  { %v2185_v23 = vpop.permute.xlu1 %2184 }
0x2b15   :  { %v2216_v59 = vpop.permute.xlu0 %2215  ;;  %v2187_v25 = vadd.f32 %v2185_v23, %v2177_v56  ;;  %v2434_v56 = vld [vmem:[%s3980_s5 + $0x10] sm:$0xff]  ;;  %v2435_v23 = vld [vmem:[%s3980_s5 + $0x18] sm:$0xff] }
0x2b16   :  { %v2218_v60 = vadd.f32 %v2216_v59, %v2208_v57  ;;  %v3100_v57 = vpack.c.bf16 %v2433_v55, %v2432_v54 }
0x2b17   :  { %3383 = vtanh.f32 %v2187_v25 }
0x2b18   :  { %3385 = vtanh.f32 %v2218_v60  ;;  %3101 = vmatpush3.bf16.msra.mxu1 %v3100_v57 }
0x2b19   :  { %3102 = vmatprep.subr.bf16.mxu1 %v3397_v19 }
0x2b21   :  { %v3384_v0 = vpop.eup %3383 }
0x2b22   :  { %v3386_v1 = vpop.eup %3385  ;;  %2190 = vrot.lane.b32.xlu1 %v3384_v0, %s3398_s3  ;;  %v3103_v0 = vpack.c.bf16 %v2435_v23, %v2434_v56 }
0x2b23   :  { %2221 = vrot.lane.b32.xlu0 %v3386_v1, %s3398_s3  ;;  %v2436_v1 = vld [vmem:[%s3980_s5 + $0x20] sm:$0xff] }
0x2b24   :  { %3104 = vmatpush3.bf16.msra.mxu1 %v3103_v0 }
0x2b25   :  { %3105 = vmatprep.subr.bf16.mxu1 %v3397_v19 }
0x2b94   :  { %v2191_v2 = vpop.permute.xlu1 %2190 }
0x2b95   :  { %v2222_v3 = vpop.permute.xlu0 %2221  ;;  %v3802_v4 = vmul.f32 %v3380_v50, %v2191_v2  ;;  %v2437_v2 = vld [vmem:[%s3980_s5 + $0x28] sm:$0xff] }
0x2b96   :  { %v2224_v5 = vmul.f32 %v3382_v52, %v2222_v3 }
0x2b97   :  { %2229 = vrot.lane.b32.xlu0 %v3802_v4, %s3398_s3 }
0x2b98   :  { %2226 = vrot.lane.b32.xlu1 %v2224_v5, %s3402_s27  ;;  %v2438_v5 = vld [vmem:[%s3980_s5 + $0x30] sm:$0xff] }
0x2c09   :  { %v2230_v6 = vpop.permute.xlu0 %2229 }
0x2c0a   :  { %v2227_v7 = vpop.permute.xlu1 %2226 }
0x2c0b   :  { %v2232_v8 = vsel %vm166_vm4, %v2227_v7, %v2230_v6  ;;  %v2439_v6 = vld [vmem:[%s3980_s5 + $0x38] sm:$0xff] }
0x2c0c   :  { %2955 = vmatmul.mubr.msk.f32.vlgmr.msra.gmra.mrb[18].mxu0 %vm168_vm5, %v2232_v8  ;;  %v3109_v8 = vpack.c.bf16 %v2439_v6, %v2438_v5 }
0x2c0d   :  { %3000 = vmatprep.mubr.msk.f32.mxu0 %vm3399_vm3, %v3400_v27 }
0x2cdf   :  { %v2302_v10 = vpop.f32.mrb[18].mxu0 }
0x2ce0   :  { %v2306_v11 = vadd.f32 %v2302_v10, %v3516_v33  ;;  %v2956_v12 = vpop.f32.mrb[19].mxu0  ;;  %v2440_v10 = vld [vmem:[%s3980_s5 + $0x40] sm:$0xff] }
0x2ce2   :  { %3387 = vtanh.f32 %v2306_v11  ;;  %v2667_v14 = vmul.f32 -1.442695, %v2306_v11  ;;  %v2441_v11 = vld [vmem:[%s3980_s5 + $0x48] sm:$0xff] }
0x2ce3   :  { %v3112_v12 = vpack.c.bf16 %v2441_v11, %v2440_v10 }
0x2ce4   :  { %3389 = vpow2.f32 %v2667_v14  ;;  %v2443_v14 = vld [vmem:[%s3980_s5 + $0x58] sm:$0xff] }
0x2cec   :  { %v3388_v13 = vpop.eup %3387 }
0x2ced   :  { %2316 = vrot.lane.b32.xlu1 %v3388_v13, %s3395_s1  ;;  %v2442_v13 = vld [vmem:[%s3980_s5 + $0x50] sm:$0xff] }
0x2cee   :  { %v3390_v17 = vpop.eup %3389 }
0x2cef   :  { %v2310_v18 = vadd.f32 1.0, %v3390_v17  ;;  %v3115_v17 = vpack.c.bf16 %v2443_v14, %v2442_v13 }
0x2cf1   :  { %3391 = vrcp.f32 %v2310_v18  ;;  %v2444_v18 = vld [vmem:[%s3980_s5 + $0x60] sm:$0xff] }
0x2cfb   :  { %v3813_v20 = vpop.eup %3391 }
0x2cfc   :  { %v2314_v27 = vmul.f32 %v3813_v20, %v2187_v25 }
0x2d5f   :  { %v2317_v21 = vpop.permute.xlu1 %2316 }
0x2d60   :  { %v2319_v26 = vmul.f32 %v3813_v20, %v2317_v21 }
0x2d62   :  { %2321 = vrot.lane.b32.xlu0 %v2319_v26, %s3396_s0  ;;  %v2446_v26 = vld [vmem:[%s3980_s5 + $0x70] sm:$0xff] }
0x2d66   :  { %414 = vrot.lane.b32.xlu0 %v3546_v38, %s3396_s0 }
0x2d6a   :  { %551 = vrot.lane.b32.xlu0 %v3566_v9, %s3396_s0 }
0x2d6e   :  { %688 = vrot.lane.b32.xlu0 %v3586_v49, %s3396_s0 }
0x2d72   :  { %825 = vrot.lane.b32.xlu0 %v3606_v22, %s3396_s0 }
0x2d76   :  { %962 = vrot.lane.b32.xlu0 %v3626_v62, %s3396_s0 }
0x2d7a   :  { %1099 = vrot.lane.b32.xlu0 %v3646_v41, %s3396_s0 }
0x2d7e   :  { %1236 = vrot.lane.b32.xlu0 %v3666_v15, %s3396_s0 }
0x2d82   :  { %276 = vrot.lane.b32.xlu0 %v3526_v63, %s3396_s0 }
0x2dd4   :  { %v2322_v33 = vpop.permute.xlu0 %2321 }
0x2dd5   :  { %v2324_v38 = vadd.f32 %v2322_v33, %v2314_v27  ;;  %v2447_v27 = vld [vmem:[%s3980_s5 + $0x78] sm:$0xff] }
0x2dd6   :  { %v3121_v33 = vpack.c.bf16 %v2447_v27, %v2446_v26 }
0x2dd7   :  { %3393 = vtanh.f32 %v2324_v38 }
0x2dd8   :  { %v415_v9 = vpop.permute.xlu0 %414 }
0x2dd9   :  { %417 = vst.msk [vmem:[#allocation3 + $0x1] sm:$0x1] %vm279_vm6, %v415_v9 }
0x2ddc   :  { %v552_v49 = vpop.permute.xlu0 %551 }
0x2ddd   :  { %554 = vst.msk [vmem:[#allocation3 + $0x2] sm:$0x1] %vm279_vm6, %v552_v49  ;;  %v2525_v49 = vld [vmem:[%s3981_s7] sm:$0xff] }
0x2de0   :  { %v689_v22 = vpop.permute.xlu0 %688  ;;  %v2338_v62 = vld [vmem:[#allocation3 + $0x1] sm:$0x1] }
0x2de1   :  { %v3394_v41 = vpop.eup %3393  ;;  %691 = vst.msk [vmem:[#allocation3 + $0x3] sm:$0x1] %vm279_vm6, %v689_v22  ;;  %2340 = vrot.lane.b32.xlu0 %v2338_v62, %s3396_s0  ;;  %v2526_v22 = vld [vmem:[%s3981_s7 + $0x8] sm:$0xff] }
0x2de2   :  { %2327 = vrot.lane.b32.xlu1 %v3394_v41, %s3398_s3  ;;  %v3124_v62 = vpack.c.bf16 %v2526_v22, %v2525_v49 }
0x2de4   :  { %v826_v63 = vpop.permute.xlu0 %825  ;;  %v2345_v15 = vld [vmem:[#allocation3 + $0x2] sm:$0x1]  ;;  %3125 = vmatpush3.bf16.msra.mxu0 %v3124_v62 }
0x2de5   :  { %828 = vst.msk [vmem:[#allocation3 + $0x4] sm:$0x1] %vm279_vm6, %v826_v63  ;;  %2347 = vrot.lane.b32.xlu0 %v2345_v15, %s3398_s3  ;;  %3126 = vmatprep.subr.bf16.mxu0 %v3397_v19 }
0x2de6   :  { %1510 = vrot.lane.b32.xlu1 %v3706_v39, %s3396_s0 }
0x2de8   :  { %v963_v28 = vpop.permute.xlu0 %962  ;;  %v2352_v29 = vld [vmem:[#allocation3 + $0x3] sm:$0x1] }
0x2de9   :  { %965 = vst.msk [vmem:[#allocation3 + $0x5] sm:$0x1] %vm279_vm6, %v963_v28  ;;  %2354 = vrot.lane.b32.xlu0 %v2352_v29, %s3403_s4 }
0x2dea   :  { %1647 = vrot.lane.b32.xlu1 %v3726_v16, %s3396_s0 }
0x2dec   :  { %v1100_v30 = vpop.permute.xlu0 %1099  ;;  %v2359_v31 = vld [vmem:[#allocation3 + $0x4] sm:$0x1] }
0x2ded   :  { %1102 = vst.msk [vmem:[#allocation3 + $0x6] sm:$0x1] %vm279_vm6, %v1100_v30  ;;  %2361 = vrot.lane.b32.xlu0 %v2359_v31, %s3401_s26 }
0x2dee   :  { %1784 = vrot.lane.b32.xlu1 %v3746_v61, %s3396_s0 }
0x2df0   :  { %v1237_v39 = vpop.permute.xlu0 %1236  ;;  %v2366_v32 = vld [vmem:[#allocation3 + $0x5] sm:$0x1] }
0x2df1   :  { %1239 = vst.msk [vmem:[#allocation3 + $0x7] sm:$0x1] %vm279_vm6, %v1237_v39  ;;  %2368 = vrot.lane.b32.xlu0 %v2366_v32, %s3402_s27 }
0x2df2   :  { %1921 = vrot.lane.b32.xlu1 %v3766_v45, %s3396_s0 }
0x2df4   :  { %v277_v34 = vpop.permute.xlu0 %276  ;;  %v2373_v16 = vld [vmem:[#allocation3 + $0x6] sm:$0x1] }
0x2df5   :  { %280 = vst.msk [vmem:[#allocation3] sm:$0x1] %vm279_vm6, %v277_v34  ;;  %2375 = vrot.lane.b32.xlu0 %v2373_v16, %s3395_s1  ;;  %v2527_v34 = vld [vmem:[%s3981_s7 + $0x10] sm:$0xff]  ;;  %v2528_v16 = vld [vmem:[%s3981_s7 + $0x18] sm:$0xff] }
0x2df6   :  { %2058 = vrot.lane.b32.xlu1 %v3786_v24, %s3396_s0 }
0x2df8   :  { %v2380_v35 = vld [vmem:[#allocation3 + $0x7] sm:$0x1] }
0x2df9   :  { %2382 = vrot.lane.b32.xlu0 %v2380_v35, %s3404_s28  ;;  %v3127_v35 = vpack.c.bf16 %v2528_v16, %v2527_v34 }
0x2dfa   :  { %2195 = vrot.lane.b32.xlu1 %v3802_v4, %s3396_s0  ;;  %v3106_v4 = vpack.c.bf16 %v2437_v2, %v2436_v1 }
0x2dfb   :  { %3128 = vmatpush3.bf16.msra.mxu0 %v3127_v35 }
0x2dfc   :  { %v2336_v61 = vld [vmem:[#allocation3] sm:$0x1]  ;;  %3107 = vmatpush3.bf16.msra.mxu1 %v3106_v4 }
0x2dfd   :  { %2337 = vst.msk [vmem:[#allocation4] sm:$0x1] %vm279_vm6, %v2336_v61  ;;  %3108 = vmatprep.subr.bf16.mxu1 %v3397_v19  ;;  %v2668_v61 = vld [vmem:[%s3982_s6] ss:$0 sm:$0xff] }
0x2e00   :  { %3110 = vmatpush3.bf16.msra.mxu1 %v3109_v8 }
0x2e01   :  { %3111 = vmatprep.subr.bf16.mxu1 %v3397_v19 }
0x2e04   :  { %3113 = vmatpush3.bf16.msra.mxu1 %v3112_v12 }
0x2e05   :  { %3114 = vmatprep.subr.bf16.mxu1 %v3397_v19 }
0x2e08   :  { %3116 = vmatpush3.bf16.msra.mxu1 %v3115_v17 }
0x2e09   :  { %3117 = vmatprep.subr.bf16.mxu1 %v3397_v19 }
0x2e53   :  { %v2341_v45 = vpop.permute.xlu0 %2340 }
0x2e54   :  { %2344 = vst.msk [vmem:[#allocation4] sm:$0x1] %vm2343_vm7, %v2341_v45  ;;  %v2328_v36 = vpop.permute.xlu1 %2327 }
0x2e55   :  { %v2330_v37 = vmul.f32 %v3813_v20, %v2328_v36  ;;  %v2445_v20 = vld [vmem:[%s3980_s5 + $0x68] sm:$0xff] }
0x2e56   :  { %v3118_v21 = vpack.c.bf16 %v2445_v20, %v2444_v18 }
0x2e57   :  { %v2348_v40 = vpop.permute.xlu0 %2347  ;;  %2332 = vrot.lane.b32.xlu1 %v2330_v37, %s3396_s0 }
0x2e58   :  { %2351 = vst.msk [vmem:[#allocation4] sm:$0x1] %vm2350_vm8, %v2348_v40  ;;  %v1511_v24 = vpop.permute.xlu1 %1510  ;;  %3119 = vmatpush3.bf16.msra.mxu1 %v3118_v21  ;;  %v2669_v40 = vld [vmem:[%s3983_s8] ss:$0 sm:$0xff] }
0x2e59   :  { %1513 = vst.msk [vmem:[#allocation3 + $0x9] sm:$0x1] %vm279_vm6, %v1511_v24  ;;  %3120 = vmatprep.subr.bf16.mxu1 %v3397_v19 }
0x2e5b   :  { %v2355_v42 = vpop.permute.xlu0 %2354  ;;  %1373 = vrot.lane.b32.xlu1 %v3686_v58, %s3396_s0 }
0x2e5c   :  { %2358 = vst.msk [vmem:[#allocation4] sm:$0x1] %vm2357_vm9, %v2355_v42  ;;  %v1648_v43 = vpop.permute.xlu1 %1647  ;;  %3122 = vmatpush3.bf16.msra.mxu1 %v3121_v33 }
0x2e5d   :  { %1650 = vst.msk [vmem:[#allocation3 + $0xa] sm:$0x1] %vm279_vm6, %v1648_v43 }
0x2e5f   :  { %v2362_v44 = vpop.permute.xlu0 %2361 }
0x2e60   :  { %2365 = vst.msk [vmem:[#allocation4] sm:$0x1] %vm2364_vm10, %v2362_v44  ;;  %v1785_v46 = vpop.permute.xlu1 %1784  ;;  %v2389_v47 = vld [vmem:[#allocation3 + $0x9] sm:$0x1] }
0x2e61   :  { %1787 = vst.msk [vmem:[#allocation3 + $0xb] sm:$0x1] %vm279_vm6, %v1785_v46  ;;  %2391 = vrot.lane.b32.xlu1 %v2389_v47, %s3396_s0 }
0x2e63   :  { %v2369_v48 = vpop.permute.xlu0 %2368 }
0x2e64   :  { %2372 = vst.msk [vmem:[#allocation4] sm:$0x1] %vm2371_vm11, %v2369_v48  ;;  %v1922_v58 = vpop.permute.xlu1 %1921  ;;  %v2395_v50 = vld [vmem:[#allocation3 + $0xa] sm:$0x1] }
0x2e65   :  { %1924 = vst.msk [vmem:[#allocation3 + $0xc] sm:$0x1] %vm279_vm6, %v1922_v58  ;;  %2397 = vrot.lane.b32.xlu1 %v2395_v50, %s3398_s3 }
0x2e67   :  { %v2376_v51 = vpop.permute.xlu0 %2375 }
0x2e68   :  { %2379 = vst.msk [vmem:[#allocation4] sm:$0x1] %vm2378_vm12, %v2376_v51  ;;  %v2059_v52 = vpop.permute.xlu1 %2058  ;;  %v2401_v53 = vld [vmem:[#allocation3 + $0xb] sm:$0x1] }
0x2e69   :  { %2061 = vst.msk [vmem:[#allocation3 + $0xd] sm:$0x1] %vm279_vm6, %v2059_v52  ;;  %2403 = vrot.lane.b32.xlu1 %v2401_v53, %s3403_s4 }
0x2e6b   :  { %v2383_v59 = vpop.permute.xlu0 %2382 }
0x2e6c   :  { %2386 = vst.msk [vmem:[#allocation4] sm:$0x1] %vm2385_vm13, %v2383_v59  ;;  %v2196_v25 = vpop.permute.xlu1 %2195  ;;  %v2407_v60 = vld [vmem:[#allocation3 + $0xc] sm:$0x1] }
0x2e6d   :  { %2198 = vst.msk [vmem:[#allocation3 + $0xe] sm:$0x1] %vm279_vm6, %v2196_v25  ;;  %2409 = vrot.lane.b32.xlu1 %v2407_v60, %s3401_s26 }
0x2e70   :  { %v2413_v3 = vld [vmem:[#allocation3 + $0xd] sm:$0x1] }
0x2e71   :  { %2415 = vrot.lane.b32.xlu1 %v2413_v3, %s3402_s27 }
0x2e74   :  { %v2419_v7 = vld [vmem:[#allocation3 + $0xe] sm:$0x1] }
0x2e75   :  { %2421 = vrot.lane.b32.xlu1 %v2419_v7, %s3395_s1 }
0x2ec9   :  { %v2333_v38 = vpop.permute.xlu1 %2332 }
0x2eca   :  { %2335 = vst.msk [vmem:[#allocation3 + $0xf] sm:$0x1] %vm279_vm6, %v2333_v38 }
0x2ecd   :  { %v1374_v9 = vpop.permute.xlu1 %1373 }
0x2ece   :  { %1376 = vst.msk [vmem:[#allocation3 + $0x8] sm:$0x1] %vm279_vm6, %v1374_v9 }
0x2ed1   :  { %v2425_v41 = vld [vmem:[#allocation3 + $0xf] sm:$0x1] }
0x2ed2   :  { %2427 = vrot.lane.b32.xlu1 %v2425_v41, %s3404_s28 }
0x2ed3   :  { %v2392_v63 = vpop.permute.xlu1 %2391 }
0x2ed5   :  { %v2387_v15 = vld [vmem:[#allocation3 + $0x8] sm:$0x1] }
0x2ed6   :  { %2388 = vst.msk [vmem:[#allocation4 + $0x1] sm:$0x1] %vm279_vm6, %v2387_v15 }
0x2ed7   :  { %2394 = vst.msk [vmem:[#allocation4 + $0x1] sm:$0x1] %vm2343_vm7, %v2392_v63  ;;  %v2398_v28 = vpop.permute.xlu1 %2397 }
0x2ed8   :  { %2400 = vst.msk [vmem:[#allocation4 + $0x1] sm:$0x1] %vm2350_vm8, %v2398_v28 }
0x2edb   :  { %v2404_v29 = vpop.permute.xlu1 %2403 }
0x2edc   :  { %2406 = vst.msk [vmem:[#allocation4 + $0x1] sm:$0x1] %vm2357_vm9, %v2404_v29 }
0x2edf   :  { %v2410_v30 = vpop.permute.xlu1 %2409 }
0x2ee0   :  { %2412 = vst.msk [vmem:[#allocation4 + $0x1] sm:$0x1] %vm2364_vm10, %v2410_v30 }
0x2ee3   :  { %v2416_v31 = vpop.permute.xlu1 %2415 }
0x2ee4   :  { %2418 = vst.msk [vmem:[#allocation4 + $0x1] sm:$0x1] %vm2371_vm11, %v2416_v31 }
0x2ee7   :  { %v2422_v39 = vpop.permute.xlu1 %2421 }
0x2ee8   :  { %2424 = vst.msk [vmem:[#allocation4 + $0x1] sm:$0x1] %vm2378_vm12, %v2422_v39 }
0x2f44   :  { %v2428_v19 = vpop.permute.xlu1 %2427 }
0x2f45   :  { %2430 = vst.msk [vmem:[#allocation4 + $0x1] sm:$0x1] %vm2385_vm13, %v2428_v19 }
0x2f4c   :  { %v2431_v32 = vld [vmem:[#allocation4] sm:$0x3] }
0x2f4d   :  { %2990 = vmatmul.mubr.f32.vlgmr.msra.gmra.mrb[14].mxu1 %v2431_v32 }
0x3020   :  { %v2521_v45 = vpop.f32.mrb[14].mxu1 }
0x3021   :  { %v2522_v36 = vadd.f32 %v2668_v61, %v2521_v45  ;;  %v2991_v37 = vpop.f32.mrb[15].mxu1 }
0x3023   :  { %3001 = vmatmul.mubr.msk.f32.vlgmr.msra.gmra.mrb[20].mxu0 %vm168_vm5, %v2522_v36 }
0x30f6   :  { %v2605_v24 = vpop.f32.mrb[20].mxu0 }
0x30f7   :  { %v2606_v42 = vadd.f32 %v2669_v40, %v2605_v24  ;;  %v3002_v43 = vpop.f32.mrb[21].mxu0 }
0x30f9   :  { %2610 = vst.msk [vmem:[%s3984_s9] sm:$0x3] %vm2609_vm14, %v2606_v42 }

</bundles_post_ra>
